<compile_context>
chip_gen: v7x
topology: tpu7x:2x2x1
jax: 0.10.0
libtpu: 0.0.40
codegen_flags: <defaults>
</compile_context>

<pallas_src>
import jax
import jax.numpy as jnp
from jax.experimental import pallas as pl
from jax.experimental.pallas import tpu as pltpu

N_CH = 4                              # n_channels
LATENT = 8                            # latent_dim
SPD_DIM = N_CH * (N_CH + 1) // 2      # 10
HEADS = 2 * LATENT                    # packed mu|logvar = 16
OUT_W = 128                           # lane-dense packed output width
EPS = 1e-6
EIG_FLOOR = 1e-12                     # clamp eigenvalues before log (f32 roundoff guard)


# ----------------------------------------------------------------------------
# Pallas kernel: fused encoder MLP + packed mu|logvar head + decoder MLP
# (eval mode; BatchNorm pre-folded into the adjacent Linear weights)
# ----------------------------------------------------------------------------
def _vae_mlp_kernel(h_ref,
                    w1_ref, b1_ref,
                    w2_ref, b2_ref,
                    whd_ref, bhd_ref,
                    wd2_ref, bd2_ref,
                    wd3_ref, bd3_ref,
                    out_ref):
    def leaky(v):                      # nn.LeakyReLU(0.2)
        return jnp.where(v >= 0, v, 0.2 * v)

    def mm(a, w_ref):
        # bf16 MXU operands, f32 accumulate; bias/activation math stays f32.
        return jnp.dot(a.astype(jnp.bfloat16), w_ref[...],
                       preferred_element_type=jnp.float32)

    x = h_ref[...]

    # Encoder: Linear(spd_dim,128) -> LeakyReLU      (Dropout = id in eval)
    h1 = leaky(mm(x, w1_ref) + b1_ref[...])
    #          Linear(128,64) [enc BN1 folded] -> LeakyReLU  (enc BN2 folded forward)
    h2 = leaky(mm(h1, w2_ref) + b2_ref[...])

    # One (64,80) matmul = fused [mu | logvar] heads (enc BN2 folded)  ++
    # decoder first layer precomposed with the mu head (eval-mode z = mu).
    hd = mm(h2, whd_ref) + bhd_ref[...]          # (tm, 80)
    heads = hd[:, :HEADS]                        # (tm, 16)  = mu | logvar
    g1 = leaky(hd[:, HEADS:])                    # (tm, 64)

    #          Linear(64,128) [dec BN1 folded] -> LeakyReLU
    g2 = leaky(mm(g1, wd2_ref) + bd2_ref[...])
    #          Linear(128, spd_dim) [dec BN2 folded]
    dec = mm(g2, wd3_ref) + bd3_ref[...]         # (tm, 10)

    # Single lane-dense (tm, 128) output slab: [heads | dec | zeros] -> unmasked vst.
    pad = jnp.zeros((heads.shape[0], OUT_W - HEADS - SPD_DIM), jnp.float32)
    out_ref[...] = jnp.concatenate([heads, dec, pad], axis=-1)


def mlp_pallas(h_p, fp, tm):
    """h_p: (Bp, SPD_DIM) padded batch, Bp % tm == 0, tm % 8 == 0."""
    Bp = h_p.shape[0]
    grid = (Bp // tm,)

    def row_spec(feat):
        return pl.BlockSpec((tm, feat), lambda i: (i, 0))

    def const_spec(arr):
        # TODO(synk): pipeline_mode=pl.Buffered(1) would drop the unused second
        #             buffer for these grid-invariant operands; left at the default
        #             to keep the lowering path conservative (~100 KB VMEM slack).
        return pl.BlockSpec(arr.shape, lambda i: (0, 0))

    args = (h_p,
            fp['w1'], fp['b1'],
            fp['w2f'], fp['b2f'],
            fp['whd'], fp['bhd'],
            fp['wd2f'], fp['bd2f'],
            fp['wd3f'], fp['bd3f'])
    in_specs = [row_spec(SPD_DIM)] + [const_spec(a) for a in args[1:]]

    return pl.pallas_call(
        _vae_mlp_kernel,
        out_shape=jax.ShapeDtypeStruct((Bp, OUT_W), jnp.float32),
        grid=grid,
        in_specs=in_specs,
        out_specs=row_spec(OUT_W),
        compiler_params=pltpu.CompilerParams(
            dimension_semantics=("parallel",)),
    )(*args)


# ----------------------------------------------------------------------------
# Plain-JAX glue: Riemannian mean, tangent-space log/exp maps (eigh-based)
# ----------------------------------------------------------------------------
def _eig_fun(M, fn):
    """f(M) for symmetric M via eigendecomposition."""
    w, V = jnp.linalg.eigh(M)
    return (V * fn(w)[None, :]) @ V.T


def _logm_spd(M):
    """logm for (near-)SPD symmetric M with eigenvalue clamping (NaN guard)."""
    w, V = jnp.linalg.eigh(M)
    w = jnp.maximum(w, EIG_FLOOR)
    return (V * jnp.log(w)[None, :]) @ V.T


def ensure_spd_jax(M, eps=EPS):
    # np.linalg.eigvalsh uses the *lower* triangle by default -> replicate that.
    Ml = jnp.tril(M) + jnp.tril(M, -1).T
    min_eig = jnp.min(jnp.linalg.eigvalsh(Ml))
    eye = jnp.eye(M.shape[0], dtype=M.dtype)
    return jnp.where(min_eig < eps, M + (eps - min_eig) * eye, M)


def mean_riemann_jax(X, tol=1e-8, max_iter=50):
    """Affine-invariant Riemannian (Karcher) mean with convergence early-exit.
    One eigh per iteration is shared between C^{1/2} and C^{-1/2}; the per-sample
    logms are a single batched (vmapped) eigh."""
    C0 = jnp.mean(X, axis=0)

    def cond(state):
        it, _, crit = state
        return jnp.logical_and(it < max_iter, crit > tol)

    def body(state):
        it, C, _ = state
        w, V = jnp.linalg.eigh(C)
        w = jnp.maximum(w, EIG_FLOOR)
        C_isq = (V * (1.0 / jnp.sqrt(w))[None, :]) @ V.T
        C_sq = (V * jnp.sqrt(w)[None, :]) @ V.T
        logs = jax.vmap(lambda A: _logm_spd(C_isq @ A @ C_isq))(X)
        J = jnp.mean(logs, axis=0)
        C_new = C_sq @ _eig_fun(J, jnp.exp) @ C_sq
        crit = jnp.linalg.norm(J)
        return it + 1, C_new, crit

    init = (jnp.int32(0), C0, jnp.array(jnp.inf, dtype=X.dtype))
    _, C, _ = jax.lax.while_loop(cond, body, init)
    return C


def to_tangent_space(x, ref, eps=EPS):
    """logm(inv(ref + eps*I) @ ensure_spd(x_i)), then upper-triangular vectorize
    (matches the torch reference: general logm, triu only, no sqrt(2) weighting)."""
    R = ref + eps * jnp.eye(N_CH, dtype=ref.dtype)
    w, V = jnp.linalg.eigh(R)                    # one eigh shared for R^{1/2}, R^{-1/2}
    w = jnp.maximum(w, EIG_FLOOR)
    R_isq = (V * (1.0 / jnp.sqrt(w))[None, :]) @ V.T
    R_sq = (V * jnp.sqrt(w)[None, :]) @ V.T

    def one(xi):
        xi = ensure_spd_jax(xi, eps)
        S = R_isq @ xi @ R_isq                   # SPD
        # logm(R^{-1} X) = R^{-1/2} logm(R^{-1/2} X R^{-1/2}) R^{1/2}  (exact)
        return R_isq @ _logm_spd(S) @ R_sq

    tang = jax.vmap(one)(x)
    iu = jnp.triu_indices(N_CH)
    return tang[:, iu[0], iu[1]]


def from_tangent_space(v, ref, eps=EPS):
    """unvectorize -> spd = ref @ expm(V + eps*I) -> ensure_spd  (as in the torch ref)."""
    iu = jnp.triu_indices(N_CH)

    def unvec(vi):
        M = jnp.zeros((N_CH, N_CH), dtype=v.dtype)
        M = M.at[iu[0], iu[1]].set(vi)
        M = M.at[iu[1], iu[0]].set(vi)
        return M

    Vm = jax.vmap(unvec)(v)
    eye = jnp.eye(N_CH, dtype=v.dtype)

    def one(Vi):
        spd = ref @ _eig_fun(Vi + eps * eye, jnp.exp)
        return ensure_spd_jax(spd, eps)

    return jax.vmap(one)(Vm)


# ----------------------------------------------------------------------------
# Deterministic parameter init (xavier_uniform weights, zero biases, default BN)
# ----------------------------------------------------------------------------
def init_params(seed=11):
    key = jax.random.PRNGKey(seed)
    keys = jax.random.split(key, 7)

    def xavier(k, fi, fo):
        bound = (6.0 / (fi + fo)) ** 0.5
        # torch stores (out,in); we store the transpose (in,out) for x @ W
        return jax.random.uniform(k, (fi, fo), jnp.float32, -bound, bound)

    def bn_fold(n):
        gamma = jnp.ones((1, n), jnp.float32)
        beta = jnp.zeros((1, n), jnp.float32)
        rm = jnp.zeros((1, n), jnp.float32)
        rv = jnp.ones((1, n), jnp.float32)
        scale = gamma / jnp.sqrt(rv + 1e-5)
        shift = beta - rm * scale
        return scale, shift

    p = {}
    p['w1'], p['b1'] = xavier(keys[0], SPD_DIM, 128), jnp.zeros((1, 128), jnp.float32)
    p['s1'], p['t1'] = bn_fold(128)
    p['w2'], p['b2'] = xavier(keys[1], 128, 64), jnp.zeros((1, 64), jnp.float32)
    p['s2'], p['t2'] = bn_fold(64)
    p['wmu'], p['bmu'] = xavier(keys[2], 64, LATENT), jnp.zeros((1, LATENT), jnp.float32)
    p['wlv'], p['blv'] = xavier(keys[3], 64, LATENT), jnp.zeros((1, LATENT), jnp.float32)
    p['d1'], p['db1'] = xavier(keys[4], LATENT, 64), jnp.zeros((1, 64), jnp.float32)
    p['ds1'], p['dt1'] = bn_fold(64)
    p['d2'], p['db2'] = xavier(keys[5], 64, 128), jnp.zeros((1, 128), jnp.float32)
    p['ds2'], p['dt2'] = bn_fold(128)
    p['d3'], p['db3'] = xavier(keys[6], 128, SPD_DIM), jnp.zeros((1, SPD_DIM), jnp.float32)
    return p


def fold_params(p):
    """Fold eval-mode BN into the following Linear, fuse mu|logvar heads, precompose
    the decoder's first layer with the mu head (eval-mode z = mu), merge both
    h2-consuming matmuls into one (64,80) weight, and cast weights to bf16."""
    def fold_into_next(scale, shift, w, b):
        # (x*scale + shift) @ w + b  ==  x @ (scale.T * w) + (shift @ w + b)
        return scale.T * w, shift @ w + b

    w2f, b2f = fold_into_next(p['s1'], p['t1'], p['w2'], p['b2'])          # enc BN1
    wmu_f, bmu_f = fold_into_next(p['s2'], p['t2'], p['wmu'], p['bmu'])    # enc BN2
    wlv_f, blv_f = fold_into_next(p['s2'], p['t2'], p['wlv'], p['blv'])

    whf = jnp.concatenate([wmu_f, wlv_f], axis=1)                          # (64, 16)
    bhf = jnp.concatenate([bmu_f, blv_f], axis=1)                          # (1, 16)

    wd1c = wmu_f @ p['d1']                                                 # (64, 64)
    bd1c = bmu_f @ p['d1'] + p['db1']                                      # (1, 64)

    # Merge heads + decoder-layer-1 into a single MXU pass over h2.
    whd = jnp.concatenate([whf, wd1c], axis=1)                             # (64, 80)
    bhd = jnp.concatenate([bhf, bd1c], axis=1)                             # (1, 80)

    wd2f, bd2f = fold_into_next(p['ds1'], p['dt1'], p['d2'], p['db2'])     # dec BN1
    wd3f, bd3f = fold_into_next(p['ds2'], p['dt2'], p['d3'], p['db3'])     # dec BN2

    bf16 = jnp.bfloat16
    return dict(w1=p['w1'].astype(bf16), b1=p['b1'],
                w2f=w2f.astype(bf16), b2f=b2f,
                whd=whd.astype(bf16), bhd=bhd,
                wd2f=wd2f.astype(bf16), bd2f=bd2f,
                wd3f=wd3f.astype(bf16), bd3f=bd3f)


# ----------------------------------------------------------------------------
# Full forward pass: recon (B,C,C), mu (B,L), logvar (B,L)
# ----------------------------------------------------------------------------
def _tile_size(B):
    """Batch tiling:
       * tiny batches : one block (padded to a multiple of 8 sublanes)
       * mid batches  : exactly 2 blocks so v7x's two TensorCores both get work
       * large batches: 2048-row tiles (amortizes ~0.35 us per-grid-step overhead;
         activations are a few MiB -> far under even v7x's 64 MiB VMEM)."""
    cap = 2048
    if B <= 16:
        tm = max(8, ((B + 7) // 8) * 8)
        return tm, tm
    if B <= 2 * cap:
        tm = (((B + 1) // 2) + 7) // 8 * 8
        return tm, 2 * tm
    tm = cap
    return tm, ((B + tm - 1) // tm) * tm


def vae_forward(x, folded_params):
    x = x.astype(jnp.float32)
    B = x.shape[0]

    ref = mean_riemann_jax(x)                    # set_reference_point (Riemannian mean)
    h = to_tangent_space(x, ref)                 # (B, SPD_DIM)

    tm, Bp = _tile_size(B)
    h_p = jnp.zeros((Bp, SPD_DIM), jnp.float32).at[:B].set(h)

    out_p = mlp_pallas(h_p, folded_params, tm)   # (Bp, 128) packed [mu|logvar|dec|0]
    mu = out_p[:B, :LATENT]
    logvar = out_p[:B, LATENT:HEADS]
    dec = out_p[:B, HEADS:HEADS + SPD_DIM]

    recon = from_tangent_space(dec, ref)         # (B, C, C)
    return recon, mu, logvar


if __name__ == "__main__":
    key = jax.random.PRNGKey(0)
    B = 2
    A = jax.random.normal(key, (B, N_CH, N_CH), jnp.float32)
    # deterministic SPD inputs
    x = jnp.einsum('bij,bkj->bik', A, A) + 0.5 * jnp.eye(N_CH, dtype=jnp.float32)

    params = fold_params(init_params(seed=11))
    recon, mu, logvar = jax.jit(vae_forward)(x, params)
    jax.block_until_ready((recon, mu, logvar))

    assert recon.shape == (B, N_CH, N_CH)
    assert mu.shape == (B, LATENT)
    assert logvar.shape == (B, LATENT)
    assert bool(jnp.all(jnp.isfinite(recon))) and bool(jnp.all(jnp.isfinite(mu)))
    assert bool(jnp.all(jnp.isfinite(logvar)))
    print("KERNEL_OK")
</pallas_src>

<mosaic_0001>
module attributes {stable_mosaic.version = 11 : i64} {
  func.func private @main(%arg0: i32) attributes {dimension_semantics = [#tpu.dimension_semantics<core_parallel>], iteration_bounds = array<i64: 2>, tpu.core_type = #tpu.core_type<sc_scalar_subcore>, window_params = []} {
    return
  }
}

module attributes {stable_mosaic.version = 11 : i64} {
  func.func private @main(%arg0: i32) attributes {dimension_semantics = [#tpu.dimension_semantics<core_parallel>], iteration_bounds = array<i64: 2>, tpu.core_type = #tpu.core_type<sc_scalar_subcore>, window_params = []} {
    return
  }
}

module attributes {stable_mosaic.version = 11 : i64} {
  func.func @_vae_mlp_kernel(%arg0: i32, %arg1: memref<8x10xf32, #tpu.memory_space<vmem>>, %arg2: memref<10x128xbf16, #tpu.memory_space<vmem>>, %arg3: memref<1x128xf32, #tpu.memory_space<vmem>>, %arg4: memref<128x64xbf16, #tpu.memory_space<vmem>>, %arg5: memref<1x64xf32, #tpu.memory_space<vmem>>, %arg6: memref<64x80xbf16, #tpu.memory_space<vmem>>, %arg7: memref<1x80xf32, #tpu.memory_space<vmem>>, %arg8: memref<64x128xbf16, #tpu.memory_space<vmem>>, %arg9: memref<1x128xf32, #tpu.memory_space<vmem>>, %arg10: memref<128x10xbf16, #tpu.memory_space<vmem>>, %arg11: memref<1x10xf32, #tpu.memory_space<vmem>>, %arg12: memref<8x128xf32, #tpu.memory_space<vmem>>) attributes {dimension_semantics = [#tpu.dimension_semantics<parallel>], iteration_bounds = array<i64: 1>, scalar_prefetch = 0 : i64, scratch_operands = 0 : i64, tpu.core_type = #tpu.core_type<tc>, window_params = [{transform_indices = @transform_0, window_bounds = array<i64: 8, 10>}, {pipeline_mode = #tpu.pipeline_mode<synchronous>, transform_indices = @transform_1, window_bounds = array<i64: 10, 128>}, {pipeline_mode = #tpu.pipeline_mode<synchronous>, transform_indices = @transform_2, window_bounds = array<i64: 1, 128>}, {pipeline_mode = #tpu.pipeline_mode<synchronous>, transform_indices = @transform_3, window_bounds = array<i64: 128, 64>}, {pipeline_mode = #tpu.pipeline_mode<synchronous>, transform_indices = @transform_4, window_bounds = array<i64: 1, 64>}, {pipeline_mode = #tpu.pipeline_mode<synchronous>, transform_indices = @transform_5, window_bounds = array<i64: 64, 80>}, {pipeline_mode = #tpu.pipeline_mode<synchronous>, transform_indices = @transform_6, window_bounds = array<i64: 1, 80>}, {pipeline_mode = #tpu.pipeline_mode<synchronous>, transform_indices = @transform_7, window_bounds = array<i64: 64, 128>}, {pipeline_mode = #tpu.pipeline_mode<synchronous>, transform_indices = @transform_8, window_bounds = array<i64: 1, 128>}, {pipeline_mode = #tpu.pipeline_mode<synchronous>, transform_indices = @transform_9, window_bounds = array<i64: 128, 10>}, {pipeline_mode = #tpu.pipeline_mode<synchronous>, transform_indices = @transform_10, window_bounds = array<i64: 1, 10>}, {transform_indices = @transform_11, window_bounds = array<i64: 8, 128>}]} {
    %c0 = arith.constant 0 : index
    %c0_0 = arith.constant 0 : index
    %0 = vector.load %arg1[%c0, %c0_0] : memref<8x10xf32, #tpu.memory_space<vmem>>, vector<8x10xf32>
    %1 = arith.truncf %0 : vector<8x10xf32> to vector<8x10xbf16>
    %c0_1 = arith.constant 0 : index
    %c0_2 = arith.constant 0 : index
    %2 = vector.load %arg2[%c0_1, %c0_2] : memref<10x128xbf16, #tpu.memory_space<vmem>>, vector<10x128xbf16>
    %cst = arith.constant dense<0.000000e+00> : vector<8x128xf32>
    %3 = tpu.matmul %1, %2, %cst {dimension_numbers = #tpu.dot_dimension_numbers<[1], [0], [0], [1], [0, 0, 1, 1], [], []>} : vector<8x10xbf16>, vector<10x128xbf16>, vector<8x128xf32> -> vector<8x128xf32>
    %c0_3 = arith.constant 0 : index
    %c0_4 = arith.constant 0 : index
    %4 = vector.load %arg3[%c0_3, %c0_4] : memref<1x128xf32, #tpu.memory_space<vmem>>, vector<1x128xf32>
    %5 = vector.broadcast %4 : vector<1x128xf32> to vector<8x128xf32>
    %6 = arith.addf %3, %5 : vector<8x128xf32>
    %cst_5 = arith.constant 0.000000e+00 : f32
    %7 = vector.broadcast %cst_5 : f32 to vector<8x128xf32>
    %8 = arith.cmpf oge, %6, %7 : vector<8x128xf32>
    %cst_6 = arith.constant 2.000000e-01 : f32
    %9 = vector.broadcast %cst_6 : f32 to vector<8x128xf32>
    %10 = arith.mulf %9, %6 : vector<8x128xf32>
    %11 = arith.select %8, %6, %10 : vector<8x128xi1>, vector<8x128xf32>
    %12 = arith.truncf %11 : vector<8x128xf32> to vector<8x128xbf16>
    %c0_7 = arith.constant 0 : index
    %c0_8 = arith.constant 0 : index
    %13 = vector.load %arg4[%c0_7, %c0_8] : memref<128x64xbf16, #tpu.memory_space<vmem>>, vector<128x64xbf16>
    %cst_9 = arith.constant dense<0.000000e+00> : vector<8x64xf32>
    %14 = tpu.matmul %12, %13, %cst_9 {dimension_numbers = #tpu.dot_dimension_numbers<[1], [0], [0], [1], [0, 0, 1, 1], [], []>} : vector<8x128xbf16>, vector<128x64xbf16>, vector<8x64xf32> -> vector<8x64xf32>
    %c0_10 = arith.constant 0 : index
    %c0_11 = arith.constant 0 : index
    %15 = vector.load %arg5[%c0_10, %c0_11] : memref<1x64xf32, #tpu.memory_space<vmem>>, vector<1x64xf32>
    %16 = vector.broadcast %15 : vector<1x64xf32> to vector<8x64xf32>
    %17 = arith.addf %14, %16 : vector<8x64xf32>
    %cst_12 = arith.constant 0.000000e+00 : f32
    %18 = vector.broadcast %cst_12 : f32 to vector<8x64xf32>
    %19 = arith.cmpf oge, %17, %18 : vector<8x64xf32>
    %cst_13 = arith.constant 2.000000e-01 : f32
    %20 = vector.broadcast %cst_13 : f32 to vector<8x64xf32>
    %21 = arith.mulf %20, %17 : vector<8x64xf32>
    %22 = arith.select %19, %17, %21 : vector<8x64xi1>, vector<8x64xf32>
    %23 = arith.truncf %22 : vector<8x64xf32> to vector<8x64xbf16>
    %c0_14 = arith.constant 0 : index
    %c0_15 = arith.constant 0 : index
    %24 = vector.load %arg6[%c0_14, %c0_15] : memref<64x80xbf16, #tpu.memory_space<vmem>>, vector<64x80xbf16>
    %cst_16 = arith.constant dense<0.000000e+00> : vector<8x80xf32>
    %25 = tpu.matmul %23, %24, %cst_16 {dimension_numbers = #tpu.dot_dimension_numbers<[1], [0], [0], [1], [0, 0, 1, 1], [], []>} : vector<8x64xbf16>, vector<64x80xbf16>, vector<8x80xf32> -> vector<8x80xf32>
    %c0_17 = arith.constant 0 : index
    %c0_18 = arith.constant 0 : index
    %26 = vector.load %arg7[%c0_17, %c0_18] : memref<1x80xf32, #tpu.memory_space<vmem>>, vector<1x80xf32>
    %27 = vector.broadcast %26 : vector<1x80xf32> to vector<8x80xf32>
    %28 = arith.addf %25, %27 : vector<8x80xf32>
    %29 = vector.extract_strided_slice %28 {offsets = [0, 0], sizes = [8, 16], strides = [1, 1]} : vector<8x80xf32> to vector<8x16xf32>
    %30 = vector.extract_strided_slice %28 {offsets = [0, 16], sizes = [8, 64], strides = [1, 1]} : vector<8x80xf32> to vector<8x64xf32>
    %cst_19 = arith.constant 0.000000e+00 : f32
    %31 = vector.broadcast %cst_19 : f32 to vector<8x64xf32>
    %32 = arith.cmpf oge, %30, %31 : vector<8x64xf32>
    %cst_20 = arith.constant 2.000000e-01 : f32
    %33 = vector.broadcast %cst_20 : f32 to vector<8x64xf32>
    %34 = arith.mulf %33, %30 : vector<8x64xf32>
    %35 = arith.select %32, %30, %34 : vector<8x64xi1>, vector<8x64xf32>
    %36 = arith.truncf %35 : vector<8x64xf32> to vector<8x64xbf16>
    %c0_21 = arith.constant 0 : index
    %c0_22 = arith.constant 0 : index
    %37 = vector.load %arg8[%c0_21, %c0_22] : memref<64x128xbf16, #tpu.memory_space<vmem>>, vector<64x128xbf16>
    %cst_23 = arith.constant dense<0.000000e+00> : vector<8x128xf32>
    %38 = tpu.matmul %36, %37, %cst_23 {dimension_numbers = #tpu.dot_dimension_numbers<[1], [0], [0], [1], [0, 0, 1, 1], [], []>} : vector<8x64xbf16>, vector<64x128xbf16>, vector<8x128xf32> -> vector<8x128xf32>
    %c0_24 = arith.constant 0 : index
    %c0_25 = arith.constant 0 : index
    %39 = vector.load %arg9[%c0_24, %c0_25] : memref<1x128xf32, #tpu.memory_space<vmem>>, vector<1x128xf32>
    %40 = vector.broadcast %39 : vector<1x128xf32> to vector<8x128xf32>
    %41 = arith.addf %38, %40 : vector<8x128xf32>
    %cst_26 = arith.constant 0.000000e+00 : f32
    %42 = vector.broadcast %cst_26 : f32 to vector<8x128xf32>
    %43 = arith.cmpf oge, %41, %42 : vector<8x128xf32>
    %cst_27 = arith.constant 2.000000e-01 : f32
    %44 = vector.broadcast %cst_27 : f32 to vector<8x128xf32>
    %45 = arith.mulf %44, %41 : vector<8x128xf32>
    %46 = arith.select %43, %41, %45 : vector<8x128xi1>, vector<8x128xf32>
    %47 = arith.truncf %46 : vector<8x128xf32> to vector<8x128xbf16>
    %c0_28 = arith.constant 0 : index
    %c0_29 = arith.constant 0 : index
    %48 = vector.load %arg10[%c0_28, %c0_29] : memref<128x10xbf16, #tpu.memory_space<vmem>>, vector<128x10xbf16>
    %cst_30 = arith.constant dense<0.000000e+00> : vector<8x10xf32>
    %49 = tpu.matmul %47, %48, %cst_30 {dimension_numbers = #tpu.dot_dimension_numbers<[1], [0], [0], [1], [0, 0, 1, 1], [], []>} : vector<8x128xbf16>, vector<128x10xbf16>, vector<8x10xf32> -> vector<8x10xf32>
    %c0_31 = arith.constant 0 : index
    %c0_32 = arith.constant 0 : index
    %50 = vector.load %arg11[%c0_31, %c0_32] : memref<1x10xf32, #tpu.memory_space<vmem>>, vector<1x10xf32>
    %51 = vector.broadcast %50 : vector<1x10xf32> to vector<8x10xf32>
    %52 = arith.addf %49, %51 : vector<8x10xf32>
    %cst_33 = arith.constant 0.000000e+00 : f32
    %53 = vector.broadcast %cst_33 : f32 to vector<8x102xf32>
    %54 = tpu.concatenate %29, %52, %53 in 1 : vector<8x16xf32>, vector<8x10xf32>, vector<8x102xf32> -> vector<8x128xf32>
    %c0_34 = arith.constant 0 : index
    %c0_35 = arith.constant 0 : index
    %55 = vector.load %arg12[%c0_34, %c0_35] : memref<8x128xf32, #tpu.memory_space<vmem>>, vector<8x128xf32>
    tpu.vector_store %arg12[%c0_34, %c0_35], %54 {strides = array<i32>} : memref<8x128xf32, #tpu.memory_space<vmem>>, vector<8x128xf32>,
    return
  }
  func.func @transform_0(%arg0: i32) -> (i32, i32) {
    %c0_i32 = arith.constant 0 : i32
    %c0_i32_0 = arith.constant 0 : i32
    return %arg0, %c0_i32 : i32, i32
  }
  func.func @transform_1(%arg0: i32) -> (i32, i32) {
    %c0_i32 = arith.constant 0 : i32
    %c0_i32_0 = arith.constant 0 : i32
    %c0_i32_1 = arith.constant 0 : i32
    return %c0_i32, %c0_i32_0 : i32, i32
  }
  func.func @transform_2(%arg0: i32) -> (i32, i32) {
    %c0_i32 = arith.constant 0 : i32
    %c0_i32_0 = arith.constant 0 : i32
    %c0_i32_1 = arith.constant 0 : i32
    return %c0_i32, %c0_i32_0 : i32, i32
  }
  func.func @transform_3(%arg0: i32) -> (i32, i32) {
    %c0_i32 = arith.constant 0 : i32
    %c0_i32_0 = arith.constant 0 : i32
    %c0_i32_1 = arith.constant 0 : i32
    return %c0_i32, %c0_i32_0 : i32, i32
  }
  func.func @transform_4(%arg0: i32) -> (i32, i32) {
    %c0_i32 = arith.constant 0 : i32
    %c0_i32_0 = arith.constant 0 : i32
    %c0_i32_1 = arith.constant 0 : i32
    return %c0_i32, %c0_i32_0 : i32, i32
  }
  func.func @transform_5(%arg0: i32) -> (i32, i32) {
    %c0_i32 = arith.constant 0 : i32
    %c0_i32_0 = arith.constant 0 : i32
    %c0_i32_1 = arith.constant 0 : i32
    return %c0_i32, %c0_i32_0 : i32, i32
  }
  func.func @transform_6(%arg0: i32) -> (i32, i32) {
    %c0_i32 = arith.constant 0 : i32
    %c0_i32_0 = arith.constant 0 : i32
    %c0_i32_1 = arith.constant 0 : i32
    return %c0_i32, %c0_i32_0 : i32, i32
  }
  func.func @transform_7(%arg0: i32) -> (i32, i32) {
    %c0_i32 = arith.constant 0 : i32
    %c0_i32_0 = arith.constant 0 : i32
    %c0_i32_1 = arith.constant 0 : i32
    return %c0_i32, %c0_i32_0 : i32, i32
  }
  func.func @transform_8(%arg0: i32) -> (i32, i32) {
    %c0_i32 = arith.constant 0 : i32
    %c0_i32_0 = arith.constant 0 : i32
    %c0_i32_1 = arith.constant 0 : i32
    return %c0_i32, %c0_i32_0 : i32, i32
  }
  func.func @transform_9(%arg0: i32) -> (i32, i32) {
    %c0_i32 = arith.constant 0 : i32
    %c0_i32_0 = arith.constant 0 : i32
    %c0_i32_1 = arith.constant 0 : i32
    return %c0_i32, %c0_i32_0 : i32, i32
  }
  func.func @transform_10(%arg0: i32) -> (i32, i32) {
    %c0_i32 = arith.constant 0 : i32
    %c0_i32_0 = arith.constant 0 : i32
    %c0_i32_1 = arith.constant 0 : i32
    return %c0_i32, %c0_i32_0 : i32, i32
  }
  func.func @transform_11(%arg0: i32) -> (i32, i32) {
    %c0_i32 = arith.constant 0 : i32
    %c0_i32_0 = arith.constant 0 : i32
    return %arg0, %c0_i32 : i32, i32
  }
}

</mosaic_0001>

<bundles_post_ra>
// kernel: custom-call.18
= control target key start
LH: loop header
LB: loop body
LE: loop exit
PB: predicated region body
PF: predicated region fallthrough
CT: control target
= control target key end

     0   :  { %s2160_s0 = inlined_call_operand.vmem [shape: f32[2,2,2], index: 0, kind: input, shape index: {}]   ;;  %s2161_s1 = inlined_call_operand.vmem [shape: f32[2,2,2], index: 1, kind: input, shape index: {}]   ;;  %s2162_s2 = inlined_call_operand.vmem [shape: f32[2,2,2], index: 2, kind: input, shape index: {}]   ;;  %s2163_s3 = inlined_call_operand.vmem [shape: f32[2,2,2], index: 3, kind: input, shape index: {}]   ;;  %s2164_s4 = inlined_call_operand.vmem [shape: f32[2,2], index: 4, kind: output, shape index: {0}]   ;;  %s2165_s5 = inlined_call_operand.vmem [shape: f32[2,2], index: 5, kind: output, shape index: {1}]   ;;  %s2166_s6 = inlined_call_operand.hbm [shape: f32[2,2,2], index: 6, kind: output, shape index: {2}]   ;;  %s2167_s7 = inlined_call_operand.hbm [shape: f32[2,2,2], index: 7, kind: output, shape index: {3}]   ;;  %s2168_s8 = inlined_call_operand.hbm [shape: f32[2,2,2], index: 8, kind: output, shape index: {4}]   ;;  %s2169_s9 = inlined_call_operand.hbm [shape: f32[2,2,2], index: 9, kind: output, shape index: {5}]  }
   0x1   :  { %2170 = sst [smem:[#allocation40_spill]] %s2160_s0 }
   0x2   :  { %2171 = sst [smem:[#allocation41_spill]] %s2161_s1 }
   0x3   :  { %11 = vsyncpa [#allocation14], 0 }
   0x4   :  { %13 = vsyncpa [#allocation14 + $0x1], 0 }
   0x5   :  { %14 = vsyncpa [#allocation17], 0 }
   0x6   :  { %16 = vsyncpa [#allocation17 + $0x1], 0 }
   0x7   :  { %17 = vsyncpa [#allocation22], 0 }
   0x8   :  { %19 = vsyncpa [#allocation22 + $0x1], 0  ;;  %s1759_s30 = smov 0   ;;  %s1761_s10 = smov 0  }
   0x9   :  { %s1763_s11 = smov 0  }
   0xa LB: > { %s1775_s12 = sadd.s32 4294967295, %s1692_s11   ;;  %s1779_s14 = sadd.s32 1, %s1692_s11   ;;  %s1692_s11 = sphi %s1763_s11, %s2193_s11   ;;  %s1688_s10 = sphi %s1761_s10, %s2192_s10   ;;  %s1684_s30 = sphi %s1759_s30, %s2191_s30  }
   0xb   : > { %s29_s15 = sshrl.u32 %s1692_s11, 3  ;;  %s30_s16 = sshrl.u32 %s1779_s14, 3 }
   0xc   : > { %s34_s17 = sadd.s32 1, %s1688_s10  ;;  %s31_s18 = ssub.s32 %s29_s15, %s30_s16 }
   0xd   : > { %p44_p0 = scmp.ne.s32.totalorder %s1688_s10, %s1684_s30  ;;  %p32_p1 = scmp.eq.s32.totalorder %s31_s18, 0 }
   0xe   : > { %p45_p2 = scmp.eq.s32.totalorder %s1775_s12, 1  ;;  %p1440_p4 = scmp.ge.s32.totalorder %s1692_s11, 2 }
   0xf   : > { %s1788_s19 = scalar_select %p32_p1, %s1688_s10, %s34_s17  }
  0x10   : > { %p1790_p3 = por %p45_p2, %p44_p0  ;;  %95 = sbr.rel (%p1440_p4) target bundleno = 29 (0x1d), region = 16 }
  0x11   : > { %2172 = sst [smem:[#allocation39_spill]] %s1788_s19  ;;  %s97_s21 = sand.u32 (!%p1440_p4), 1, %s1692_s11  }
  0x12   : > { %s1442_s22 = sshll.u32 (!%p1440_p4), %s1692_s11, 1  ;;  %s1441_s23 = sshll.u32 (!%p1440_p4), %s97_s21, 1 }
  0x13   : > { %s2174_s0 = sld [smem:[#allocation40_spill]] (!%p1440_p4)  ;;  %s99_s27 = scalar_lea.vmem (!%p1440_p4), [#allocation1], %s1441_s23 }
  0x14   : > { %s2175_s1 = sld [smem:[#allocation41_spill]] (!%p1440_p4)  ;;  %s175_s18 = scalar_lea.vmem (!%p1440_p4), %s2162_s2, %s1442_s22 }
  0x15   : > { %s136_s13 = scalar_lea.vmem (!%p1440_p4), [#allocation3], %s1441_s23  ;;  %v191_v2 = vld [vmem:[%s175_s18] sm:$0x3] (!%p1440_p4)  ;;  %s212_s24 = scalar_lea.vmem (!%p1440_p4), %s2163_s3, %s1442_s22 }
  0x16   : > { %s173_s25 = scalar_lea.vmem (!%p1440_p4), [#allocation5], %s1441_s23  ;;  %v228_v3 = vld [vmem:[%s212_s24] sm:$0x3] (!%p1440_p4) }
  0x17   : > { %192 = vst [vmem:[%s173_s25] sm:$0x3] %v191_v2 }
  0x19   : > { %s101_s26 = scalar_lea.vmem %s2174_s0, %s1442_s22 }
  0x1a   : > { %v117_v0 = vld [vmem:[%s101_s26] sm:$0x3]  ;;  %s138_s15 = scalar_lea.vmem %s2175_s1, %s1442_s22  ;;  %s210_s26 = scalar_lea.vmem [#allocation7], %s1441_s23 }
  0x1b   : > { %118 = vst [vmem:[%s99_s27] sm:$0x3] %v117_v0  ;;  %v154_v1 = vld [vmem:[%s138_s15] sm:$0x3]  ;;  %229 = vst [vmem:[%s210_s26] sm:$0x3] %v228_v3 }
  0x1c   : > { %155 = vst [vmem:[%s136_s13] sm:$0x3] %v154_v1 }
  0x1d PF: > { %p1449_p5 = scmp.ge.s32.totalorder %s1692_s11, 1  ;;  %p245_p6 = scmp.lt.s32.totalorder %s1692_s11, 3 }
  0x1f   : > { %p246_p7 = pnand %p1449_p5, %p245_p6 }
  0x21   : > { %249 = sbr.rel (%p246_p7) target bundleno = 1100 (0x44c), region = 140 }
  0x28   : > { %s1814_s13 = sand.u32 1, %s1775_s12   ;;  %s286_s27 = sand.u32 1, %s1684_s30   ;;  %v350_v4 = vlaneseq  ;;  %v1702_v5 = vmov 0.0  }
  0x29   : > { %s1818_s19 = sshll.u32 %s1814_s13, 1  ;;  %s1820_s22 = sshll.u32 %s286_s27, 1  ;;  %345 = vst [vmem:[#allocation12] sm:$0xff] %v1702_v5  ;;  %346 = vst [vmem:[#allocation15] sm:$0xff] %v1702_v5 }
  0x2a   : > { %347 = vst [vmem:[#allocation18] sm:$0xff] %v1702_v5  ;;  %348 = vst [vmem:[#allocation20] sm:$0xff] %v1702_v5  ;;  %v1822_v6 = vand.u32 127, %v350_v4  ;;  %v1824_v7 = vshrl.u32 %v350_v4, 7  ;;  %s270_s23 = scalar_lea.vmem [#allocation1], %s1818_s19  ;;  %s274_s30 = scalar_lea.vmem [#allocation3], %s1818_s19 }
  0x2b   : > { %v317_v8 = vld [vmem:[%s270_s23] sm:$0x3]  ;;  %v321_v9 = vld [vmem:[%s274_s30] sm:$0x3]  ;;  %s278_s28 = scalar_lea.vmem [#allocation5], %s1818_s19  ;;  %s282_s29 = scalar_lea.vmem [#allocation7], %s1818_s19 }
  0x2c   : > { %318 = vst [vmem:[#allocation0] sm:$0x3] %v317_v8  ;;  %322 = vst [vmem:[#allocation2] sm:$0x3] %v321_v9  ;;  %v325_v10 = vld [vmem:[%s278_s28] sm:$0x3]  ;;  %v352_v6 = vmov %v1822_v6  ;;  %v355_v7 = vmov %v1824_v7 }
  0x2d   : > { %v329_v11 = vld [vmem:[%s282_s29] sm:$0x3]  ;;  %326 = vst [vmem:[#allocation4] sm:$0x3] %v325_v10  ;;  %v365_v6 = vmov %v1822_v6  ;;  %v368_v7 = vmov %v1824_v7  ;;  %s333_s15 = smov [#allocation23]  ;;  %s336_s16 = smov [#allocation24]  ;;  %vm359_vm0 = vcmp.eq.s32.totalorder %v355_v7, %v352_v6 }
  0x2e   : > { %330 = vst [vmem:[#allocation6] sm:$0x3] %v329_v11  ;;  %vm372_vm1 = vcmp.eq.s32.totalorder %v368_v7, %v365_v6  ;;  %s349_s17 = smov [#allocation12]  ;;  %s362_s18 = smov [#allocation20]  ;;  %vm1329_vm2 = vcmp.lt.s32.totalorder %v1822_v6, 2  ;;  %v1321_v6 = vmov %v1822_v6  ;;  %v1324_v7 = vmov %v1824_v7 }
  0x2f   : > { %s339_s21 = smov [#allocation25]  ;;  %s342_s24 = smov [#allocation26]  ;;  %vm1334_vm3 = vcmp.eq.s32.totalorder %v1324_v7, %v1321_v6  ;;  %v1372_v6 = vmov %v1822_v6  ;;  %v1341_v7 = vmov %v1824_v7 }
  0x30   : > { %v356_v12 = vld [vmem:[%s349_s17] sm:$0x3]  ;;  %s1325_s29 = smov [#allocation23]  ;;  %s1342_s0 = smov [#allocation24]  ;;  %v1338_v6 = vmov %v1822_v6  ;;  %v1375_v7 = vmov %v1824_v7 }
  0x31   : > { %v369_v13 = vld [vmem:[%s362_s18] sm:$0x3]  ;;  %v360_v16 = vsel %vm359_vm0, 1.0, %v356_v12  ;;  %v1355_v6 = vmov %v1822_v6  ;;  %v1358_v7 = vmov %v1824_v7  ;;  %vm1385_vm4 = vcmp.eq.s32.totalorder %v1375_v7, %v1372_v6 }
  0x32   : > { %v373_v17 = vsel %vm372_vm1, 1.0, %v369_v13  ;;  %361 = vst [vmem:[%s349_s17] sm:$0x3] %v360_v16 }
  0x33   : > { %v334_v14 = vld [vmem:[#allocation0] sm:$0xff]  ;;  %v337_v15 = vld [vmem:[#allocation2] sm:$0xff]  ;;  %374 = vst [vmem:[%s362_s18] sm:$0x3] %v373_v17 }
  0x34   : > { %335 = vst [vmem:[%s333_s15] sm:$0xff] %v334_v14  ;;  %338 = vst [vmem:[%s336_s16] sm:$0xff] %v337_v15  ;;  %v340_v18 = vld [vmem:[#allocation4] sm:$0xff]  ;;  %s1359_s15 = smov [#allocation25]  ;;  %s1376_s16 = smov [#allocation26] }
  0x35   : > { %v343_v19 = vld [vmem:[#allocation6] sm:$0xff]  ;;  %341 = vst [vmem:[%s339_s21] sm:$0xff] %v340_v18 }
  0x36   : > { %344 = vst [vmem:[%s342_s24] sm:$0xff] %v343_v19 }
  0x3b   : > { %v1331_v20 = vld [vmem:[%s1325_s29] sm:$0x3] }
  0x3c   : > { %v1348_v21 = vld [vmem:[%s1342_s0] sm:$0x3]  ;;  %v1332_v22 = vsel %vm1329_vm2, %v1331_v20, 0.0 }
  0x3d   : > { %v1349_v23 = vsel %vm1329_vm2, %v1348_v21, 0.0  ;;  %v1365_v24 = vld [vmem:[%s1359_s15] sm:$0x3]  ;;  %v1333_v26 = vmul.f32 %v1332_v22, %v1332_v22 }
  0x3e   : > { %v1382_v25 = vld [vmem:[%s1376_s16] sm:$0x3]  ;;  %v1350_v27 = vmul.f32 %v1349_v23, %v1349_v23  ;;  %v1366_v28 = vsel %vm1329_vm2, %v1365_v24, 0.0 }
  0x3f   : > { %v1383_v29 = vsel %vm1329_vm2, %v1382_v25, 0.0  ;;  %v1367_v30 = vmul.f32 %v1366_v28, %v1366_v28  ;;  %v1335_v33 = vsel %vm1334_vm3, 0.0, %v1333_v26 }
  0x40   : > { %v1352_v31 = vadd.f32 %v1350_v27, %v1333_v26  ;;  %v1384_v32 = vmul.f32 %v1383_v29, %v1383_v29  ;;  %v1351_v34 = vadd.f32 %v1350_v27, %v1335_v33 }
  0x42   : > { %v1369_v35 = vadd.f32 %v1367_v30, %v1352_v31  ;;  %v1368_v36 = vadd.f32 %v1367_v30, %v1351_v34  ;;  %v1386_v37 = vsel %vm1385_vm4, 0.0, %v1384_v32 }
  0x44   : > { %v1388_v38 = vadd.f32 %v1384_v32, %v1369_v35  ;;  %v1387_v39 = vadd.f32 %v1386_v37, %v1368_v36 }
  0x46   : > { %1389 = vadd.xlane.f32.xlu0 %v1388_v38 }
  0x4a   : > { %1397 = vadd.xlane.f32.xlu0 %v1387_v39 }
  0xd3   : > { %v1390_v40 = vpop.xlane.xlu0 %1389 }
  0xd4   : > { %v1391_v41 = vrot.slane %v1390_v40, 4 }
  0xd6   : > { %v1392_v42 = vadd.f32 %v1391_v41, %v1390_v40 }
  0xd7   : > { %v1398_v43 = vpop.xlane.xlu0 %1397 }
  0xd8   : > { %v1393_v44 = vrot.slane %v1392_v42, 2  ;;  %v1399_v45 = vrot.slane %v1398_v43, 4 }
  0xda   : > { %v1400_v46 = vadd.f32 %v1399_v45, %v1398_v43  ;;  %v1394_v47 = vadd.f32 %v1393_v44, %v1392_v42 }
  0xdc   : > { %v1401_v48 = vrot.slane %v1400_v46, 2  ;;  %v1395_v50 = vrot.slane %v1394_v47, 1 }
  0xde   : > { %v1402_v49 = vadd.f32 %v1401_v48, %v1400_v46  ;;  %v1396_v53 = vadd.f32 %v1395_v50, %v1394_v47 }
  0xe0   : > { %v1403_v51 = vrot.slane %v1402_v49, 1 }
  0xe2   : > { %v1404_v52 = vadd.f32 %v1403_v51, %v1402_v49 }
  0xe4   : > { %1490 = vpush %v1404_v52 }
  0xe5   : > { %1492 = vpush %v1396_v53 }
 0x115   : > { %s1491_s0 = spop %1490 }
 0x116   : > { %s1493_s17 = spop %1492 }
 0x117   : > { %s1407_s18 = smul.f32 1e-10, %s1493_s17 }
 0x119   : > { %p1408_p8 = scmp.le.f32.partialorder %s1491_s0, %s1407_s18 }
 0x11a   : > { %s1858_s21 = smov (!%p1408_p8), 0  }
 0x11b   : > { %1411 = sbr.rel (%p1408_p8) target bundleno = 965 (0x3c5), region = 349 }
 0x122 LB: >> { %s1863_s24 = smov 0   ;;  %s1696_s21 = sphi %s1858_s21, %s2176_s21  }
 0x123 LB: >>> { %s479_s29 = smov [#allocation23]  ;;  %v483_v6 = vmov %v1822_v6  ;;  %v486_v7 = vmov %v1824_v7  ;;  %s499_s15 = smov [#allocation24]  ;;  %vm802_vm14 = vcmp.eq.s32.totalorder %v1824_v7, 0  ;;  %vm814_vm15 = vcmp.eq.s32.totalorder %v1824_v7, 1  ;;  %s1700_s24 = sphi %s1863_s24, %s478_s24  }
 0x124   : >>> { %v503_v6 = vmov %v1822_v6  ;;  %v506_v7 = vmov %v1824_v7  ;;  %v487_v54 = vld [vmem:[%s479_s29] sm:$0x3]  ;;  %vm490_vm5 = vcmp.eq.s32.totalorder %v486_v7, %v483_v6  ;;  %s519_s16 = smov [#allocation26]  ;;  %s480_s0 = smov [#allocation27] }
 0x125   : >>> { %vm510_vm6 = vcmp.eq.s32.totalorder %v506_v7, %v503_v6  ;;  %v523_v6 = vmov %v1822_v6  ;;  %v526_v7 = vmov %v1824_v7  ;;  %v491_v55 = vsel %vm490_vm5, %v487_v54, 0.0  ;;  %v507_v56 = vld [vmem:[%s499_s15] sm:$0x3]  ;;  %s500_s17 = smov [#allocation28]  ;;  %s520_s18 = smov [#allocation29] }
 0x126   : >>> { %vm530_vm7 = vcmp.eq.s32.totalorder %v526_v7, %v523_v6  ;;  %v492_v57 = vrot.slane %v491_v55, 4  ;;  %v511_v58 = vsel %vm510_vm6, %v507_v56, 0.0  ;;  %v527_v59 = vld [vmem:[%s519_s16] sm:$0x3]  ;;  %s543_s29 = smov [#allocation28]  ;;  %s541_s15 = smov [#allocation27]  ;;  %v592_v6 = vmov %v1822_v6 }
 0x127   : >>> { %v512_v60 = vrot.slane %v511_v58, 4  ;;  %v531_v61 = vsel %vm530_vm7, %v527_v59, 0.0  ;;  %s545_s16 = smov [#allocation29]  ;;  %v595_v7 = vmov %v1824_v7  ;;  %v607_v6 = vmov %v1822_v6  ;;  %s1880_s26 = smov [#allocation24] }
 0x128   : >>> { %v493_v62 = vadd.f32 %v492_v57, %v491_v55  ;;  %v532_v63 = vrot.slane %v531_v61, 4  ;;  %v610_v7 = vmov %v1824_v7  ;;  %vm597_vm12 = vcmp.eq.s32.totalorder %v595_v7, %v592_v6  ;;  %s1882_s25 = smov [#allocation25]  ;;  %s1888_s28 = smov [#allocation15]  ;;  %v627_v54 = vld [vmem:[%s1880_s26] sm:$0x3] }
 0x129   : >>> { %v513_v0 = vadd.f32 %v512_v60, %v511_v58  ;;  %vm612_vm13 = vcmp.eq.s32.totalorder %v610_v7, %v607_v6  ;;  %s842_s30 = smov [#allocation34]  ;;  %s1894_s23 = smov [#allocation20]  ;;  %v628_v55 = vld [vmem:[%s1882_s25] sm:$0x3]  ;;  %v705_v6 = vmov %v1822_v6  ;;  %v708_v7 = vmov %v1824_v7 }
 0x12a   : >>> { %v494_v1 = vrot.slane %v493_v62, 2  ;;  %v533_v2 = vadd.f32 %v532_v63, %v531_v61  ;;  %v851_v58 = vld [vmem:[%s1888_s28] sm:$0x3]  ;;  %s620_s27 = smov [#allocation35]  ;;  %s844_s1 = smov [#allocation35]  ;;  %v719_v6 = vmov %v1822_v6  ;;  %v722_v7 = vmov %v1824_v7 }
 0x12b   : >>> { %v514_v3 = vrot.slane %v513_v0, 2  ;;  %v853_v61 = vld [vmem:[%s1894_s23] sm:$0x3]  ;;  %vm712_vm0 = vcmp.eq.s32.totalorder %v708_v7, %v705_v6  ;;  %v678_v6 = vmov %v1822_v6  ;;  %v681_v7 = vmov %v1824_v7  ;;  %s478_s24 = sadd.s32 1, %s1700_s24  }
 0x12c   : >>> { %v495_v4 = vadd.f32 %v494_v1, %v493_v62  ;;  %v534_v5 = vrot.slane %v533_v2, 2  ;;  %v692_v6 = vmov %v1822_v6  ;;  %v695_v7 = vmov %v1824_v7  ;;  %p475_p9 = scmp.ge.s32.totalorder %s478_s24, 3  }
 0x12d   : >>> { %v515_v8 = vadd.f32 %v514_v3, %v513_v0  ;;  %vm727_vm1 = vcmp.eq.s32.totalorder %v722_v7, %v719_v6  ;;  %vm686_vm3 = vcmp.eq.s32.totalorder %v681_v7, %v678_v6  ;;  %vm699_vm4 = vcmp.eq.s32.totalorder %v695_v7, %v692_v6 }
 0x12e   : >>> { %v496_v9 = vrot.slane %v495_v4, 1  ;;  %v535_v10 = vadd.f32 %v534_v5, %v533_v2  ;;  %vm741_vm5 = vcmp.eq.s32.totalorder %v1822_v6, 0  ;;  %vm745_vm6 = vcmp.eq.s32.totalorder %v1822_v6, 1 }
 0x12f   : >>> { %v516_v11 = vrot.slane %v515_v8, 1  ;;  %v379_v6 = vmov (%p475_p9), %v1822_v6  ;;  %v382_v7 = vmov (%p475_p9), %v1824_v7 }
 0x130   : >>> { %v497_v12 = vadd.f32 %v496_v9, %v495_v4  ;;  %v536_v13 = vrot.slane %v535_v10, 1  ;;  %v432_v6 = vmov (%p475_p9), %v1822_v6  ;;  %vm394_vm7 = vcmp.eq.s32.totalorder (%p475_p9), %v382_v7, %v379_v6 }
 0x131   : >>> { %v517_v14 = vadd.f32 %v516_v11, %v515_v8  ;;  %v435_v7 = vmov (%p475_p9), %v1824_v7  ;;  %v398_v6 = vmov (%p475_p9), %v1822_v6 }
 0x132   : >>> { %498 = vst [vmem:[%s480_s0] sm:$0x1] %v497_v12  ;;  %v537_v15 = vadd.f32 %v536_v13, %v535_v10  ;;  %s580_s0 = smov [#allocation30]  ;;  %v401_v7 = vmov (%p475_p9), %v1824_v7  ;;  %v415_v6 = vmov (%p475_p9), %v1822_v6 }
 0x133   : >>> { %518 = vst [vmem:[%s500_s17] sm:$0x1] %v517_v14  ;;  %s582_s17 = smov [#allocation31]  ;;  %v418_v7 = vmov (%p475_p9), %v1824_v7 }
 0x134   : >>> { %538 = vst [vmem:[%s520_s18] sm:$0x1] %v537_v15  ;;  %s539_s18 = smov [#allocation32] }
 0x135   : >>> { %s584_s18 = smov %s539_s18 }
 0x139   : >>> { %v542_v18 = vld [vmem:[%s541_s15] sm:$0xff]  ;;  %s588_s15 = smov [#allocation32] }
 0x13a   : >>> { %v544_v16 = vld [vmem:[%s543_s29] sm:$0xff]  ;;  %v565_v31 = vand.u32 2147483647, %v542_v18  ;;  %s540_s29 = smov [#allocation33] }
 0x13b   : >>> { %v548_v17 = vmul.f32 2.0, %v544_v16  ;;  %v546_v19 = vld [vmem:[%s545_s16] sm:$0xff]  ;;  %v566_v36 = vand.u32 2147483647, %v544_v16  ;;  %s586_s29 = smov %s540_s29  ;;  %s603_s16 = smov [#allocation33] }
 0x13c   : >>> { %v547_v20 = vsub.f32 %v546_v19, %v542_v18  ;;  %v567_v32 = vand.u32 2147483647, %v546_v19 }
 0x13d   : >>> { %1546 = vrcp.f32 %v548_v17 }
 0x13e   : >>> { %v568_v35 = vmin.f32 %v565_v31, %v567_v32 }
 0x140   : >>> { %v569_v37 = vmul.f32 1.1920929e-08, %v568_v35 }
 0x142   : >>> { %vm570_vm11 = vcmp.le.f32.partialorder %v566_v36, %v569_v37 }
 0x147   : >>> { %v1547_v21 = vpop.eup %1546 }
 0x148   : >>> { %v550_v22 = vmul.f32 %v1547_v21, %v547_v20 }
 0x14a   : >>> { %v552_v23 = vmul.f32 %v550_v22, %v550_v22  ;;  %vm551_vm10 = vcmp.ge.f32.partialorder %v550_v22, 0.0 }
 0x14c   : >>> { %v553_v24 = vadd.f32 1.0, %v552_v23 }
 0x14e   : >>> { %1548 = vrsqrt.f32 %v553_v24  ;;  %vm556_vm8 = vcmp.eq.f32.partialorder %v553_v24, inf  ;;  %v559_v26 = vand.u32 2147483648, %v553_v24  ;;  %vm558_vm9 = vcmp.eq.f32.partialorder %v553_v24, 0.0 }
 0x158   : >>> { %v1549_v25 = vpop.eup %1548 }
 0x159   : >>> { %v555_v27 = vmul.f32 %v1549_v25, %v553_v24 }
 0x15b   : >>> { %v557_v28 = vsel %vm556_vm8, %v553_v24, %v555_v27  ;;  %vm447_vm8 = vcmp.eq.s32.totalorder (%p475_p9), %v435_v7, %v432_v6 }
 0x15c   : >>> { %v560_v29 = vsel %vm558_vm9, %v559_v26, %v557_v28 }
 0x15d   : >>> { %v561_v30 = vxor.u32 2147483648, %v560_v29 }
 0x15f   : >>> { %v562_v33 = vsel %vm551_vm10, %v560_v29, %v561_v30 }
 0x160   : >>> { %v563_v34 = vadd.f32 %v562_v33, %v550_v22 }
 0x162   : >>> { %1550 = vrcp.f32 %v563_v34 }
 0x16c   : >>> { %v1551_v38 = vpop.eup %1550 }
 0x16d   : >>> { %v571_v39 = vsel %vm570_vm11, 0.0, %v1551_v38 }
 0x16e   : >>> { %v572_v40 = vmul.f32 %v571_v39, %v571_v39  ;;  %v576_v41 = vmul.f32 %v571_v39, %v544_v16 }
 0x170   : >>> { %v573_v42 = vadd.f32 1.0, %v572_v40  ;;  %v577_v43 = vsub.f32 %v542_v18, %v576_v41  ;;  %v579_v44 = vadd.f32 %v576_v41, %v546_v19 }
 0x172   : >>> { %1552 = vrsqrt.f32 %v573_v42  ;;  %581 = vst [vmem:[%s580_s0] sm:$0xff] %v577_v43  ;;  %583 = vst [vmem:[%s582_s17] sm:$0xff] %v579_v44  ;;  %s601_s0 = smov [#allocation34]  ;;  %s618_s17 = smov [#allocation34] }
 0x17c   : >>> { %v1553_v45 = vpop.eup %1552 }
 0x17d   : >>> { %585 = vst [vmem:[%s584_s18] sm:$0xff] %v1553_v45  ;;  %v575_v46 = vmul.f32 %v1553_v45, %v571_v39  ;;  %s1878_s18 = smov [#allocation23] }
 0x17e   : >>> { %v626_v53 = vld [vmem:[%s1878_s18] sm:$0x3] }
 0x17f   : >>> { %587 = vst [vmem:[%s586_s29] sm:$0xff] %v575_v46  ;;  %s616_s29 = smov [#allocation35] }
 0x184   : >>> { %v589_v47 = vld [vmem:[%s588_s15] ss:$0 sm:$0xff]  ;;  %s1884_s15 = smov [#allocation26] }
 0x185   : >>> { %v598_v48 = vsel %vm597_vm12, %v589_v47, 0.0  ;;  %v629_v56 = vld [vmem:[%s1884_s15] sm:$0x3] }
 0x186   : >>> { %599 = vadd.xlane.f32.xlu0 %v598_v48  ;;  %v604_v49 = vld [vmem:[%s603_s16] ss:$0 sm:$0xff]  ;;  %s1886_s16 = smov [#allocation12] }
 0x187   : >>> { %v613_v50 = vsel %vm612_vm13, %v604_v49, 0.0  ;;  %v850_v57 = vld [vmem:[%s1886_s16] sm:$0x3] }
 0x18a   : >>> { %614 = vadd.xlane.f32.xlu0 %v613_v50 }
 0x213   : >>> { %v600_v51 = vpop.xlane.xlu0 %599 }
 0x214   : >>> { %602 = vst [vmem:[%s601_s0] sm:$0xff] %v600_v51  ;;  %s1890_s0 = smov [#allocation18] }
 0x215   : >>> { %v852_v59 = vld [vmem:[%s1890_s0] sm:$0x3] }
 0x217   : >>> { %v615_v52 = vpop.xlane.xlu0 %614 }
 0x218   : >>> { %617 = vst [vmem:[%s616_s29] sm:$0xff] %v615_v52  ;;  %s1914_s29 = smov [#allocation26] }
 0x21b   : >>> { %v619_v60 = vld [vmem:[%s618_s17] sm:$0xff]  ;;  %s1912_s17 = smov [#allocation25] }
 0x21c   : >>> { %v843_v62 = vld [vmem:[%s842_s30] sm:$0xff]  ;;  %v630_v63 = vmul.f32 %v626_v53, %v619_v60  ;;  %v633_v0 = vmul.f32 %v627_v54, %v619_v60  ;;  %v637_v1 = vmul.f32 %v628_v55, %v619_v60  ;;  %v640_v2 = vmul.f32 %v629_v56, %v619_v60  ;;  %s1910_s30 = smov [#allocation12] }
 0x21d   : >>> { %v854_v3 = vmul.f32 %v850_v57, %v843_v62  ;;  %v857_v4 = vmul.f32 %v851_v58, %v843_v62  ;;  %v861_v5 = vmul.f32 %v852_v59, %v843_v62  ;;  %v864_v8 = vmul.f32 %v853_v61, %v843_v62 }
 0x21f   : >>> { %v621_v9 = vld [vmem:[%s620_s27] sm:$0xff]  ;;  %s648_s27 = smov [#allocation33] }
 0x220   : >>> { %v845_v10 = vld [vmem:[%s844_s1] sm:$0xff]  ;;  %v631_v11 = vmul.f32 %v628_v55, %v621_v9  ;;  %v634_v12 = vmul.f32 %v629_v56, %v621_v9  ;;  %v636_v13 = vmul.f32 %v626_v53, %v621_v9  ;;  %v639_v14 = vmul.f32 %v627_v54, %v621_v9  ;;  %s646_s1 = smov [#allocation32] }
 0x221   : >>> { %v855_v15 = vmul.f32 %v852_v59, %v845_v10  ;;  %v858_v16 = vmul.f32 %v853_v61, %v845_v10  ;;  %v860_v17 = vmul.f32 %v850_v57, %v845_v10  ;;  %v863_v18 = vmul.f32 %v851_v58, %v845_v10  ;;  %v647_v27 = vld [vmem:[%s646_s1] ss:$0 sm:$0xff]  ;;  %s675_s1 = smov [#allocation30] }
 0x222   : >>> { %v632_v19 = vsub.f32 %v630_v63, %v631_v11  ;;  %v635_v20 = vsub.f32 %v633_v0, %v634_v12  ;;  %v638_v21 = vadd.f32 %v637_v1, %v636_v13  ;;  %v641_v22 = vadd.f32 %v640_v2, %v639_v14  ;;  %v649_v28 = vld [vmem:[%s648_s27] ss:$0 sm:$0xff]  ;;  %s674_s27 = smov [#allocation23] }
 0x223   : >>> { %v856_v23 = vsub.f32 %v854_v3, %v855_v15  ;;  %v859_v24 = vsub.f32 %v857_v4, %v858_v16  ;;  %v862_v25 = vadd.f32 %v861_v5, %v860_v17  ;;  %v865_v26 = vadd.f32 %v864_v8, %v863_v18  ;;  %v682_v63 = vld [vmem:[%s675_s1] ss:$0 sm:$0xff]  ;;  %s918_s1 = sadd.s32 (%p475_p9), 1, %s1696_s21  }
 0x224   : >>> { %643 = vst [vmem:[%s1880_s26] sm:$0x3] %v635_v20  ;;  %645 = vst [vmem:[%s1884_s15] sm:$0x3] %v641_v22  ;;  %s1916_s26 = smov [#allocation23]  ;;  %s716_s15 = smov [#allocation31] }
 0x225   : >>> { %642 = vst [vmem:[%s1878_s18] sm:$0x3] %v632_v19  ;;  %644 = vst [vmem:[%s1882_s25] sm:$0x3] %v638_v21  ;;  %s1918_s25 = smov [#allocation18]  ;;  %s1926_s18 = smov [#allocation24]  ;;  %v723_v59 = vld [vmem:[%s716_s15] ss:$0 sm:$0xff] }
 0x226   : >>> { %866 = vst [vmem:[%s1886_s16] sm:$0x3] %v856_v23  ;;  %867 = vst [vmem:[%s1888_s28] sm:$0x3] %v859_v24  ;;  %s1920_s28 = smov [#allocation15]  ;;  %s702_s16 = smov [#allocation25] }
 0x227   : >>> { %868 = vst [vmem:[%s1890_s0] sm:$0x3] %v862_v25  ;;  %869 = vst [vmem:[%s1894_s23] sm:$0x3] %v865_v26  ;;  %s1924_s23 = smov [#allocation20]  ;;  %s715_s0 = smov [#allocation26] }
 0x228   : >>> { %s818_s15 = smov [#allocation24]  ;;  %p471_p10 = scmp.ge.s32.totalorder (%p475_p9), %s918_s1, 15 }
 0x229   : >> { %s2176_s21 = smov (%p475_p9), %s918_s1 }
 0x22b   : >>> { %v657_v30 = vld [vmem:[%s1914_s29] sm:$0x3] }
 0x22c   : >>> { %v656_v29 = vld [vmem:[%s1912_s17] sm:$0x3]  ;;  %v665_v36 = vmul.f32 %v657_v30, %v649_v28  ;;  %v668_v42 = vmul.f32 %v657_v30, %v647_v27 }
 0x22d   : >>> { %v654_v31 = vld [vmem:[%s1916_s26] sm:$0x3]  ;;  %v664_v35 = vmul.f32 %v656_v29, %v647_v27  ;;  %v667_v37 = vmul.f32 %v656_v29, %v649_v28 }
 0x22e   : >>> { %v872_v32 = vld [vmem:[%s1910_s30] ss:$0 sm:$0xff]  ;;  %v1469_v34 = vld [vmem:[%s1910_s30 + $0x1] ss:$0 sm:$0xff]  ;;  %v658_v48 = vmul.f32 %v654_v31, %v647_v27  ;;  %v661_v49 = vmul.f32 %v654_v31, %v649_v28 }
 0x22f   : >>> { %v1468_v33 = vld [vmem:[%s1910_s30 - $0x1] sm:$0x2]  ;;  %v1471_v40 = vld [vmem:[%s1918_s25 + $0x1] sm:$0x1]  ;;  %v666_v47 = vsub.f32 %v664_v35, %v665_v36  ;;  %v669_v53 = vadd.f32 %v668_v42, %v667_v37 }
 0x230   : >>> { %v879_v38 = vsel %vm802_vm14, %v872_v32, %v1468_v33  ;;  %v883_v39 = vld [vmem:[%s1918_s25] ss:$0 sm:$0xff]  ;;  %v891_v43 = vsel %vm814_vm15, %v1469_v34, %v1471_v40  ;;  %v1473_v45 = vld [vmem:[%s1920_s28 + $0x1] ss:$0 sm:$0xff] }
 0x231   : >>> { %v896_v41 = vld [vmem:[%s1920_s28] ss:$0 sm:$0xff]  ;;  %882 = vst [vmem:[%s1910_s30] sm:$0x3] %v879_v38  ;;  %893 = vst [vmem:[%s1918_s25] sm:$0x3] %v891_v43  ;;  %v1475_v51 = vld [vmem:[%s1924_s23 + $0x1] sm:$0x1] }
 0x232   : >>> { %v1472_v44 = vld [vmem:[%s1920_s28 - $0x1] sm:$0x2]  ;;  %1470 = vst [vmem:[%s1910_s30 + $0x1] sm:$0x1] %v883_v39  ;;  %v915_v54 = vsel %vm814_vm15, %v1473_v45, %v1475_v51  ;;  %672 = vst [vmem:[%s1912_s17] sm:$0x3] %v666_v47  ;;  %s689_s30 = smov [#allocation24] }
 0x233   : >>> { %v907_v46 = vld [vmem:[%s1924_s23] ss:$0 sm:$0xff]  ;;  %v903_v50 = vsel %vm802_vm14, %v896_v41, %v1472_v44  ;;  %673 = vst [vmem:[%s1914_s29] sm:$0x3] %v669_v53  ;;  %s1968_s17 = smov [#allocation25]  ;;  %s1703_s29 = smov 1  }
 0x234   : >>> { %v655_v52 = vld [vmem:[%s1926_s18] sm:$0x3]  ;;  %906 = vst [vmem:[%s1920_s28] sm:$0x3] %v903_v50  ;;  %917 = vst [vmem:[%s1924_s23] sm:$0x3] %v915_v54  ;;  %s731_s25 = smov [#allocation24]  ;;  %s1971_s23 = smov [#allocation26] }
 0x235   : >>> { %v659_v55 = vmul.f32 %v655_v52, %v649_v28  ;;  %v662_v56 = vmul.f32 %v655_v52, %v647_v27  ;;  %1474 = vst [vmem:[%s1920_s28 + $0x1] sm:$0x1] %v907_v46  ;;  %s1704_s28 = smov 127  }
 0x237   : >>> { %v660_v57 = vsub.f32 %v658_v48, %v659_v55  ;;  %v663_v58 = vadd.f32 %v662_v56, %v661_v49 }
 0x239   : >>> { %670 = vst [vmem:[%s1916_s26] sm:$0x3] %v660_v57  ;;  %671 = vst [vmem:[%s1926_s18] sm:$0x3] %v663_v58  ;;  %v709_v60 = vld [vmem:[%s702_s16] sm:$0x3]  ;;  %s730_s26 = smov [#allocation23]  ;;  %s794_s18 = smov [#allocation23] }
 0x23a   : >>> { %v713_v61 = vsel %vm712_vm0, 0.0, %v709_v60  ;;  %v724_v62 = vld [vmem:[%s715_s0] sm:$0x3] }
 0x23b   : >>> { %714 = vst [vmem:[%s702_s16] sm:$0x3] %v713_v61  ;;  %v728_v0 = vsel %vm727_vm1, %v723_v59, %v724_v62  ;;  %s795_s16 = smov [#allocation25] }
 0x23c   : >>> { %729 = vst [vmem:[%s715_s0] sm:$0x3] %v728_v0  ;;  %s819_s0 = smov [#allocation26] }
 0x240   : >>> { %v683_v1 = vld [vmem:[%s674_s27] sm:$0x3] }
 0x241   : >>> { %v696_v2 = vld [vmem:[%s689_s30] sm:$0x3]  ;;  %v687_v3 = vsel %vm686_vm3, %v682_v63, %v683_v1 }
 0x242   : >>> { %v700_v4 = vsel %vm699_vm4, 0.0, %v696_v2  ;;  %688 = vst [vmem:[%s674_s27] sm:$0x3] %v687_v3  ;;  %v768_v5 = vld [vmem:[%s1968_s17] sm:$0x3]  ;;  %s383_s27 = smov (%p475_p9), [#allocation23] }
 0x243   : >>> { %701 = vst [vmem:[%s689_s30] sm:$0x3] %v700_v4  ;;  %769 = vrot.lane.b32.xlu0 %v768_v5, %s1703_s29  ;;  %v764_v11 = vld [vmem:[%s1971_s23] sm:$0x3]  ;;  %s402_s30 = smov (%p475_p9), [#allocation24] }
 0x244   : >>> { %v785_v12 = vld [vmem:[%s1971_s23] sm:$0x3] }
 0x245   : >>> { %v767_v30 = vld [vmem:[%s1968_s17] sm:$0x3] }
 0x249   : >>> { %v736_v8 = vld [vmem:[%s730_s26] sm:$0x3] }
 0x24a   : >>> { %737 = vrot.lane.b32.xlu1 %v736_v8, %s1703_s29  ;;  %v732_v9 = vld [vmem:[%s731_s25] sm:$0x3] }
 0x24b   : >>> { %v753_v10 = vld [vmem:[%s731_s25] sm:$0x3] }
 0x24c   : >>> { %v735_v18 = vld [vmem:[%s730_s26] sm:$0x3] }
 0x24e   : >>> { %733 = vrot.lane.b32.xlu1 %v732_v9, %s1703_s29 }
 0x252   : >>> { %754 = vrot.lane.b32.xlu1 %v753_v10, %s1704_s28 }
 0x256   : >>> { %765 = vrot.lane.b32.xlu1 %v764_v11, %s1703_s29  ;;  %s436_s29 = smov (%p475_p9), [#allocation26] }
 0x25a   : >>> { %786 = vrot.lane.b32.xlu1 %v785_v12, %s1704_s28 }
 0x2b5   : >>> { %v770_v20 = vpop.permute.xlu0 %769 }
 0x2b6   : >>> { %v774_v22 = vsel %vm741_vm5, %v768_v5, %v770_v20 }
 0x2bc   : >>> { %v738_v13 = vpop.permute.xlu1 %737 }
 0x2bd   : >>> { %v742_v14 = vsel %vm741_vm5, %v736_v8, %v738_v13 }
 0x2c0   : >>> { %v734_v15 = vpop.permute.xlu1 %733 }
 0x2c1   : >>> { %v746_v16 = vsel %vm745_vm6, %v734_v15, %v742_v14 }
 0x2c2   : >>> { %v752_v17 = vsel %vm1329_vm2, %v746_v16, 0.0 }
 0x2c3   : >>> { %760 = vst [vmem:[%s730_s26] sm:$0x3] %v752_v17 }
 0x2c4   : >>> { %v755_v19 = vpop.permute.xlu1 %754 }
 0x2c5   : >>> { %v759_v21 = vsel %vm745_vm6, %v735_v18, %v755_v19 }
 0x2c6   : >>> { %761 = vst [vmem:[%s731_s25] sm:$0x3] %v759_v21 }
 0x2c8   : >>> { %v766_v23 = vpop.permute.xlu1 %765 }
 0x2c9   : >>> { %v778_v24 = vsel %vm745_vm6, %v766_v23, %v774_v22 }
 0x2ca   : >>> { %v796_v25 = vld [vmem:[%s794_s18] ss:$0 sm:$0xff]  ;;  %v1461_v27 = vld [vmem:[%s794_s18 + $0x1] ss:$0 sm:$0xff]  ;;  %v784_v29 = vsel %vm1329_vm2, %v778_v24, 0.0 }
 0x2cb   : >>> { %v1460_v26 = vld [vmem:[%s794_s18 - $0x1] sm:$0x2]  ;;  %792 = vst [vmem:[%s1968_s17] sm:$0x3] %v784_v29  ;;  %s419_s17 = smov (%p475_p9), [#allocation25] }
 0x2cc   : >>> { %v803_v28 = vsel %vm802_vm14, %v796_v25, %v1460_v26  ;;  %v787_v31 = vpop.permute.xlu1 %786 }
 0x2cd   : >>> { %806 = vst [vmem:[%s794_s18] sm:$0x3] %v803_v28  ;;  %v820_v32 = vld [vmem:[%s818_s15] ss:$0 sm:$0xff]  ;;  %v1465_v34 = vld [vmem:[%s818_s15 + $0x1] ss:$0 sm:$0xff]  ;;  %v791_v35 = vsel %vm745_vm6, %v767_v30, %v787_v31 }
 0x2ce   : >>> { %v1464_v33 = vld [vmem:[%s818_s15 - $0x1] sm:$0x2]  ;;  %793 = vst [vmem:[%s1971_s23] sm:$0x3] %v791_v35 }
 0x2cf   : >>> { %v827_v36 = vsel %vm802_vm14, %v820_v32, %v1464_v33 }
 0x2d0   : >>> { %830 = vst [vmem:[%s818_s15] sm:$0x3] %v827_v36 }
 0x2d2   : >>> { %v807_v37 = vld [vmem:[%s795_s16] ss:$0 sm:$0xff]  ;;  %v1463_v38 = vld [vmem:[%s795_s16 + $0x1] sm:$0x1] }
 0x2d3   : >>> { %1462 = vst [vmem:[%s794_s18 + $0x1] sm:$0x1] %v807_v37  ;;  %v815_v39 = vsel %vm814_vm15, %v1461_v27, %v1463_v38  ;;  %477 = sbr.rel (!%p475_p9) target bundleno = 291 (0x123), region = 344 }
 0x2d4   : >>> { %817 = vst [vmem:[%s795_s16] sm:$0x3] %v815_v39 }
 0x2d5   : >>> { %v831_v40 = vld [vmem:[%s819_s0] ss:$0 sm:$0xff]  ;;  %v1467_v41 = vld [vmem:[%s819_s0 + $0x1] sm:$0x1] }
 0x2d6   : >>> { %1466 = vst [vmem:[%s818_s15 + $0x1] sm:$0x1] %v831_v40  ;;  %v839_v42 = vsel %vm814_vm15, %v1465_v34, %v1467_v41 }
 0x2d7   : >>> { %841 = vst [vmem:[%s819_s0] sm:$0x3] %v839_v42 }
 0x2da   : >> { %v389_v43 = vld [vmem:[%s383_s27] sm:$0x3] }
 0x2db   : >> { %v390_v45 = vsel %vm1329_vm2, %v389_v43, 0.0  ;;  %v425_v47 = vld [vmem:[%s419_s17] sm:$0x3] }
 0x2dc   : >> { %v391_v49 = vmul.f32 %v390_v45, %v390_v45  ;;  %v426_v51 = vsel %vm1329_vm2, %v425_v47, 0.0 }
 0x2dd   : >> { %v408_v44 = vld [vmem:[%s402_s30] sm:$0x3]  ;;  %v427_v53 = vmul.f32 %v426_v51, %v426_v51 }
 0x2de   : >> { %v409_v46 = vsel %vm1329_vm2, %v408_v44, 0.0  ;;  %v442_v48 = vld [vmem:[%s436_s29] sm:$0x3]  ;;  %v395_v56 = vsel %vm394_vm7, 0.0, %v391_v49 }
 0x2df   : >> { %v410_v50 = vmul.f32 %v409_v46, %v409_v46  ;;  %v443_v52 = vsel %vm1329_vm2, %v442_v48, 0.0 }
 0x2e0   : >> { %v444_v55 = vmul.f32 %v443_v52, %v443_v52 }
 0x2e1   : >> { %v412_v54 = vadd.f32 %v410_v50, %v391_v49  ;;  %v411_v57 = vadd.f32 %v410_v50, %v395_v56 }
 0x2e2   : >> { %v448_v60 = vsel %vm447_vm8, 0.0, %v444_v55 }
 0x2e3   : >> { %v429_v58 = vadd.f32 %v427_v53, %v412_v54  ;;  %v428_v59 = vadd.f32 %v427_v53, %v411_v57 }
 0x2e5   : >> { %v450_v61 = vadd.f32 %v444_v55, %v429_v58  ;;  %v449_v62 = vadd.f32 %v448_v60, %v428_v59 }
 0x2e7   : >> { %451 = vadd.xlane.f32.xlu0 %v450_v61 }
 0x2eb   : >> { %459 = vadd.xlane.f32.xlu0 %v449_v62 }
 0x374   : >> { %v452_v63 = vpop.xlane.xlu0 %451 }
 0x375   : >> { %v453_v0 = vrot.slane %v452_v63, 4 }
 0x377   : >> { %v454_v1 = vadd.f32 %v453_v0, %v452_v63 }
 0x378   : >> { %v460_v2 = vpop.xlane.xlu0 %459 }
 0x379   : >> { %v455_v3 = vrot.slane %v454_v1, 2  ;;  %v461_v4 = vrot.slane %v460_v2, 4 }
 0x37b   : >> { %v462_v5 = vadd.f32 %v461_v4, %v460_v2  ;;  %v456_v8 = vadd.f32 %v455_v3, %v454_v1 }
 0x37d   : >> { %v463_v9 = vrot.slane %v462_v5, 2  ;;  %v457_v11 = vrot.slane %v456_v8, 1 }
 0x37f   : >> { %v464_v10 = vadd.f32 %v463_v9, %v462_v5  ;;  %v458_v14 = vadd.f32 %v457_v11, %v456_v8 }
 0x381   : >> { %v465_v12 = vrot.slane %v464_v10, 1 }
 0x383   : >> { %v466_v13 = vadd.f32 %v465_v12, %v464_v10 }
 0x385   : >> { %1494 = vpush %v466_v13 }
 0x386   : >> { %1496 = vpush %v458_v14 }
 0x3b6   : >> { %s1495_s24 = spop %1494 }
 0x3b7   : >> { %s1497_s26 = spop %1496 }
 0x3b8   : >> { %s469_s25 = smul.f32 1e-10, %s1497_s26 }
 0x3ba   : >> { %p470_p11 = scmp.le.f32.partialorder %s1495_s24, %s469_s25 }
 0x3bc   : >> { %p472_p12 = por %p471_p10, %p470_p11 }
 0x3be   : > { %920 = sbr.rel (!%p472_p12) target bundleno = 290 (0x122), region = 355 }
 0x3c5 PF: > { %s925_s28 = smov [#allocation23]  ;;  %v929_v6 = vmov %v1822_v6  ;;  %v932_v7 = vmov %v1824_v7  ;;  %v980_v15 = vld [vmem:[#allocation12] sm:$0x3]  ;;  %v986_v16 = vld [vmem:[#allocation15] sm:$0x3]  ;;  %s2177_s21 = scalar_lea.vmem [#allocation13], %s1818_s19 }
 0x3c6   : > { %v949_v6 = vmov %v1822_v6  ;;  %v952_v7 = vmov %v1824_v7  ;;  %v933_v17 = vld [vmem:[%s925_s28] sm:$0x3]  ;;  %vm936_vm9 = vcmp.eq.s32.totalorder %v932_v7, %v929_v6  ;;  %982 = vst [vmem:[%s2177_s21] sm:$0x3] %v980_v15  ;;  %s2178_s23 = scalar_lea.vmem [#allocation16], %s1818_s19  ;;  %s945_s18 = smov [#allocation26] }
 0x3c7   : > { %vm956_vm10 = vcmp.eq.s32.totalorder %v952_v7, %v949_v6  ;;  %988 = vst [vmem:[%s2178_s23] sm:$0x3] %v986_v16  ;;  %v992_v18 = vld [vmem:[#allocation18] sm:$0x3]  ;;  %v937_v19 = vsel %vm936_vm9, %v933_v17, 0.0  ;;  %s2179_s15 = scalar_lea.vmem [#allocation19], %s1818_s19  ;;  %s2180_s16 = scalar_lea.vmem [#allocation21], %s1818_s19 }
 0x3c8   : > { %994 = vst [vmem:[%s2179_s15] sm:$0x3] %v992_v18  ;;  %v998_v20 = vld [vmem:[#allocation20] sm:$0x3]  ;;  %v938_v21 = vrot.slane %v937_v19, 4  ;;  %v953_v22 = vld [vmem:[%s945_s18] sm:$0x3] }
 0x3c9   : > { %1000 = vst [vmem:[%s2180_s16] sm:$0x3] %v998_v20  ;;  %v957_v23 = vsel %vm956_vm10, %v953_v22, 0.0  ;;  %s921_s0 = sand.u32 7, %s1775_s12   ;;  %s2181_s30 = scalar_lea.vmem [#allocation9], %s1820_s22 }
 0x3ca   : > { %v939_v24 = vadd.f32 %v938_v21, %v937_v19  ;;  %v958_v25 = vrot.slane %v957_v23, 4  ;;  %s922_s1 = scalar_lea.vmem [#allocation8], %s921_s0  ;;  %s924_s27 = scalar_lea.vmem [#allocation10], %s921_s0 }
 0x3cb   : > { %s926_s1 = smov %s922_s1  ;;  %s946_s27 = smov %s924_s27 }
 0x3cc   : > { %v940_v26 = vrot.slane %v939_v24, 2  ;;  %v959_v6 = vadd.f32 %v958_v25, %v957_v23  ;;  %s2182_s17 = scalar_lea.vmem [#allocation11], %s1820_s22  ;;  %s1010_s29 = scalar_lea.sflag [#allocation14], %s1814_s13 }
 0x3cd   : > { %s1015_s24 = scalar_lea.sflag [#allocation17], %s1814_s13  ;;  %s1025_s26 = scalar_lea.sflag [#allocation22], %s1814_s13 }
 0x3ce   : > { %v941_v7 = vadd.f32 %v940_v26, %v939_v24  ;;  %v960_v27 = vrot.slane %v959_v6, 2  ;;  %s1032_s25 = sshrl.u32 (%p1790_p3), %s1775_s12, 3  ;;  %s2183_s28 = scalar_lea.vmem (%p1790_p3), [#allocation9], %s1820_s22 }
 0x3cf   : > { %s1482_s21 = sshll.u32 (%p1790_p3), %s1032_s25, 1 }
 0x3d0   : > { %v942_v28 = vrot.slane %v941_v7, 1  ;;  %v961_v29 = vadd.f32 %v960_v27, %v959_v6  ;;  %s1034_s15 = scalar_lea.vmem (%p1790_p3), %s2164_s4, %s1482_s21 }
 0x3d2   : > { %v943_v30 = vadd.f32 %v942_v28, %v941_v7  ;;  %v962_v31 = vrot.slane %v961_v29, 1 }
 0x3d4   : > { %944 = vst [vmem:[%s926_s1] sm:$0x1] %v943_v30  ;;  %v963_v32 = vadd.f32 %v962_v31, %v961_v29 }
 0x3d6   : > { %964 = vst [vmem:[%s946_s27] sm:$0x1] %v963_v32 }
 0x3d8   : > { %1031 = sbr.rel (!%p1790_p3) target bundleno = 997 (0x3e5), region = 158 }
 0x3db   : > { %v968_v33 = vld [vmem:[#allocation8] sm:$0x3] }
 0x3dc   : > { %970 = vst [vmem:[%s2181_s30] sm:$0x3] %v968_v33 }
 0x3dd   : > { %v974_v34 = vld [vmem:[#allocation10] sm:$0x3] }
 0x3de   : > { %976 = vst [vmem:[%s2182_s17] sm:$0x3] %v974_v34 }
 0x3e3   : > { %v1050_v35 = vld [vmem:[%s2183_s28] sm:$0x3] }
 0x3e4   : > { %1051 = vst [vmem:[%s1034_s15] sm:$0x3] %v1050_v35 }
 0x3e5 PF: > { %1068 = sbr.rel (!%p1790_p3) target bundleno = 1005 (0x3ed), region = 192  ;;  %s1069_s16 = sshrl.u32 (%p1790_p3), %s1775_s12, 3 }
 0x3e6   : > { %s2184_s0 = scalar_lea.vmem (%p1790_p3), [#allocation11], %s1820_s22  ;;  %s1483_s1 = sshll.u32 (%p1790_p3), %s1069_s16, 1 }
 0x3e7   : > { %s1071_s17 = scalar_lea.vmem (%p1790_p3), %s2165_s5, %s1483_s1 }
 0x3eb   : > { %v1087_v36 = vld [vmem:[%s2184_s0] sm:$0x3] (%p1790_p3) }
 0x3ec   : > { %1088 = vst [vmem:[%s1071_s17] sm:$0x3] %v1087_v36 }
 0x3ed PF: > { %s2064_s25 = sshll.u32 %s1775_s12, 5  ;;  %s2185_s28 = scalar_lea.vmem [#allocation16], %s1818_s19 }
 0x3ee   : > { %s1119_s20 = sshll.u32 %s2185_s28, 4  ;;  %s1117_s18 = scalar_lea.hbm %s2167_s7, %s2064_s25  ;;  %s1120_s20 = int_to_ptr.vmem [resolvable:$true] %s1119_s20 }
 0x3ef   : > { %s1554_s22 = scalar_lea.vmem %s1120_s20, 32  ;;  %s1705_s15 = smov [#allocation16]  }
 0x3f0   : > { %p1555_p13 = scmp.ne.s32.totalorder %s1120_s20, %s1554_s22  ;;  %s1556_s16 = sshll.u32 %s1705_s15, 4  ;;  %s1557_s16 = int_to_ptr.vmem [resolvable:$false] %s1556_s16 }
 0x3f1   : > { %s1558_s0 = scalar_lea.vmem %s1557_s16, 64  ;;  %p1559_p0 = scmp.lt.s32.totalorder %s1120_s20, %s1557_s16 }
 0x3f2   : > { %p1560_p1 = scmp.lt.s32.totalorder %s1558_s0, %s1554_s22 }
 0x3f4   : > { %p1561_p2 = por %p1560_p1, %p1559_p0 }
 0x3f6   : > { %p1562_p3 = pnand %p1561_p2, %p1555_p13 }
 0x3f8   : > { %1565 = shalt.err (!%p1562_p3)
}
 0x3f9   : > { %s1566_s12 = scalar_lea.hbm %s1117_s18, 32  ;;  %s1568_s30 = scalar_lea.hbm %s2167_s7, 64 }
 0x3fa   : > { %p1567_p5 = scmp.ne.s32.totalorder %s1117_s18, %s1566_s12  ;;  %p1569_p6 = scmp.lt.u32.totalorder %s1117_s18, %s2167_s7 }
 0x3fb   : > { %p1570_p7 = scmp.lt.u32.totalorder %s1568_s30, %s1566_s12  ;;  %p1572_p9 = scmp.lt.u32.totalorder %s1566_s12, %s1117_s18 }
 0x3fd   : > { %p1571_p8 = por %p1570_p7, %p1569_p6 }
 0x3ff   : > { %p1573_p10 = por %p1572_p9, %p1571_p8 }
 0x401   : > { %p1574_p11 = pnand %p1573_p10, %p1567_p5 }
 0x403   : > { %1577 = shalt.err (!%p1574_p11)
}
 0x404   : > { %1122 = dma.vmem_to_hbm [thread:$0]  %s1120_s20, 32, %s1117_s18, %s1015_s24  }
 0x405   : > { %s1107_s22 = scalar_lea.hbm %s2166_s6, %s2064_s25  ;;  %s2186_s15 = scalar_lea.vmem [#allocation13], %s1818_s19 }
 0x406   : > { %s1109_s16 = sshll.u32 %s2186_s15, 4  ;;  %s2090_s12 = scalar_lea.hbm %s2168_s8, %s2064_s25  ;;  %s1110_s16 = int_to_ptr.vmem [resolvable:$true] %s1109_s16 }
 0x407   : > { %s1578_s27 = scalar_lea.vmem %s1110_s16, 32  ;;  %s1706_s30 = smov [#allocation13]  }
 0x408   : > { %p1579_p12 = scmp.ne.s32.totalorder %s1110_s16, %s1578_s27  ;;  %s1580_s17 = sshll.u32 %s1706_s30, 4  ;;  %s1581_s17 = int_to_ptr.vmem [resolvable:$false] %s1580_s17 }
 0x409   : > { %s1582_s28 = scalar_lea.vmem %s1581_s17, 64  ;;  %p1583_p13 = scmp.lt.s32.totalorder %s1110_s16, %s1581_s17 }
 0x40a   : > { %p1584_p0 = scmp.lt.s32.totalorder %s1582_s28, %s1578_s27 }
 0x40c   : > { %p1585_p1 = por %p1584_p0, %p1583_p13 }
 0x40e   : > { %p1586_p2 = pnand %p1585_p1, %p1579_p12 }
 0x410   : > { %1589 = shalt.err (!%p1586_p2)
}
 0x411   : > { %s1590_s20 = scalar_lea.hbm %s1107_s22, 32  ;;  %s1592_s23 = scalar_lea.hbm %s2166_s6, 64 }
 0x412   : > { %p1591_p3 = scmp.ne.s32.totalorder %s1107_s22, %s1590_s20  ;;  %p1593_p5 = scmp.lt.u32.totalorder %s1107_s22, %s2166_s6 }
 0x413   : > { %p1594_p6 = scmp.lt.u32.totalorder %s1592_s23, %s1590_s20  ;;  %p1596_p8 = scmp.lt.u32.totalorder %s1590_s20, %s1107_s22 }
 0x415   : > { %p1595_p7 = por %p1594_p6, %p1593_p5 }
 0x417   : > { %p1597_p9 = por %p1596_p8, %p1595_p7 }
 0x419   : > { %p1598_p10 = pnand %p1597_p9, %p1591_p3 }
 0x41b   : > { %1601 = shalt.err (!%p1598_p10)
}
 0x41c   : > { %1112 = dma.vmem_to_hbm [thread:$0]  %s1110_s16, 32, %s1107_s22, %s1010_s29  }
 0x41d   : > { %s2187_s1 = scalar_lea.vmem [#allocation19], %s1818_s19  ;;  %s2106_s28 = scalar_lea.hbm %s2169_s9, %s2064_s25 }
 0x41e   : > { %s1129_s27 = sshll.u32 %s2187_s1, 4  ;;  %s2188_s18 = scalar_lea.vmem [#allocation21], %s1818_s19  ;;  %s1130_s27 = int_to_ptr.vmem [resolvable:$true] %s1129_s27 }
 0x41f   : > { %s1139_s21 = sshll.u32 %s2188_s18, 4  ;;  %s1602_s20 = scalar_lea.vmem %s1130_s27, 32  ;;  %s1140_s21 = int_to_ptr.vmem [resolvable:$true] %s1139_s21 }
 0x420   : > { %p1603_p11 = scmp.ne.s32.totalorder %s1130_s27, %s1602_s20  ;;  %s1707_s23 = smov [#allocation19]  }
 0x421   : > { %s1604_s15 = sshll.u32 %s1707_s23, 4  ;;  %s1605_s15 = int_to_ptr.vmem [resolvable:$false] %s1604_s15 }
 0x422   : > { %s1606_s0 = scalar_lea.vmem %s1605_s15, 64  ;;  %p1607_p12 = scmp.lt.s32.totalorder %s1130_s27, %s1605_s15 }
 0x423   : > { %p1608_p13 = scmp.lt.s32.totalorder %s1606_s0, %s1602_s20 }
 0x425   : > { %p1609_p0 = por %p1608_p13, %p1607_p12 }
 0x427   : > { %p1610_p1 = pnand %p1609_p0, %p1603_p11 }
 0x429   : > { %1613 = shalt.err (!%p1610_p1)
}
 0x42a   : > { %s1614_s29 = scalar_lea.hbm %s2090_s12, 32  ;;  %s1616_s22 = scalar_lea.hbm %s2168_s8, 64 }
 0x42b   : > { %p1615_p2 = scmp.ne.s32.totalorder %s2090_s12, %s1614_s29  ;;  %p1617_p3 = scmp.lt.u32.totalorder %s2090_s12, %s2168_s8 }
 0x42c   : > { %p1618_p5 = scmp.lt.u32.totalorder %s1616_s22, %s1614_s29  ;;  %p1620_p7 = scmp.lt.u32.totalorder %s1614_s29, %s2090_s12 }
 0x42e   : > { %p1619_p6 = por %p1618_p5, %p1617_p3 }
 0x430   : > { %p1621_p8 = por %p1620_p7, %p1619_p6 }
 0x432   : > { %p1622_p9 = pnand %p1621_p8, %p1615_p2 }
 0x434   : > { %1625 = shalt.err (!%p1622_p9)
}
 0x435   : > { %1132 = dma.vmem_to_hbm [thread:$0]  %s1130_s27, 32, %s2090_s12, %s1015_s24  }
 0x436   : > { %s1626_s30 = scalar_lea.vmem %s1140_s21, 32  ;;  %s1708_s17 = smov [#allocation21]  }
 0x437   : > { %p1627_p10 = scmp.ne.s32.totalorder %s1140_s21, %s1626_s30  ;;  %s1628_s18 = sshll.u32 %s1708_s17, 4  ;;  %s1629_s18 = int_to_ptr.vmem [resolvable:$false] %s1628_s18 }
 0x438   : > { %s1630_s20 = scalar_lea.vmem %s1629_s18, 64  ;;  %p1631_p11 = scmp.lt.s32.totalorder %s1140_s21, %s1629_s18 }
 0x439   : > { %p1632_p12 = scmp.lt.s32.totalorder %s1630_s20, %s1626_s30 }
 0x43b   : > { %p1633_p13 = por %p1632_p12, %p1631_p11 }
 0x43d   : > { %p1634_p0 = pnand %p1633_p13, %p1627_p10 }
 0x43f   : > { %1637 = shalt.err (!%p1634_p0)
}
 0x440   : > { %s1638_s23 = scalar_lea.hbm %s2106_s28, 32  ;;  %s1640_s12 = scalar_lea.hbm %s2169_s9, 64 }
 0x441   : > { %p1639_p1 = scmp.ne.s32.totalorder %s2106_s28, %s1638_s23  ;;  %p1641_p2 = scmp.lt.u32.totalorder %s2106_s28, %s2169_s9 }
 0x442   : > { %p1642_p3 = scmp.lt.u32.totalorder %s1640_s12, %s1638_s23  ;;  %p1644_p6 = scmp.lt.u32.totalorder %s1638_s23, %s2106_s28 }
 0x444   : > { %p1643_p5 = por %p1642_p3, %p1641_p2 }
 0x446   : > { %p1645_p7 = por %p1644_p6, %p1643_p5 }
 0x448   : > { %p1646_p8 = pnand %p1645_p7, %p1639_p1 }
 0x44a   : > { %1649 = shalt.err (!%p1646_p8)
}
 0x44b   : > { %1142 = dma.vmem_to_hbm [thread:$0]  %s1140_s21, 32, %s2106_s28, %s1025_s26  }
 0x44c PF: > { %s2189_s29 = sadd.s32 4294967294, %s1692_s11  }
 0x44d   : > { %s1162_s25 = sand.u32 1, %s2189_s29  }
 0x44e   : > { %s1163_s19 = scalar_lea.sflag [#allocation14], %s1162_s25 }
 0x44f   : > { %1671 = dma.done.wait (%p1440_p4), %s1163_s19, 32  }
 0x450   : > { %1673 = vsyncadd (%p1440_p4), %s1163_s19, 4294967264  ;;  %s1169_s22 = scalar_lea.sflag [#allocation17], %s1162_s25 }
 0x451   : > { %1675 = dma.done.wait (%p1440_p4), %s1169_s22, 64  }
 0x452   : > { %1677 = vsyncadd (%p1440_p4), %s1169_s22, 4294967232  ;;  %s1181_s13 = scalar_lea.sflag [#allocation22], %s1162_s25 }
 0x453   : > { %1679 = dma.done.wait (%p1440_p4), %s1181_s13, 32  }
 0x454   : > { %1681 = vsyncadd (%p1440_p4), %s1181_s13, 4294967264  ;;  %s2190_s26 = sld [smem:[#allocation39_spill]]  ;;  %p22_p9 = scmp.ge.s32.totalorder %s1779_s14, 4  }
 0x455   : > { %s2191_s30 = smov %s1688_s10  ;;  %s2193_s11 = smov %s1779_s14 }
 0x456   :  { %24 = sbr.rel (!%p22_p9) target bundleno = 10 (0xa), region = 366 }
 0x45a   : > { %s2192_s10 = smov %s2190_s26 }
 0x45d   :  { %1186 = vsyncpa [#allocation14], 1 }
 0x45e   :  { %1188 = vsyncpa [#allocation14 + $0x1], 1 }
 0x45f   :  { %1189 = vsyncpa [#allocation17], 1 }
 0x460   :  { %1191 = vsyncpa [#allocation17 + $0x1], 1 }
 0x461   :  { %1192 = vsyncpa [#allocation22], 1 }
 0x462   :  { %1194 = vsyncpa [#allocation22 + $0x1], 1 }

// kernel: custom-call.25
= control target key start
LH: loop header
LB: loop body
LE: loop exit
PB: predicated region body
PF: predicated region fallthrough
CT: control target
= control target key end

     0   :  { %v292_v3 = vlaneseq  ;;  %v1743_v5 = vmov 0.0   ;;  %s281_s17 = smov [#allocation22]  ;;  %s284_s18 = smov [#allocation23]  ;;  %s2025_s0 = inlined_call_operand.vmem [shape: f32[2,2], index: 0, kind: input, shape index: {}]   ;;  %s2026_s1 = inlined_call_operand.vmem [shape: f32[2,2], index: 1, kind: input, shape index: {}]   ;;  %s2027_s2 = inlined_call_operand.vmem [shape: f32[2,2], index: 2, kind: input, shape index: {}]   ;;  %s2028_s3 = inlined_call_operand.vmem [shape: f32[2,2], index: 3, kind: input, shape index: {}]   ;;  %s2029_s4 = inlined_call_operand.vmem [shape: f32[2], index: 4, kind: output, shape index: {0}]   ;;  %s2030_s5 = inlined_call_operand.vmem [shape: f32[2], index: 5, kind: output, shape index: {1}]   ;;  %s2031_s6 = inlined_call_operand.vmem [shape: f32[2,2], index: 6, kind: output, shape index: {2}]   ;;  %s2032_s7 = inlined_call_operand.vmem [shape: f32[2,2], index: 7, kind: output, shape index: {3}]   ;;  %s2033_s8 = inlined_call_operand.vmem [shape: f32[2,2], index: 8, kind: output, shape index: {4}]   ;;  %s2034_s9 = inlined_call_operand.vmem [shape: f32[2,2], index: 9, kind: output, shape index: {5}]  }
   0x1   :  { %v71_v0 = vld [vmem:[%s2025_s0] sm:$0x3]  ;;  %287 = vst [vmem:[#allocation12] sm:$0xff] %v1743_v5  ;;  %288 = vst [vmem:[#allocation14] sm:$0xff] %v1743_v5  ;;  %s291_s0 = smov [#allocation12]  ;;  %s1441_s19 = smov [#allocation20] }
   0x2   :  { %v133_v1 = vld [vmem:[%s2026_s1] sm:$0x3]  ;;  %72 = vst [vmem:[#allocation1] sm:$0x3] %v71_v0  ;;  %289 = vst [vmem:[#allocation16] sm:$0xff] %v1743_v5  ;;  %v1808_v6 = vand.u32 127, %v292_v3 }
   0x3   :  { %v195_v2 = vld [vmem:[%s2027_s2] sm:$0x3]  ;;  %134 = vst [vmem:[#allocation3] sm:$0x3] %v133_v1  ;;  %290 = vst [vmem:[#allocation18] sm:$0xff] %v1743_v5  ;;  %v1810_v7 = vshrl.u32 %v292_v3, 7 }
   0x4   :  { %196 = vst [vmem:[#allocation5] sm:$0x3] %v195_v2  ;;  %v257_v4 = vld [vmem:[%s2028_s3] sm:$0x3]  ;;  %v294_v6 = vmov %v1808_v6  ;;  %s304_s1 = smov [#allocation18]  ;;  %s275_s2 = smov [#allocation20] }
   0x5   :  { %258 = vst [vmem:[#allocation7] sm:$0x3] %v257_v4  ;;  %v297_v7 = vmov %v1810_v7  ;;  %v307_v6 = vmov %v1808_v6  ;;  %s278_s3 = smov [#allocation21]  ;;  %vm1445_vm2 = vcmp.lt.s32.totalorder %v1808_v6, 2  ;;  %s1458_s20 = smov [#allocation21] }
   0x6   :  { %v310_v7 = vmov %v1810_v7  ;;  %vm301_vm0 = vcmp.eq.s32.totalorder %v297_v7, %v294_v6  ;;  %s1475_s21 = smov [#allocation22]  ;;  %s1492_s22 = smov [#allocation23] }
   0x7   :  { %vm314_vm1 = vcmp.eq.s32.totalorder %v310_v7, %v307_v6  ;;  %v1437_v6 = vmov %v1808_v6  ;;  %v1440_v7 = vmov %v1810_v7 }
   0x8   :  { %v298_v12 = vld [vmem:[%s291_s0] sm:$0x3]  ;;  %vm1450_vm3 = vcmp.eq.s32.totalorder %v1440_v7, %v1437_v6  ;;  %v1488_v6 = vmov %v1808_v6  ;;  %v1457_v7 = vmov %v1810_v7 }
   0x9   :  { %v261_v8 = vld [vmem:[#allocation1] sm:$0x3]  ;;  %v302_v14 = vsel %vm301_vm0, 1.0, %v298_v12  ;;  %v1454_v6 = vmov %v1808_v6  ;;  %v1491_v7 = vmov %v1810_v7 }
   0xa   :  { %v265_v9 = vld [vmem:[#allocation3] sm:$0x3]  ;;  %262 = vst [vmem:[#allocation0] sm:$0x3] %v261_v8  ;;  %v311_v13 = vld [vmem:[%s304_s1] sm:$0x3]  ;;  %v1471_v6 = vmov %v1808_v6  ;;  %v1474_v7 = vmov %v1810_v7  ;;  %vm1501_vm4 = vcmp.eq.s32.totalorder %v1491_v7, %v1488_v6 }
   0xb   :  { %v269_v10 = vld [vmem:[#allocation5] sm:$0x3]  ;;  %266 = vst [vmem:[#allocation2] sm:$0x3] %v265_v9  ;;  %v315_v15 = vsel %vm314_vm1, 1.0, %v311_v13  ;;  %303 = vst [vmem:[%s291_s0] sm:$0x3] %v302_v14 }
   0xc   :  { %270 = vst [vmem:[#allocation4] sm:$0x3] %v269_v10  ;;  %v273_v11 = vld [vmem:[#allocation7] sm:$0x3]  ;;  %316 = vst [vmem:[%s304_s1] sm:$0x3] %v315_v15 }
   0xd   :  { %274 = vst [vmem:[#allocation6] sm:$0x3] %v273_v11 }
  0x11   :  { %v276_v16 = vld [vmem:[#allocation0] sm:$0xff] }
  0x12   :  { %v279_v17 = vld [vmem:[#allocation2] sm:$0xff]  ;;  %277 = vst [vmem:[%s275_s2] sm:$0xff] %v276_v16 }
  0x13   :  { %v282_v18 = vld [vmem:[#allocation4] sm:$0xff]  ;;  %280 = vst [vmem:[%s278_s3] sm:$0xff] %v279_v17 }
  0x14   :  { %283 = vst [vmem:[%s281_s17] sm:$0xff] %v282_v18  ;;  %v285_v19 = vld [vmem:[#allocation6] sm:$0xff] }
  0x15   :  { %286 = vst [vmem:[%s284_s18] sm:$0xff] %v285_v19 }
  0x19   :  { %v1447_v20 = vld [vmem:[%s1441_s19] sm:$0x3] }
  0x1a   :  { %v1464_v21 = vld [vmem:[%s1458_s20] sm:$0x3]  ;;  %v1448_v22 = vsel %vm1445_vm2, %v1447_v20, 0.0 }
  0x1b   :  { %v1465_v23 = vsel %vm1445_vm2, %v1464_v21, 0.0  ;;  %v1481_v24 = vld [vmem:[%s1475_s21] sm:$0x3]  ;;  %v1449_v26 = vmul.f32 %v1448_v22, %v1448_v22 }
  0x1c   :  { %v1498_v25 = vld [vmem:[%s1492_s22] sm:$0x3]  ;;  %v1466_v27 = vmul.f32 %v1465_v23, %v1465_v23  ;;  %v1482_v28 = vsel %vm1445_vm2, %v1481_v24, 0.0 }
  0x1d   :  { %v1499_v29 = vsel %vm1445_vm2, %v1498_v25, 0.0  ;;  %v1483_v30 = vmul.f32 %v1482_v28, %v1482_v28  ;;  %v1451_v33 = vsel %vm1450_vm3, 0.0, %v1449_v26 }
  0x1e   :  { %v1468_v31 = vadd.f32 %v1466_v27, %v1449_v26  ;;  %v1500_v32 = vmul.f32 %v1499_v29, %v1499_v29  ;;  %v1467_v34 = vadd.f32 %v1466_v27, %v1451_v33 }
  0x20   :  { %v1485_v35 = vadd.f32 %v1483_v30, %v1468_v31  ;;  %v1484_v36 = vadd.f32 %v1483_v30, %v1467_v34  ;;  %v1502_v37 = vsel %vm1501_vm4, 0.0, %v1500_v32 }
  0x22   :  { %v1504_v38 = vadd.f32 %v1500_v32, %v1485_v35  ;;  %v1503_v39 = vadd.f32 %v1502_v37, %v1484_v36 }
  0x24   :  { %1505 = vadd.xlane.f32.xlu0 %v1504_v38 }
  0x28   :  { %1513 = vadd.xlane.f32.xlu0 %v1503_v39 }
  0xb1   :  { %v1506_v40 = vpop.xlane.xlu0 %1505 }
  0xb2   :  { %v1507_v41 = vrot.slane %v1506_v40, 4 }
  0xb4   :  { %v1508_v42 = vadd.f32 %v1507_v41, %v1506_v40 }
  0xb5   :  { %v1514_v43 = vpop.xlane.xlu0 %1513 }
  0xb6   :  { %v1509_v44 = vrot.slane %v1508_v42, 2  ;;  %v1515_v45 = vrot.slane %v1514_v43, 4 }
  0xb8   :  { %v1516_v46 = vadd.f32 %v1515_v45, %v1514_v43  ;;  %v1510_v47 = vadd.f32 %v1509_v44, %v1508_v42 }
  0xba   :  { %v1517_v48 = vrot.slane %v1516_v46, 2  ;;  %v1511_v50 = vrot.slane %v1510_v47, 1 }
  0xbc   :  { %v1518_v49 = vadd.f32 %v1517_v48, %v1516_v46  ;;  %v1512_v53 = vadd.f32 %v1511_v50, %v1510_v47 }
  0xbe   :  { %v1519_v51 = vrot.slane %v1518_v49, 1 }
  0xc0   :  { %v1520_v52 = vadd.f32 %v1519_v51, %v1518_v49 }
  0xc2   :  { %1692 = vpush %v1520_v52 }
  0xc3   :  { %1694 = vpush %v1512_v53 }
  0xf3   :  { %s1693_s23 = spop %1692 }
  0xf4   :  { %s1695_s24 = spop %1694 }
  0xf5   :  { %s1523_s25 = smul.f32 1e-10, %s1695_s24 }
  0xf7   :  { %p1524_p0 = scmp.le.f32.partialorder %s1693_s23, %s1523_s25 }
  0xf8   :  { %s1834_s26 = smov (!%p1524_p0), 0  }
  0xf9   :  { %1527 = sbr.rel (%p1524_p0) target bundleno = 931 (0x3a3), region = 440 }
 0x100 LB: > { %s1839_s27 = smov 0   ;;  %s1737_s26 = sphi %s1834_s26, %s2035_s26  }
 0x101 LB: >> { %s421_s28 = smov [#allocation20]  ;;  %v425_v6 = vmov %v1808_v6  ;;  %v428_v7 = vmov %v1810_v7  ;;  %s441_s29 = smov [#allocation21]  ;;  %vm744_vm14 = vcmp.eq.s32.totalorder %v1810_v7, 0  ;;  %vm756_vm15 = vcmp.eq.s32.totalorder %v1810_v7, 1  ;;  %s1741_s27 = sphi %s1839_s27, %s420_s27  }
 0x102   : >> { %v445_v6 = vmov %v1808_v6  ;;  %v448_v7 = vmov %v1810_v7  ;;  %v429_v54 = vld [vmem:[%s421_s28] sm:$0x3]  ;;  %vm432_vm5 = vcmp.eq.s32.totalorder %v428_v7, %v425_v6  ;;  %s461_s30 = smov [#allocation23]  ;;  %s422_s10 = smov [#allocation24] }
 0x103   : >> { %vm452_vm6 = vcmp.eq.s32.totalorder %v448_v7, %v445_v6  ;;  %v465_v6 = vmov %v1808_v6  ;;  %v468_v7 = vmov %v1810_v7  ;;  %v433_v55 = vsel %vm432_vm5, %v429_v54, 0.0  ;;  %v449_v56 = vld [vmem:[%s441_s29] sm:$0x3]  ;;  %s442_s11 = smov [#allocation25]  ;;  %s462_s12 = smov [#allocation26] }
 0x104   : >> { %vm472_vm7 = vcmp.eq.s32.totalorder %v468_v7, %v465_v6  ;;  %v434_v57 = vrot.slane %v433_v55, 4  ;;  %v453_v58 = vsel %vm452_vm6, %v449_v56, 0.0  ;;  %v469_v59 = vld [vmem:[%s461_s30] sm:$0x3]  ;;  %s485_s13 = smov [#allocation25]  ;;  %s483_s14 = smov [#allocation24]  ;;  %v534_v6 = vmov %v1808_v6 }
 0x105   : >> { %v454_v60 = vrot.slane %v453_v58, 4  ;;  %v473_v61 = vsel %vm472_vm7, %v469_v59, 0.0  ;;  %s487_s15 = smov [#allocation26]  ;;  %s522_s16 = smov [#allocation27]  ;;  %v537_v7 = vmov %v1810_v7  ;;  %v549_v6 = vmov %v1808_v6 }
 0x106   : >> { %v435_v62 = vadd.f32 %v434_v57, %v433_v55  ;;  %v474_v63 = vrot.slane %v473_v61, 4  ;;  %s524_s0 = smov [#allocation28]  ;;  %s481_s1 = smov [#allocation29]  ;;  %v552_v7 = vmov %v1810_v7  ;;  %vm539_vm12 = vcmp.eq.s32.totalorder %v537_v7, %v534_v6 }
 0x107   : >> { %v455_v0 = vadd.f32 %v454_v60, %v453_v58  ;;  %s482_s2 = smov [#allocation30]  ;;  %s526_s1 = smov %s481_s1  ;;  %vm554_vm13 = vcmp.eq.s32.totalorder %v552_v7, %v549_v6  ;;  %v647_v6 = vmov %v1808_v6  ;;  %v650_v7 = vmov %v1810_v7 }
 0x108   : >> { %v436_v1 = vrot.slane %v435_v62, 2  ;;  %v475_v2 = vadd.f32 %v474_v63, %v473_v61  ;;  %s528_s2 = smov %s482_s2  ;;  %s530_s3 = smov [#allocation29]  ;;  %v661_v6 = vmov %v1808_v6  ;;  %v664_v7 = vmov %v1810_v7 }
 0x109   : >> { %v456_v3 = vrot.slane %v455_v0, 2  ;;  %s545_s17 = smov [#allocation30]  ;;  %s543_s18 = smov [#allocation31]  ;;  %vm654_vm0 = vcmp.eq.s32.totalorder %v650_v7, %v647_v6  ;;  %v620_v6 = vmov %v1808_v6  ;;  %v623_v7 = vmov %v1810_v7 }
 0x10a   : >> { %v437_v4 = vadd.f32 %v436_v1, %v435_v62  ;;  %v476_v5 = vrot.slane %v475_v2, 2  ;;  %s560_s19 = smov [#allocation31]  ;;  %s1854_s20 = smov [#allocation20]  ;;  %v634_v6 = vmov %v1808_v6  ;;  %v637_v7 = vmov %v1810_v7 }
 0x10b   : >> { %v457_v8 = vadd.f32 %v456_v3, %v455_v0  ;;  %s558_s21 = smov [#allocation32]  ;;  %s1856_s22 = smov [#allocation21]  ;;  %v568_v53 = vld [vmem:[%s1854_s20] sm:$0x3]  ;;  %vm669_vm1 = vcmp.eq.s32.totalorder %v664_v7, %v661_v6  ;;  %vm628_vm3 = vcmp.eq.s32.totalorder %v623_v7, %v620_v6  ;;  %vm641_vm4 = vcmp.eq.s32.totalorder %v637_v7, %v634_v6 }
 0x10c   : >> { %v438_v9 = vrot.slane %v437_v4, 1  ;;  %v477_v10 = vadd.f32 %v476_v5, %v475_v2  ;;  %s1858_s23 = smov [#allocation22]  ;;  %s1860_s24 = smov [#allocation23]  ;;  %v569_v54 = vld [vmem:[%s1856_s22] sm:$0x3]  ;;  %vm683_vm5 = vcmp.eq.s32.totalorder %v1808_v6, 0 }
 0x10d   : >> { %v458_v11 = vrot.slane %v457_v8, 1  ;;  %s1862_s25 = smov [#allocation12]  ;;  %s1864_s28 = smov [#allocation14]  ;;  %v570_v55 = vld [vmem:[%s1858_s23] sm:$0x3]  ;;  %vm687_vm6 = vcmp.eq.s32.totalorder %v1808_v6, 1 }
 0x10e   : >> { %v439_v12 = vadd.f32 %v438_v9, %v437_v4  ;;  %v478_v13 = vrot.slane %v477_v10, 1  ;;  %s1866_s29 = smov [#allocation16]  ;;  %s784_s30 = smov [#allocation31]  ;;  %v571_v56 = vld [vmem:[%s1860_s24] sm:$0x3] }
 0x10f   : >> { %v459_v14 = vadd.f32 %v458_v11, %v457_v8  ;;  %v792_v57 = vld [vmem:[%s1862_s25] sm:$0x3]  ;;  %s420_s27 = sadd.s32 1, %s1741_s27  }
 0x110   : >> { %440 = vst [vmem:[%s422_s10] sm:$0x1] %v439_v12  ;;  %v479_v15 = vadd.f32 %v478_v13, %v477_v10  ;;  %s1870_s10 = smov [#allocation18]  ;;  %v793_v58 = vld [vmem:[%s1864_s28] sm:$0x3]  ;;  %p417_p1 = scmp.ge.s32.totalorder %s420_s27, 3  }
 0x111   : >> { %460 = vst [vmem:[%s442_s11] sm:$0x1] %v459_v14  ;;  %v794_v59 = vld [vmem:[%s1866_s29] sm:$0x3]  ;;  %s562_s11 = smov [#allocation32]  ;;  %v321_v6 = vmov (%p417_p1), %v1808_v6  ;;  %v324_v7 = vmov (%p417_p1), %v1810_v7 }
 0x112   : >> { %480 = vst [vmem:[%s462_s12] sm:$0x1] %v479_v15  ;;  %v795_v61 = vld [vmem:[%s1870_s10] sm:$0x3]  ;;  %s786_s12 = smov [#allocation32]  ;;  %v374_v6 = vmov (%p417_p1), %v1808_v6  ;;  %vm336_vm7 = vcmp.eq.s32.totalorder (%p417_p1), %v324_v7, %v321_v6  ;;  %v377_v7 = vmov (%p417_p1), %v1810_v7 }
 0x113   : > { %v340_v6 = vmov (%p417_p1), %v1808_v6  ;;  %v343_v7 = vmov (%p417_p1), %v1810_v7 }
 0x114   : > { %v357_v6 = vmov (%p417_p1), %v1808_v6  ;;  %v360_v7 = vmov (%p417_p1), %v1810_v7 }
 0x117   : >> { %v484_v18 = vld [vmem:[%s483_s14] sm:$0xff]  ;;  %s590_s14 = smov [#allocation30] }
 0x118   : >> { %v486_v16 = vld [vmem:[%s485_s13] sm:$0xff]  ;;  %v507_v31 = vand.u32 2147483647, %v484_v18  ;;  %s588_s13 = smov [#allocation29] }
 0x119   : >> { %v490_v17 = vmul.f32 2.0, %v486_v16  ;;  %v488_v19 = vld [vmem:[%s487_s15] sm:$0xff]  ;;  %v508_v36 = vand.u32 2147483647, %v486_v16  ;;  %s1886_s15 = smov [#allocation12] }
 0x11a   : >> { %v489_v20 = vsub.f32 %v488_v19, %v484_v18  ;;  %v509_v32 = vand.u32 2147483647, %v488_v19 }
 0x11b   : >> { %1719 = vrcp.f32 %v490_v17 }
 0x11c   : >> { %v510_v35 = vmin.f32 %v507_v31, %v509_v32 }
 0x11e   : >> { %v511_v37 = vmul.f32 1.1920929e-08, %v510_v35 }
 0x120   : >> { %vm512_vm11 = vcmp.le.f32.partialorder %v508_v36, %v511_v37 }
 0x125   : >> { %v1720_v21 = vpop.eup %1719 }
 0x126   : >> { %v492_v22 = vmul.f32 %v1720_v21, %v489_v20 }
 0x128   : >> { %v494_v23 = vmul.f32 %v492_v22, %v492_v22  ;;  %vm493_vm10 = vcmp.ge.f32.partialorder %v492_v22, 0.0 }
 0x12a   : >> { %v495_v24 = vadd.f32 1.0, %v494_v23 }
 0x12c   : >> { %1721 = vrsqrt.f32 %v495_v24  ;;  %vm498_vm8 = vcmp.eq.f32.partialorder %v495_v24, inf  ;;  %v501_v26 = vand.u32 2147483648, %v495_v24  ;;  %vm500_vm9 = vcmp.eq.f32.partialorder %v495_v24, 0.0 }
 0x136   : >> { %v1722_v25 = vpop.eup %1721 }
 0x137   : >> { %v497_v27 = vmul.f32 %v1722_v25, %v495_v24 }
 0x139   : >> { %v499_v28 = vsel %vm498_vm8, %v495_v24, %v497_v27  ;;  %vm389_vm8 = vcmp.eq.s32.totalorder (%p417_p1), %v377_v7, %v374_v6 }
 0x13a   : >> { %v502_v29 = vsel %vm500_vm9, %v501_v26, %v499_v28 }
 0x13b   : >> { %v503_v30 = vxor.u32 2147483648, %v502_v29 }
 0x13d   : >> { %v504_v33 = vsel %vm493_vm10, %v502_v29, %v503_v30 }
 0x13e   : >> { %v505_v34 = vadd.f32 %v504_v33, %v492_v22 }
 0x140   : >> { %1723 = vrcp.f32 %v505_v34 }
 0x14a   : >> { %v1724_v38 = vpop.eup %1723 }
 0x14b   : >> { %v513_v39 = vsel %vm512_vm11, 0.0, %v1724_v38 }
 0x14c   : >> { %v514_v40 = vmul.f32 %v513_v39, %v513_v39  ;;  %v518_v41 = vmul.f32 %v513_v39, %v486_v16 }
 0x14e   : >> { %v515_v42 = vadd.f32 1.0, %v514_v40  ;;  %v519_v43 = vsub.f32 %v484_v18, %v518_v41  ;;  %v521_v44 = vadd.f32 %v518_v41, %v488_v19 }
 0x150   : >> { %1725 = vrsqrt.f32 %v515_v42  ;;  %523 = vst [vmem:[%s522_s16] sm:$0xff] %v519_v43  ;;  %525 = vst [vmem:[%s524_s0] sm:$0xff] %v521_v44  ;;  %s1888_s16 = smov [#allocation22]  ;;  %s1890_s0 = smov [#allocation23] }
 0x15a   : >> { %v1726_v45 = vpop.eup %1725 }
 0x15b   : >> { %527 = vst [vmem:[%s526_s1] sm:$0xff] %v1726_v45  ;;  %v517_v46 = vmul.f32 %v1726_v45, %v513_v39  ;;  %s1892_s1 = smov [#allocation20] }
 0x15d   : >> { %529 = vst [vmem:[%s528_s2] sm:$0xff] %v517_v46  ;;  %s1894_s2 = smov [#allocation16] }
 0x162   : >> { %v531_v47 = vld [vmem:[%s530_s3] ss:$0 sm:$0xff]  ;;  %s1896_s3 = smov [#allocation14] }
 0x163   : >> { %v540_v48 = vsel %vm539_vm12, %v531_v47, 0.0  ;;  %v589_v27 = vld [vmem:[%s588_s13] ss:$0 sm:$0xff]  ;;  %s760_s13 = smov [#allocation21] }
 0x164   : >> { %541 = vadd.xlane.f32.xlu0 %v540_v48  ;;  %v546_v49 = vld [vmem:[%s545_s17] ss:$0 sm:$0xff]  ;;  %s1900_s17 = smov [#allocation18] }
 0x165   : >> { %v555_v50 = vsel %vm554_vm13, %v546_v49, 0.0  ;;  %v591_v28 = vld [vmem:[%s590_s14] ss:$0 sm:$0xff]  ;;  %s737_s14 = smov [#allocation22] }
 0x168   : >> { %556 = vadd.xlane.f32.xlu0 %v555_v50 }
 0x1f1   : >> { %v542_v51 = vpop.xlane.xlu0 %541 }
 0x1f2   : >> { %544 = vst [vmem:[%s543_s18] sm:$0xff] %v542_v51  ;;  %s1902_s18 = smov [#allocation21] }
 0x1f5   : >> { %v557_v52 = vpop.xlane.xlu0 %556 }
 0x1f6   : >> { %559 = vst [vmem:[%s558_s21] sm:$0xff] %v557_v52  ;;  %s657_s21 = smov [#allocation23] }
 0x1f9   : >> { %v561_v60 = vld [vmem:[%s560_s19] sm:$0xff]  ;;  %s658_s19 = smov [#allocation28] }
 0x1fa   : >> { %v785_v62 = vld [vmem:[%s784_s30] sm:$0xff]  ;;  %v572_v63 = vmul.f32 %v568_v53, %v561_v60  ;;  %v575_v0 = vmul.f32 %v569_v54, %v561_v60  ;;  %v579_v1 = vmul.f32 %v570_v55, %v561_v60  ;;  %v582_v2 = vmul.f32 %v571_v56, %v561_v60  ;;  %s673_s30 = smov [#allocation21] }
 0x1fb   : >> { %v796_v3 = vmul.f32 %v792_v57, %v785_v62  ;;  %v799_v4 = vmul.f32 %v793_v58, %v785_v62  ;;  %v803_v5 = vmul.f32 %v794_v59, %v785_v62  ;;  %v806_v8 = vmul.f32 %v795_v61, %v785_v62 }
 0x1fd   : >> { %v563_v9 = vld [vmem:[%s562_s11] sm:$0xff]  ;;  %s1947_s11 = smov [#allocation23] }
 0x1fe   : >> { %v787_v10 = vld [vmem:[%s786_s12] sm:$0xff]  ;;  %v573_v11 = vmul.f32 %v570_v55, %v563_v9  ;;  %v576_v12 = vmul.f32 %v571_v56, %v563_v9  ;;  %v578_v13 = vmul.f32 %v568_v53, %v563_v9  ;;  %v581_v14 = vmul.f32 %v569_v54, %v563_v9  ;;  %s736_s12 = smov [#allocation20] }
 0x1ff   : >> { %v797_v15 = vmul.f32 %v794_v59, %v787_v10  ;;  %v800_v16 = vmul.f32 %v795_v61, %v787_v10  ;;  %v802_v17 = vmul.f32 %v792_v57, %v787_v10  ;;  %v805_v18 = vmul.f32 %v793_v58, %v787_v10  ;;  %v665_v59 = vld [vmem:[%s658_s19] ss:$0 sm:$0xff] }
 0x200   : >> { %v574_v19 = vsub.f32 %v572_v63, %v573_v11  ;;  %v577_v20 = vsub.f32 %v575_v0, %v576_v12  ;;  %v580_v21 = vadd.f32 %v579_v1, %v578_v13  ;;  %v583_v22 = vadd.f32 %v582_v2, %v581_v14 }
 0x201   : >> { %v798_v23 = vsub.f32 %v796_v3, %v797_v15  ;;  %v801_v24 = vsub.f32 %v799_v4, %v800_v16  ;;  %v804_v25 = vadd.f32 %v803_v5, %v802_v17  ;;  %v807_v26 = vadd.f32 %v806_v8, %v805_v18 }
 0x202   : >> { %585 = vst [vmem:[%s1856_s22] sm:$0x3] %v577_v20  ;;  %587 = vst [vmem:[%s1860_s24] sm:$0x3] %v583_v22  ;;  %s617_s22 = smov [#allocation27]  ;;  %s631_s24 = smov [#allocation21] }
 0x203   : >> { %584 = vst [vmem:[%s1854_s20] sm:$0x3] %v574_v19  ;;  %586 = vst [vmem:[%s1858_s23] sm:$0x3] %v580_v21  ;;  %s644_s20 = smov [#allocation22]  ;;  %s616_s23 = smov [#allocation20]  ;;  %v624_v63 = vld [vmem:[%s617_s22] ss:$0 sm:$0xff] }
 0x204   : >> { %808 = vst [vmem:[%s1862_s25] sm:$0x3] %v798_v23  ;;  %809 = vst [vmem:[%s1864_s28] sm:$0x3] %v801_v24  ;;  %s1944_s25 = smov [#allocation22]  ;;  %s1744_s28 = smov 1  }
 0x205   : >> { %810 = vst [vmem:[%s1866_s29] sm:$0x3] %v804_v25  ;;  %811 = vst [vmem:[%s1870_s10] sm:$0x3] %v807_v26  ;;  %s672_s29 = smov [#allocation20]  ;;  %s1745_s10 = smov 127  }
 0x209   : >> { %v599_v30 = vld [vmem:[%s1890_s0] sm:$0x3] }
 0x20a   : >> { %v598_v29 = vld [vmem:[%s1888_s16] sm:$0x3]  ;;  %v607_v36 = vmul.f32 %v599_v30, %v591_v28  ;;  %v610_v42 = vmul.f32 %v599_v30, %v589_v27 }
 0x20b   : >> { %v596_v31 = vld [vmem:[%s1892_s1] sm:$0x3]  ;;  %v606_v35 = vmul.f32 %v598_v29, %v589_v27  ;;  %v609_v37 = vmul.f32 %v598_v29, %v591_v28 }
 0x20c   : >> { %v814_v32 = vld [vmem:[%s1886_s15] ss:$0 sm:$0xff]  ;;  %v1667_v34 = vld [vmem:[%s1886_s15 + $0x1] ss:$0 sm:$0xff]  ;;  %v600_v48 = vmul.f32 %v596_v31, %v589_v27  ;;  %v603_v49 = vmul.f32 %v596_v31, %v591_v28 }
 0x20d   : >> { %v1666_v33 = vld [vmem:[%s1886_s15 - $0x1] sm:$0x2]  ;;  %v1669_v40 = vld [vmem:[%s1894_s2 + $0x1] sm:$0x1]  ;;  %v608_v47 = vsub.f32 %v606_v35, %v607_v36  ;;  %v611_v53 = vadd.f32 %v610_v42, %v609_v37 }
 0x20e   : >> { %v821_v38 = vsel %vm744_vm14, %v814_v32, %v1666_v33  ;;  %v825_v39 = vld [vmem:[%s1894_s2] ss:$0 sm:$0xff]  ;;  %v833_v43 = vsel %vm756_vm15, %v1667_v34, %v1669_v40  ;;  %v1671_v45 = vld [vmem:[%s1896_s3 + $0x1] ss:$0 sm:$0xff] }
 0x20f   : >> { %v838_v41 = vld [vmem:[%s1896_s3] ss:$0 sm:$0xff]  ;;  %824 = vst [vmem:[%s1886_s15] sm:$0x3] %v821_v38  ;;  %835 = vst [vmem:[%s1894_s2] sm:$0x3] %v833_v43  ;;  %v1673_v51 = vld [vmem:[%s1900_s17 + $0x1] sm:$0x1] }
 0x210   : >> { %v1670_v44 = vld [vmem:[%s1896_s3 - $0x1] sm:$0x2]  ;;  %1668 = vst [vmem:[%s1886_s15 + $0x1] sm:$0x1] %v825_v39  ;;  %v857_v54 = vsel %vm756_vm15, %v1671_v45, %v1673_v51  ;;  %614 = vst [vmem:[%s1888_s16] sm:$0x3] %v608_v47  ;;  %s761_s15 = smov [#allocation23] }
 0x211   : >> { %v849_v46 = vld [vmem:[%s1900_s17] ss:$0 sm:$0xff]  ;;  %v845_v50 = vsel %vm744_vm14, %v838_v41, %v1670_v44  ;;  %615 = vst [vmem:[%s1890_s0] sm:$0x3] %v611_v53  ;;  %s860_s16 = sadd.s32 (%p417_p1), 1, %s1737_s26   ;;  %s325_s0 = smov (%p417_p1), [#allocation20] }
 0x212   : >> { %v597_v52 = vld [vmem:[%s1902_s18] sm:$0x3]  ;;  %848 = vst [vmem:[%s1896_s3] sm:$0x3] %v845_v50  ;;  %859 = vst [vmem:[%s1900_s17] sm:$0x3] %v857_v54  ;;  %s361_s2 = smov (%p417_p1), [#allocation22]  ;;  %p413_p2 = scmp.ge.s32.totalorder (%p417_p1), %s860_s16, 15 }
 0x213   : >> { %v601_v55 = vmul.f32 %v597_v52, %v591_v28  ;;  %v604_v56 = vmul.f32 %v597_v52, %v589_v27  ;;  %1672 = vst [vmem:[%s1896_s3 + $0x1] sm:$0x1] %v849_v46  ;;  %s378_s3 = smov (%p417_p1), [#allocation23]  ;;  %s2035_s26 = smov (%p417_p1), %s860_s16 }
 0x215   : >> { %v602_v57 = vsub.f32 %v600_v48, %v601_v55  ;;  %v605_v58 = vadd.f32 %v604_v56, %v603_v49 }
 0x217   : >> { %612 = vst [vmem:[%s1892_s1] sm:$0x3] %v602_v57  ;;  %613 = vst [vmem:[%s1902_s18] sm:$0x3] %v605_v58  ;;  %v651_v60 = vld [vmem:[%s644_s20] sm:$0x3]  ;;  %s344_s1 = smov (%p417_p1), [#allocation21] }
 0x218   : >> { %v655_v61 = vsel %vm654_vm0, 0.0, %v651_v60  ;;  %v666_v62 = vld [vmem:[%s657_s21] sm:$0x3] }
 0x219   : >> { %656 = vst [vmem:[%s644_s20] sm:$0x3] %v655_v61  ;;  %v670_v0 = vsel %vm669_vm1, %v665_v59, %v666_v62 }
 0x21a   : >> { %671 = vst [vmem:[%s657_s21] sm:$0x3] %v670_v0 }
 0x21e   : >> { %v625_v1 = vld [vmem:[%s616_s23] sm:$0x3] }
 0x21f   : >> { %v638_v2 = vld [vmem:[%s631_s24] sm:$0x3]  ;;  %v629_v3 = vsel %vm628_vm3, %v624_v63, %v625_v1 }
 0x220   : >> { %v642_v4 = vsel %vm641_vm4, 0.0, %v638_v2  ;;  %630 = vst [vmem:[%s616_s23] sm:$0x3] %v629_v3  ;;  %v710_v5 = vld [vmem:[%s1944_s25] sm:$0x3] }
 0x221   : >> { %643 = vst [vmem:[%s631_s24] sm:$0x3] %v642_v4  ;;  %711 = vrot.lane.b32.xlu0 %v710_v5, %s1744_s28  ;;  %v706_v11 = vld [vmem:[%s1947_s11] sm:$0x3] }
 0x222   : >> { %v727_v12 = vld [vmem:[%s1947_s11] sm:$0x3] }
 0x223   : >> { %v709_v30 = vld [vmem:[%s1944_s25] sm:$0x3] }
 0x227   : >> { %v678_v8 = vld [vmem:[%s672_s29] sm:$0x3] }
 0x228   : >> { %679 = vrot.lane.b32.xlu1 %v678_v8, %s1744_s28  ;;  %v674_v9 = vld [vmem:[%s673_s30] sm:$0x3] }
 0x229   : >> { %v695_v10 = vld [vmem:[%s673_s30] sm:$0x3] }
 0x22a   : >> { %v677_v18 = vld [vmem:[%s672_s29] sm:$0x3] }
 0x22c   : >> { %675 = vrot.lane.b32.xlu1 %v674_v9, %s1744_s28 }
 0x230   : >> { %696 = vrot.lane.b32.xlu1 %v695_v10, %s1745_s10 }
 0x234   : >> { %707 = vrot.lane.b32.xlu1 %v706_v11, %s1744_s28 }
 0x238   : >> { %728 = vrot.lane.b32.xlu1 %v727_v12, %s1745_s10 }
 0x293   : >> { %v712_v20 = vpop.permute.xlu0 %711 }
 0x294   : >> { %v716_v22 = vsel %vm683_vm5, %v710_v5, %v712_v20 }
 0x29a   : >> { %v680_v13 = vpop.permute.xlu1 %679 }
 0x29b   : >> { %v684_v14 = vsel %vm683_vm5, %v678_v8, %v680_v13 }
 0x29e   : >> { %v676_v15 = vpop.permute.xlu1 %675 }
 0x29f   : >> { %v688_v16 = vsel %vm687_vm6, %v676_v15, %v684_v14 }
 0x2a0   : >> { %v694_v17 = vsel %vm1445_vm2, %v688_v16, 0.0 }
 0x2a1   : >> { %702 = vst [vmem:[%s672_s29] sm:$0x3] %v694_v17 }
 0x2a2   : >> { %v697_v19 = vpop.permute.xlu1 %696 }
 0x2a3   : >> { %v701_v21 = vsel %vm687_vm6, %v677_v18, %v697_v19 }
 0x2a4   : >> { %703 = vst [vmem:[%s673_s30] sm:$0x3] %v701_v21 }
 0x2a6   : >> { %v708_v23 = vpop.permute.xlu1 %707 }
 0x2a7   : >> { %v720_v24 = vsel %vm687_vm6, %v708_v23, %v716_v22 }
 0x2a8   : >> { %v738_v25 = vld [vmem:[%s736_s12] ss:$0 sm:$0xff]  ;;  %v1659_v27 = vld [vmem:[%s736_s12 + $0x1] ss:$0 sm:$0xff]  ;;  %v726_v29 = vsel %vm1445_vm2, %v720_v24, 0.0 }
 0x2a9   : >> { %v1658_v26 = vld [vmem:[%s736_s12 - $0x1] sm:$0x2]  ;;  %734 = vst [vmem:[%s1944_s25] sm:$0x3] %v726_v29 }
 0x2aa   : >> { %v745_v28 = vsel %vm744_vm14, %v738_v25, %v1658_v26  ;;  %v729_v31 = vpop.permute.xlu1 %728 }
 0x2ab   : >> { %748 = vst [vmem:[%s736_s12] sm:$0x3] %v745_v28  ;;  %v762_v32 = vld [vmem:[%s760_s13] ss:$0 sm:$0xff]  ;;  %v1663_v34 = vld [vmem:[%s760_s13 + $0x1] ss:$0 sm:$0xff]  ;;  %v733_v35 = vsel %vm687_vm6, %v709_v30, %v729_v31 }
 0x2ac   : >> { %v1662_v33 = vld [vmem:[%s760_s13 - $0x1] sm:$0x2]  ;;  %735 = vst [vmem:[%s1947_s11] sm:$0x3] %v733_v35 }
 0x2ad   : >> { %v769_v36 = vsel %vm744_vm14, %v762_v32, %v1662_v33 }
 0x2ae   : >> { %772 = vst [vmem:[%s760_s13] sm:$0x3] %v769_v36 }
 0x2b0   : >> { %v749_v37 = vld [vmem:[%s737_s14] ss:$0 sm:$0xff]  ;;  %v1661_v38 = vld [vmem:[%s737_s14 + $0x1] sm:$0x1] }
 0x2b1   : >> { %1660 = vst [vmem:[%s736_s12 + $0x1] sm:$0x1] %v749_v37  ;;  %v757_v39 = vsel %vm756_vm15, %v1659_v27, %v1661_v38  ;;  %419 = sbr.rel (!%p417_p1) target bundleno = 257 (0x101), region = 435 }
 0x2b2   : >> { %759 = vst [vmem:[%s737_s14] sm:$0x3] %v757_v39 }
 0x2b3   : >> { %v773_v40 = vld [vmem:[%s761_s15] ss:$0 sm:$0xff]  ;;  %v1665_v41 = vld [vmem:[%s761_s15 + $0x1] sm:$0x1] }
 0x2b4   : >> { %1664 = vst [vmem:[%s760_s13 + $0x1] sm:$0x1] %v773_v40  ;;  %v781_v42 = vsel %vm756_vm15, %v1663_v34, %v1665_v41 }
 0x2b5   : >> { %783 = vst [vmem:[%s761_s15] sm:$0x3] %v781_v42 }
 0x2b8   : > { %v331_v43 = vld [vmem:[%s325_s0] sm:$0x3] }
 0x2b9   : > { %v332_v45 = vsel %vm1445_vm2, %v331_v43, 0.0  ;;  %v367_v47 = vld [vmem:[%s361_s2] sm:$0x3] }
 0x2ba   : > { %v333_v49 = vmul.f32 %v332_v45, %v332_v45  ;;  %v368_v51 = vsel %vm1445_vm2, %v367_v47, 0.0 }
 0x2bb   : > { %v350_v44 = vld [vmem:[%s344_s1] sm:$0x3]  ;;  %v369_v53 = vmul.f32 %v368_v51, %v368_v51 }
 0x2bc   : > { %v351_v46 = vsel %vm1445_vm2, %v350_v44, 0.0  ;;  %v384_v48 = vld [vmem:[%s378_s3] sm:$0x3]  ;;  %v337_v56 = vsel %vm336_vm7, 0.0, %v333_v49 }
 0x2bd   : > { %v352_v50 = vmul.f32 %v351_v46, %v351_v46  ;;  %v385_v52 = vsel %vm1445_vm2, %v384_v48, 0.0 }
 0x2be   : > { %v386_v55 = vmul.f32 %v385_v52, %v385_v52 }
 0x2bf   : > { %v354_v54 = vadd.f32 %v352_v50, %v333_v49  ;;  %v353_v57 = vadd.f32 %v352_v50, %v337_v56 }
 0x2c0   : > { %v390_v60 = vsel %vm389_vm8, 0.0, %v386_v55 }
 0x2c1   : > { %v371_v58 = vadd.f32 %v369_v53, %v354_v54  ;;  %v370_v59 = vadd.f32 %v369_v53, %v353_v57 }
 0x2c3   : > { %v392_v61 = vadd.f32 %v386_v55, %v371_v58  ;;  %v391_v62 = vadd.f32 %v390_v60, %v370_v59 }
 0x2c5   : > { %393 = vadd.xlane.f32.xlu0 %v392_v61 }
 0x2c9   : > { %401 = vadd.xlane.f32.xlu0 %v391_v62 }
 0x352   : > { %v394_v63 = vpop.xlane.xlu0 %393 }
 0x353   : > { %v395_v0 = vrot.slane %v394_v63, 4 }
 0x355   : > { %v396_v1 = vadd.f32 %v395_v0, %v394_v63 }
 0x356   : > { %v402_v2 = vpop.xlane.xlu0 %401 }
 0x357   : > { %v397_v3 = vrot.slane %v396_v1, 2  ;;  %v403_v4 = vrot.slane %v402_v2, 4 }
 0x359   : > { %v404_v5 = vadd.f32 %v403_v4, %v402_v2  ;;  %v398_v8 = vadd.f32 %v397_v3, %v396_v1 }
 0x35b   : > { %v405_v9 = vrot.slane %v404_v5, 2  ;;  %v399_v11 = vrot.slane %v398_v8, 1 }
 0x35d   : > { %v406_v10 = vadd.f32 %v405_v9, %v404_v5  ;;  %v400_v14 = vadd.f32 %v399_v11, %v398_v8 }
 0x35f   : > { %v407_v12 = vrot.slane %v406_v10, 1 }
 0x361   : > { %v408_v13 = vadd.f32 %v407_v12, %v406_v10 }
 0x363   : > { %1696 = vpush %v408_v13 }
 0x364   : > { %1698 = vpush %v400_v14 }
 0x394   : > { %s1697_s27 = spop %1696 }
 0x395   : > { %s1699_s17 = spop %1698 }
 0x396   : > { %s411_s18 = smul.f32 1e-10, %s1699_s17 }
 0x398   : > { %p412_p3 = scmp.le.f32.partialorder %s1697_s27, %s411_s18 }
 0x39a   : > { %p414_p4 = por %p413_p2, %p412_p3 }
 0x39c   :  { %862 = sbr.rel (!%p414_p4) target bundleno = 256 (0x100), region = 446 }
 0x3a3 PF:  { %s863_s19 = smov [#allocation20]  ;;  %v867_v6 = vmov %v1808_v6  ;;  %v870_v7 = vmov %v1810_v7  ;;  %v918_v15 = vld [vmem:[#allocation12] sm:$0x3]  ;;  %v924_v16 = vld [vmem:[#allocation14] sm:$0x3]  ;;  %s883_s20 = smov [#allocation23] }
 0x3a4   :  { %v887_v6 = vmov %v1808_v6  ;;  %v890_v7 = vmov %v1810_v7  ;;  %v871_v17 = vld [vmem:[%s863_s19] sm:$0x3]  ;;  %vm874_vm9 = vcmp.eq.s32.totalorder %v870_v7, %v867_v6  ;;  %920 = vst [vmem:[#allocation13] sm:$0x3] %v918_v15  ;;  %926 = vst [vmem:[#allocation15] sm:$0x3] %v924_v16 }
 0x3a5   :  { %vm894_vm10 = vcmp.eq.s32.totalorder %v890_v7, %v887_v6  ;;  %v930_v18 = vld [vmem:[#allocation16] sm:$0x3]  ;;  %v875_v19 = vsel %vm874_vm9, %v871_v17, 0.0  ;;  %v891_v20 = vld [vmem:[%s883_s20] sm:$0x3]  ;;  %s864_s30 = smov [#allocation8] }
 0x3a6   :  { %932 = vst [vmem:[#allocation17] sm:$0x3] %v930_v18  ;;  %v936_v21 = vld [vmem:[#allocation18] sm:$0x3]  ;;  %v876_v22 = vrot.slane %v875_v19, 4  ;;  %v895_v23 = vsel %vm894_vm10, %v891_v20, 0.0 }
 0x3a7   :  { %938 = vst [vmem:[#allocation19] sm:$0x3] %v936_v21  ;;  %v896_v24 = vrot.slane %v895_v23, 4 }
 0x3a8   :  { %v877_v25 = vadd.f32 %v876_v22, %v875_v19 }
 0x3a9   :  { %v897_v26 = vadd.f32 %v896_v24, %v895_v23 }
 0x3aa   :  { %v878_v27 = vrot.slane %v877_v25, 2 }
 0x3ab   :  { %v898_v28 = vrot.slane %v897_v26, 2  ;;  %v1127_v29 = vld [vmem:[#allocation13] sm:$0x3]  ;;  %v1189_v30 = vld [vmem:[#allocation15] sm:$0x3] }
 0x3ac   :  { %v879_v31 = vadd.f32 %v878_v27, %v877_v25  ;;  %1128 = vst [vmem:[%s2031_s6] sm:$0x3] %v1127_v29  ;;  %1190 = vst [vmem:[%s2032_s7] sm:$0x3] %v1189_v30  ;;  %s884_s6 = smov [#allocation10] }
 0x3ad   :  { %v1251_v6 = vld [vmem:[#allocation17] sm:$0x3]  ;;  %v899_v7 = vadd.f32 %v898_v28, %v897_v26 }
 0x3ae   :  { %1252 = vst [vmem:[%s2033_s8] sm:$0x3] %v1251_v6  ;;  %v1313_v32 = vld [vmem:[#allocation19] sm:$0x3]  ;;  %v880_v33 = vrot.slane %v879_v31, 1 }
 0x3af   :  { %1314 = vst [vmem:[%s2034_s9] sm:$0x3] %v1313_v32  ;;  %v900_v34 = vrot.slane %v899_v7, 1 }
 0x3b0   :  { %v881_v35 = vadd.f32 %v880_v33, %v879_v31 }
 0x3b1   :  { %v901_v36 = vadd.f32 %v900_v34, %v899_v7 }
 0x3b2   :  { %882 = vst [vmem:[%s864_s30] sm:$0x1] %v881_v35 }
 0x3b3   :  { %902 = vst [vmem:[%s884_s6] sm:$0x1] %v901_v36 }
 0x3b9   :  { %v906_v37 = vld [vmem:[#allocation8] sm:$0x1] }
 0x3ba   :  { %908 = vst [vmem:[#allocation9] sm:$0x1] %v906_v37  ;;  %v912_v38 = vld [vmem:[#allocation10] sm:$0x1] }
 0x3bb   :  { %914 = vst [vmem:[#allocation11] sm:$0x1] %v912_v38 }
 0x3c1   :  { %v1001_v39 = vld [vmem:[#allocation9] sm:$0x1] }
 0x3c2   :  { %1002 = vst [vmem:[%s2029_s4] sm:$0x1] %v1001_v39  ;;  %v1065_v40 = vld [vmem:[#allocation11] sm:$0x1] }
 0x3c3   :  { %1066 = vst [vmem:[%s2030_s5] sm:$0x1] %v1065_v40 }

// kernel: custom-call.26
= control target key start
LH: loop header
LB: loop body
LE: loop exit
PB: predicated region body
PF: predicated region fallthrough
CT: control target
= control target key end

     0   :  { %s1704_s30 = smov 0   ;;  %s1706_s10 = smov 0   ;;  %s2030_s0 = inlined_call_operand.vmem [shape: f32[2,2,2], index: 0, kind: input, shape index: {}]   ;;  %s2031_s1 = inlined_call_operand.vmem [shape: f32[2,2,2], index: 1, kind: input, shape index: {}]   ;;  %s2032_s2 = inlined_call_operand.vmem [shape: f32[2,2,2], index: 2, kind: input, shape index: {}]   ;;  %s2033_s3 = inlined_call_operand.vmem [shape: f32[2,2,2], index: 3, kind: input, shape index: {}]   ;;  %s2034_s4 = inlined_call_operand.vmem [shape: f32[2,2], index: 4, kind: output, shape index: {0}]   ;;  %s2035_s5 = inlined_call_operand.vmem [shape: f32[2,2], index: 5, kind: output, shape index: {1}]   ;;  %s2036_s6 = inlined_call_operand.vmem [shape: f32[2,2,2], index: 6, kind: output, shape index: {2}]   ;;  %s2037_s7 = inlined_call_operand.vmem [shape: f32[2,2,2], index: 7, kind: output, shape index: {3}]   ;;  %s2038_s8 = inlined_call_operand.vmem [shape: f32[2,2,2], index: 8, kind: output, shape index: {4}]   ;;  %s2039_s9 = inlined_call_operand.vmem [shape: f32[2,2,2], index: 9, kind: output, shape index: {5}]  }
   0x1   :  { %s1708_s11 = smov 0  }
   0x2 LB: > { %s1720_s12 = sadd.s32 4294967295, %s1641_s11   ;;  %s1723_s13 = sadd.s32 1, %s1641_s11   ;;  %s1641_s11 = sphi %s1708_s11, %s2058_s11   ;;  %s1637_s10 = sphi %s1706_s10, %s2057_s10   ;;  %s1633_s30 = sphi %s1704_s30, %s2056_s30  }
   0x3   : > { %s20_s14 = sshrl.u32 %s1641_s11, 3  ;;  %s21_s15 = sshrl.u32 %s1723_s13, 3 }
   0x4   : > { %s22_s16 = ssub.s32 %s20_s14, %s21_s15  ;;  %s25_s17 = sadd.s32 1, %s1637_s10 }
   0x5   : > { %p23_p0 = scmp.eq.s32.totalorder %s22_s16, 0  ;;  %p35_p1 = scmp.ne.s32.totalorder %s1637_s10, %s1633_s30 }
   0x6   : > { %p36_p2 = scmp.eq.s32.totalorder %s1720_s12, 1  ;;  %p1502_p4 = scmp.ge.s32.totalorder %s1641_s11, 2 }
   0x7   : > { %s1732_s18 = scalar_select %p23_p0, %s1637_s10, %s25_s17  }
   0x8   : > { %p1734_p3 = por %p36_p2, %p35_p1  ;;  %86 = sbr.rel (%p1502_p4) target bundleno = 17 (0x11), region = 16 }
   0x9   : > { %2040 = sst [smem:[#allocation33_spill]] %s1732_s18  ;;  %s88_s20 = sand.u32 (!%p1502_p4), 1, %s1641_s11  }
   0xa   : > { %s1504_s21 = sshll.u32 (!%p1502_p4), %s1641_s11, 1  ;;  %s1503_s22 = sshll.u32 (!%p1502_p4), %s88_s20, 1 }
   0xb   : > { %s92_s25 = scalar_lea.vmem (!%p1502_p4), %s2030_s0, %s1504_s21  ;;  %s90_s26 = scalar_lea.vmem (!%p1502_p4), [#allocation1], %s1503_s22 }
   0xc   : > { %v108_v0 = vld [vmem:[%s92_s25] sm:$0x3] (!%p1502_p4)  ;;  %s129_s29 = scalar_lea.vmem (!%p1502_p4), %s2031_s1, %s1504_s21  ;;  %s166_s16 = scalar_lea.vmem (!%p1502_p4), %s2032_s2, %s1504_s21 }
   0xd   : > { %109 = vst [vmem:[%s90_s26] sm:$0x3] (!%p1502_p4), %v108_v0  ;;  %v145_v1 = vld [vmem:[%s129_s29] sm:$0x3] (!%p1502_p4)  ;;  %s127_s17 = scalar_lea.vmem (!%p1502_p4), [#allocation3], %s1503_s22  ;;  %s203_s23 = scalar_lea.vmem (!%p1502_p4), %s2033_s3, %s1504_s21 }
   0xe   : > { %146 = vst [vmem:[%s127_s17] sm:$0x3] (!%p1502_p4), %v145_v1  ;;  %v182_v2 = vld [vmem:[%s166_s16] sm:$0x3] (!%p1502_p4)  ;;  %s164_s24 = scalar_lea.vmem (!%p1502_p4), [#allocation5], %s1503_s22  ;;  %s201_s25 = scalar_lea.vmem (!%p1502_p4), [#allocation7], %s1503_s22 }
   0xf   : > { %183 = vst [vmem:[%s164_s24] sm:$0x3] %v182_v2  ;;  %v219_v3 = vld [vmem:[%s203_s23] sm:$0x3] }
  0x10   : > { %220 = vst [vmem:[%s201_s25] sm:$0x3] %v219_v3 }
  0x11 PF: > { %p1511_p5 = scmp.ge.s32.totalorder %s1641_s11, 1  ;;  %p236_p6 = scmp.lt.s32.totalorder %s1641_s11, 3 }
  0x13   : > { %p237_p7 = pnand %p1511_p5, %p236_p6 }
  0x15   : > { %240 = sbr.rel (%p237_p7) target bundleno = 999 (0x3e7), region = 140 }
  0x1c   : > { %s259_s26 = sand.u32 1, %s1720_s12   ;;  %s277_s27 = sand.u32 1, %s1633_s30   ;;  %v337_v4 = vlaneseq  ;;  %v1651_v5 = vmov 0.0  }
  0x1d   : > { %s1757_s28 = sshll.u32 %s259_s26, 1  ;;  %s1759_s18 = sshll.u32 %s277_s27, 1  ;;  %332 = vst [vmem:[#allocation12] sm:$0xff] %v1651_v5  ;;  %333 = vst [vmem:[#allocation14] sm:$0xff] %v1651_v5 }
  0x1e   : > { %334 = vst [vmem:[#allocation16] sm:$0xff] %v1651_v5  ;;  %335 = vst [vmem:[#allocation18] sm:$0xff] %v1651_v5  ;;  %v1761_v6 = vand.u32 127, %v337_v4  ;;  %v1763_v7 = vshrl.u32 %v337_v4, 7  ;;  %s261_s11 = scalar_lea.vmem [#allocation1], %s1757_s28  ;;  %s265_s30 = scalar_lea.vmem [#allocation3], %s1757_s28 }
  0x1f   : > { %v304_v8 = vld [vmem:[%s261_s11] sm:$0x3]  ;;  %v308_v9 = vld [vmem:[%s265_s30] sm:$0x3]  ;;  %s269_s21 = scalar_lea.vmem [#allocation5], %s1757_s28  ;;  %s273_s22 = scalar_lea.vmem [#allocation7], %s1757_s28 }
  0x20   : > { %305 = vst [vmem:[#allocation0] sm:$0x3] %v304_v8  ;;  %309 = vst [vmem:[#allocation2] sm:$0x3] %v308_v9  ;;  %v312_v10 = vld [vmem:[%s269_s21] sm:$0x3]  ;;  %v339_v6 = vmov %v1761_v6  ;;  %v342_v7 = vmov %v1763_v7 }
  0x21   : > { %v316_v11 = vld [vmem:[%s273_s22] sm:$0x3]  ;;  %313 = vst [vmem:[#allocation4] sm:$0x3] %v312_v10  ;;  %v352_v6 = vmov %v1761_v6  ;;  %v355_v7 = vmov %v1763_v7  ;;  %s320_s29 = smov [#allocation20]  ;;  %s323_s14 = smov [#allocation21]  ;;  %vm346_vm0 = vcmp.eq.s32.totalorder %v342_v7, %v339_v6 }
  0x22   : > { %317 = vst [vmem:[#allocation6] sm:$0x3] %v316_v11  ;;  %vm359_vm1 = vcmp.eq.s32.totalorder %v355_v7, %v352_v6  ;;  %s336_s15 = smov [#allocation12]  ;;  %s349_s16 = smov [#allocation18]  ;;  %vm1391_vm2 = vcmp.lt.s32.totalorder %v1761_v6, 2  ;;  %v1383_v6 = vmov %v1761_v6  ;;  %v1386_v7 = vmov %v1763_v7 }
  0x23   : > { %s326_s17 = smov [#allocation22]  ;;  %s329_s20 = smov [#allocation23]  ;;  %vm1396_vm3 = vcmp.eq.s32.totalorder %v1386_v7, %v1383_v6  ;;  %v1434_v6 = vmov %v1761_v6  ;;  %v1403_v7 = vmov %v1763_v7 }
  0x24   : > { %v343_v12 = vld [vmem:[%s336_s15] sm:$0x3]  ;;  %s1387_s30 = smov [#allocation20]  ;;  %s1404_s21 = smov [#allocation21]  ;;  %v1400_v6 = vmov %v1761_v6  ;;  %v1437_v7 = vmov %v1763_v7 }
  0x25   : > { %v356_v13 = vld [vmem:[%s349_s16] sm:$0x3]  ;;  %v347_v16 = vsel %vm346_vm0, 1.0, %v343_v12  ;;  %s1421_s22 = smov [#allocation22]  ;;  %v1417_v6 = vmov %v1761_v6  ;;  %v1420_v7 = vmov %v1763_v7  ;;  %vm1447_vm4 = vcmp.eq.s32.totalorder %v1437_v7, %v1434_v6 }
  0x26   : > { %v360_v17 = vsel %vm359_vm1, 1.0, %v356_v13  ;;  %348 = vst [vmem:[%s336_s15] sm:$0x3] %v347_v16 }
  0x27   : > { %v321_v14 = vld [vmem:[#allocation0] sm:$0xff]  ;;  %v324_v15 = vld [vmem:[#allocation2] sm:$0xff]  ;;  %361 = vst [vmem:[%s349_s16] sm:$0x3] %v360_v17 }
  0x28   : > { %322 = vst [vmem:[%s320_s29] sm:$0xff] %v321_v14  ;;  %325 = vst [vmem:[%s323_s14] sm:$0xff] %v324_v15  ;;  %v327_v18 = vld [vmem:[#allocation4] sm:$0xff]  ;;  %s1438_s29 = smov [#allocation23] }
  0x29   : > { %v330_v19 = vld [vmem:[#allocation6] sm:$0xff]  ;;  %328 = vst [vmem:[%s326_s17] sm:$0xff] %v327_v18 }
  0x2a   : > { %331 = vst [vmem:[%s329_s20] sm:$0xff] %v330_v19 }
  0x2f   : > { %v1393_v20 = vld [vmem:[%s1387_s30] sm:$0x3] }
  0x30   : > { %v1410_v21 = vld [vmem:[%s1404_s21] sm:$0x3]  ;;  %v1394_v22 = vsel %vm1391_vm2, %v1393_v20, 0.0 }
  0x31   : > { %v1411_v23 = vsel %vm1391_vm2, %v1410_v21, 0.0  ;;  %v1427_v24 = vld [vmem:[%s1421_s22] sm:$0x3]  ;;  %v1395_v26 = vmul.f32 %v1394_v22, %v1394_v22 }
  0x32   : > { %v1444_v25 = vld [vmem:[%s1438_s29] sm:$0x3]  ;;  %v1412_v27 = vmul.f32 %v1411_v23, %v1411_v23  ;;  %v1428_v28 = vsel %vm1391_vm2, %v1427_v24, 0.0 }
  0x33   : > { %v1445_v29 = vsel %vm1391_vm2, %v1444_v25, 0.0  ;;  %v1429_v30 = vmul.f32 %v1428_v28, %v1428_v28  ;;  %v1397_v33 = vsel %vm1396_vm3, 0.0, %v1395_v26 }
  0x34   : > { %v1414_v31 = vadd.f32 %v1412_v27, %v1395_v26  ;;  %v1446_v32 = vmul.f32 %v1445_v29, %v1445_v29  ;;  %v1413_v34 = vadd.f32 %v1412_v27, %v1397_v33 }
  0x36   : > { %v1431_v35 = vadd.f32 %v1429_v30, %v1414_v31  ;;  %v1430_v36 = vadd.f32 %v1429_v30, %v1413_v34  ;;  %v1448_v37 = vsel %vm1447_vm4, 0.0, %v1446_v32 }
  0x38   : > { %v1450_v38 = vadd.f32 %v1446_v32, %v1431_v35  ;;  %v1449_v39 = vadd.f32 %v1448_v37, %v1430_v36 }
  0x3a   : > { %1451 = vadd.xlane.f32.xlu0 %v1450_v38 }
  0x3e   : > { %1459 = vadd.xlane.f32.xlu0 %v1449_v39 }
  0xc7   : > { %v1452_v40 = vpop.xlane.xlu0 %1451 }
  0xc8   : > { %v1453_v41 = vrot.slane %v1452_v40, 4 }
  0xca   : > { %v1454_v42 = vadd.f32 %v1453_v41, %v1452_v40 }
  0xcb   : > { %v1460_v43 = vpop.xlane.xlu0 %1459 }
  0xcc   : > { %v1455_v44 = vrot.slane %v1454_v42, 2  ;;  %v1461_v45 = vrot.slane %v1460_v43, 4 }
  0xce   : > { %v1462_v46 = vadd.f32 %v1461_v45, %v1460_v43  ;;  %v1456_v47 = vadd.f32 %v1455_v44, %v1454_v42 }
  0xd0   : > { %v1463_v48 = vrot.slane %v1462_v46, 2  ;;  %v1457_v50 = vrot.slane %v1456_v47, 1 }
  0xd2   : > { %v1464_v49 = vadd.f32 %v1463_v48, %v1462_v46  ;;  %v1458_v53 = vadd.f32 %v1457_v50, %v1456_v47 }
  0xd4   : > { %v1465_v51 = vrot.slane %v1464_v49, 1 }
  0xd6   : > { %v1466_v52 = vadd.f32 %v1465_v51, %v1464_v49 }
  0xd8   : > { %1552 = vpush %v1466_v52 }
  0xd9   : > { %1554 = vpush %v1458_v53 }
 0x109   : > { %s1553_s14 = spop %1552 }
 0x10a   : > { %s1555_s15 = spop %1554 }
 0x10b   : > { %s1469_s16 = smul.f32 1e-10, %s1555_s15 }
 0x10d   : > { %p1470_p8 = scmp.le.f32.partialorder %s1553_s14, %s1469_s16 }
 0x10e   : > { %s1797_s17 = smov (!%p1470_p8), 0  }
 0x10f   : > { %1473 = sbr.rel (%p1470_p8) target bundleno = 953 (0x3b9), region = 467 }
 0x116 LB: >> { %s1802_s20 = smov 0   ;;  %s1645_s17 = sphi %s1797_s17, %s2042_s17  }
 0x117 LB: >>> { %s466_s30 = smov [#allocation20]  ;;  %v470_v6 = vmov %v1761_v6  ;;  %v473_v7 = vmov %v1763_v7  ;;  %s486_s21 = smov [#allocation21]  ;;  %vm789_vm14 = vcmp.eq.s32.totalorder %v1763_v7, 0  ;;  %vm801_vm15 = vcmp.eq.s32.totalorder %v1763_v7, 1  ;;  %s1649_s20 = sphi %s1802_s20, %s465_s20  }
 0x118   : >>> { %v490_v6 = vmov %v1761_v6  ;;  %v493_v7 = vmov %v1763_v7  ;;  %v474_v54 = vld [vmem:[%s466_s30] sm:$0x3]  ;;  %vm477_vm5 = vcmp.eq.s32.totalorder %v473_v7, %v470_v6  ;;  %s506_s22 = smov [#allocation23]  ;;  %s467_s29 = smov [#allocation24] }
 0x119   : >>> { %vm497_vm6 = vcmp.eq.s32.totalorder %v493_v7, %v490_v6  ;;  %v510_v6 = vmov %v1761_v6  ;;  %v513_v7 = vmov %v1763_v7  ;;  %v478_v55 = vsel %vm477_vm5, %v474_v54, 0.0  ;;  %v494_v56 = vld [vmem:[%s486_s21] sm:$0x3]  ;;  %s487_s14 = smov [#allocation25]  ;;  %s507_s15 = smov [#allocation26] }
 0x11a   : >>> { %vm517_vm7 = vcmp.eq.s32.totalorder %v513_v7, %v510_v6  ;;  %v479_v57 = vrot.slane %v478_v55, 4  ;;  %v498_v58 = vsel %vm497_vm6, %v494_v56, 0.0  ;;  %v514_v59 = vld [vmem:[%s506_s22] sm:$0x3]  ;;  %s530_s16 = smov [#allocation25]  ;;  %s528_s30 = smov [#allocation24]  ;;  %v579_v6 = vmov %v1761_v6 }
 0x11b   : >>> { %v499_v60 = vrot.slane %v498_v58, 4  ;;  %v518_v61 = vsel %vm517_vm7, %v514_v59, 0.0  ;;  %s532_s21 = smov [#allocation26]  ;;  %s567_s22 = smov [#allocation27]  ;;  %v582_v7 = vmov %v1763_v7  ;;  %v594_v6 = vmov %v1761_v6 }
 0x11c   : >>> { %v480_v62 = vadd.f32 %v479_v57, %v478_v55  ;;  %v519_v63 = vrot.slane %v518_v61, 4  ;;  %v597_v7 = vmov %v1763_v7  ;;  %vm584_vm12 = vcmp.eq.s32.totalorder %v582_v7, %v579_v6  ;;  %s1821_s24 = smov [#allocation22]  ;;  %s1827_s23 = smov [#allocation14] }
 0x11d   : >>> { %v500_v0 = vadd.f32 %v499_v60, %v498_v58  ;;  %vm599_vm13 = vcmp.eq.s32.totalorder %v597_v7, %v594_v6  ;;  %s829_s11 = smov [#allocation31]  ;;  %s1833_s27 = smov [#allocation18]  ;;  %v615_v55 = vld [vmem:[%s1821_s24] sm:$0x3]  ;;  %v692_v6 = vmov %v1761_v6  ;;  %v695_v7 = vmov %v1763_v7 }
 0x11e   : >>> { %v481_v1 = vrot.slane %v480_v62, 2  ;;  %v520_v2 = vadd.f32 %v519_v63, %v518_v61  ;;  %v838_v58 = vld [vmem:[%s1827_s23] sm:$0x3]  ;;  %s607_s26 = smov [#allocation32]  ;;  %s831_s25 = smov [#allocation32]  ;;  %v706_v6 = vmov %v1761_v6  ;;  %v709_v7 = vmov %v1763_v7 }
 0x11f   : >>> { %v501_v3 = vrot.slane %v500_v0, 2  ;;  %v840_v61 = vld [vmem:[%s1833_s27] sm:$0x3]  ;;  %vm699_vm0 = vcmp.eq.s32.totalorder %v695_v7, %v692_v6  ;;  %v665_v6 = vmov %v1761_v6  ;;  %v668_v7 = vmov %v1763_v7  ;;  %s465_s20 = sadd.s32 1, %s1649_s20  }
 0x120   : >>> { %v482_v4 = vadd.f32 %v481_v1, %v480_v62  ;;  %v521_v5 = vrot.slane %v520_v2, 2  ;;  %v679_v6 = vmov %v1761_v6  ;;  %v682_v7 = vmov %v1763_v7  ;;  %p462_p9 = scmp.ge.s32.totalorder %s465_s20, 3  }
 0x121   : >>> { %v502_v8 = vadd.f32 %v501_v3, %v500_v0  ;;  %vm714_vm1 = vcmp.eq.s32.totalorder %v709_v7, %v706_v6  ;;  %vm673_vm3 = vcmp.eq.s32.totalorder %v668_v7, %v665_v6  ;;  %vm686_vm4 = vcmp.eq.s32.totalorder %v682_v7, %v679_v6 }
 0x122   : >>> { %v483_v9 = vrot.slane %v482_v4, 1  ;;  %v522_v10 = vadd.f32 %v521_v5, %v520_v2  ;;  %vm728_vm5 = vcmp.eq.s32.totalorder %v1761_v6, 0  ;;  %vm732_vm6 = vcmp.eq.s32.totalorder %v1761_v6, 1 }
 0x123   : >>> { %v503_v11 = vrot.slane %v502_v8, 1  ;;  %v366_v6 = vmov (%p462_p9), %v1761_v6  ;;  %v369_v7 = vmov (%p462_p9), %v1763_v7 }
 0x124   : >>> { %v484_v12 = vadd.f32 %v483_v9, %v482_v4  ;;  %v523_v13 = vrot.slane %v522_v10, 1  ;;  %v419_v6 = vmov (%p462_p9), %v1761_v6  ;;  %vm381_vm7 = vcmp.eq.s32.totalorder (%p462_p9), %v369_v7, %v366_v6 }
 0x125   : >>> { %v504_v14 = vadd.f32 %v503_v11, %v502_v8  ;;  %v422_v7 = vmov (%p462_p9), %v1763_v7  ;;  %v385_v6 = vmov (%p462_p9), %v1761_v6 }
 0x126   : >>> { %485 = vst [vmem:[%s467_s29] sm:$0x1] %v484_v12  ;;  %v524_v15 = vadd.f32 %v523_v13, %v522_v10  ;;  %s569_s29 = smov [#allocation28]  ;;  %v388_v7 = vmov (%p462_p9), %v1763_v7  ;;  %v402_v6 = vmov (%p462_p9), %v1761_v6 }
 0x127   : >>> { %505 = vst [vmem:[%s487_s14] sm:$0x1] %v504_v14  ;;  %s526_s14 = smov [#allocation29]  ;;  %v405_v7 = vmov (%p462_p9), %v1763_v7 }
 0x128   : >>> { %525 = vst [vmem:[%s507_s15] sm:$0x1] %v524_v15  ;;  %s527_s15 = smov [#allocation30]  ;;  %s571_s14 = smov %s526_s14 }
 0x129   : >>> { %s573_s15 = smov %s527_s15 }
 0x12d   : >>> { %v529_v18 = vld [vmem:[%s528_s30] sm:$0xff]  ;;  %s590_s30 = smov [#allocation30] }
 0x12e   : >>> { %v531_v16 = vld [vmem:[%s530_s16] sm:$0xff]  ;;  %v552_v31 = vand.u32 2147483647, %v529_v18  ;;  %s575_s16 = smov [#allocation29] }
 0x12f   : >>> { %v535_v17 = vmul.f32 2.0, %v531_v16  ;;  %v533_v19 = vld [vmem:[%s532_s21] sm:$0xff]  ;;  %v553_v36 = vand.u32 2147483647, %v531_v16  ;;  %s588_s21 = smov [#allocation31] }
 0x130   : >>> { %v534_v20 = vsub.f32 %v533_v19, %v529_v18  ;;  %v554_v32 = vand.u32 2147483647, %v533_v19 }
 0x131   : >>> { %1603 = vrcp.f32 %v535_v17 }
 0x132   : >>> { %v555_v35 = vmin.f32 %v552_v31, %v554_v32 }
 0x134   : >>> { %v556_v37 = vmul.f32 1.1920929e-08, %v555_v35 }
 0x136   : >>> { %vm557_vm11 = vcmp.le.f32.partialorder %v553_v36, %v556_v37 }
 0x13b   : >>> { %v1604_v21 = vpop.eup %1603 }
 0x13c   : >>> { %v537_v22 = vmul.f32 %v1604_v21, %v534_v20 }
 0x13e   : >>> { %v539_v23 = vmul.f32 %v537_v22, %v537_v22  ;;  %vm538_vm10 = vcmp.ge.f32.partialorder %v537_v22, 0.0 }
 0x140   : >>> { %v540_v24 = vadd.f32 1.0, %v539_v23 }
 0x142   : >>> { %1605 = vrsqrt.f32 %v540_v24  ;;  %vm543_vm8 = vcmp.eq.f32.partialorder %v540_v24, inf  ;;  %v546_v26 = vand.u32 2147483648, %v540_v24  ;;  %vm545_vm9 = vcmp.eq.f32.partialorder %v540_v24, 0.0 }
 0x14c   : >>> { %v1606_v25 = vpop.eup %1605 }
 0x14d   : >>> { %v542_v27 = vmul.f32 %v1606_v25, %v540_v24 }
 0x14f   : >>> { %v544_v28 = vsel %vm543_vm8, %v540_v24, %v542_v27  ;;  %vm434_vm8 = vcmp.eq.s32.totalorder (%p462_p9), %v422_v7, %v419_v6 }
 0x150   : >>> { %v547_v29 = vsel %vm545_vm9, %v546_v26, %v544_v28 }
 0x151   : >>> { %v548_v30 = vxor.u32 2147483648, %v547_v29 }
 0x153   : >>> { %v549_v33 = vsel %vm538_vm10, %v547_v29, %v548_v30 }
 0x154   : >>> { %v550_v34 = vadd.f32 %v549_v33, %v537_v22 }
 0x156   : >>> { %1607 = vrcp.f32 %v550_v34 }
 0x160   : >>> { %v1608_v38 = vpop.eup %1607 }
 0x161   : >>> { %v558_v39 = vsel %vm557_vm11, 0.0, %v1608_v38 }
 0x162   : >>> { %v559_v40 = vmul.f32 %v558_v39, %v558_v39  ;;  %v563_v41 = vmul.f32 %v558_v39, %v531_v16 }
 0x164   : >>> { %v560_v42 = vadd.f32 1.0, %v559_v40  ;;  %v564_v43 = vsub.f32 %v529_v18, %v563_v41  ;;  %v566_v44 = vadd.f32 %v563_v41, %v533_v19 }
 0x166   : >>> { %1609 = vrsqrt.f32 %v560_v42  ;;  %568 = vst [vmem:[%s567_s22] sm:$0xff] %v564_v43  ;;  %570 = vst [vmem:[%s569_s29] sm:$0xff] %v566_v44  ;;  %s605_s22 = smov [#allocation31]  ;;  %s1817_s29 = smov [#allocation20] }
 0x167   : >>> { %v613_v53 = vld [vmem:[%s1817_s29] sm:$0x3] }
 0x170   : >>> { %v1610_v45 = vpop.eup %1609 }
 0x171   : >>> { %572 = vst [vmem:[%s571_s14] sm:$0xff] %v1610_v45  ;;  %v562_v46 = vmul.f32 %v1610_v45, %v558_v39  ;;  %s603_s14 = smov [#allocation32] }
 0x173   : >>> { %574 = vst [vmem:[%s573_s15] sm:$0xff] %v562_v46  ;;  %s1819_s15 = smov [#allocation21] }
 0x174   : >>> { %v614_v54 = vld [vmem:[%s1819_s15] sm:$0x3] }
 0x178   : >>> { %v576_v47 = vld [vmem:[%s575_s16] ss:$0 sm:$0xff]  ;;  %s1823_s16 = smov [#allocation23] }
 0x179   : >>> { %v585_v48 = vsel %vm584_vm12, %v576_v47, 0.0  ;;  %v616_v56 = vld [vmem:[%s1823_s16] sm:$0x3] }
 0x17a   : >>> { %586 = vadd.xlane.f32.xlu0 %v585_v48  ;;  %v591_v49 = vld [vmem:[%s590_s30] ss:$0 sm:$0xff]  ;;  %s1825_s30 = smov [#allocation12] }
 0x17b   : >>> { %v600_v50 = vsel %vm599_vm13, %v591_v49, 0.0  ;;  %v837_v57 = vld [vmem:[%s1825_s30] sm:$0x3] }
 0x17e   : >>> { %601 = vadd.xlane.f32.xlu0 %v600_v50 }
 0x207   : >>> { %v587_v51 = vpop.xlane.xlu0 %586 }
 0x208   : >>> { %589 = vst [vmem:[%s588_s21] sm:$0xff] %v587_v51  ;;  %s1829_s21 = smov [#allocation16] }
 0x209   : >>> { %v839_v59 = vld [vmem:[%s1829_s21] sm:$0x3] }
 0x20b   : >>> { %v602_v52 = vpop.xlane.xlu0 %601 }
 0x20c   : >>> { %604 = vst [vmem:[%s603_s14] sm:$0xff] %v602_v52  ;;  %s1853_s14 = smov [#allocation23] }
 0x20f   : >>> { %v606_v60 = vld [vmem:[%s605_s22] sm:$0xff]  ;;  %s1851_s22 = smov [#allocation22] }
 0x210   : >>> { %v830_v62 = vld [vmem:[%s829_s11] sm:$0xff]  ;;  %v617_v63 = vmul.f32 %v613_v53, %v606_v60  ;;  %v620_v0 = vmul.f32 %v614_v54, %v606_v60  ;;  %v624_v1 = vmul.f32 %v615_v55, %v606_v60  ;;  %v627_v2 = vmul.f32 %v616_v56, %v606_v60  ;;  %s1849_s11 = smov [#allocation12] }
 0x211   : >>> { %v841_v3 = vmul.f32 %v837_v57, %v830_v62  ;;  %v844_v4 = vmul.f32 %v838_v58, %v830_v62  ;;  %v848_v5 = vmul.f32 %v839_v59, %v830_v62  ;;  %v851_v8 = vmul.f32 %v840_v61, %v830_v62 }
 0x213   : >>> { %v608_v9 = vld [vmem:[%s607_s26] sm:$0xff]  ;;  %s635_s26 = smov [#allocation30] }
 0x214   : >>> { %v832_v10 = vld [vmem:[%s831_s25] sm:$0xff]  ;;  %v618_v11 = vmul.f32 %v615_v55, %v608_v9  ;;  %v621_v12 = vmul.f32 %v616_v56, %v608_v9  ;;  %v623_v13 = vmul.f32 %v613_v53, %v608_v9  ;;  %v626_v14 = vmul.f32 %v614_v54, %v608_v9  ;;  %s633_s25 = smov [#allocation29] }
 0x215   : >>> { %v842_v15 = vmul.f32 %v839_v59, %v832_v10  ;;  %v845_v16 = vmul.f32 %v840_v61, %v832_v10  ;;  %v847_v17 = vmul.f32 %v837_v57, %v832_v10  ;;  %v850_v18 = vmul.f32 %v838_v58, %v832_v10  ;;  %v634_v27 = vld [vmem:[%s633_s25] ss:$0 sm:$0xff]  ;;  %s662_s25 = smov [#allocation27] }
 0x216   : >>> { %v619_v19 = vsub.f32 %v617_v63, %v618_v11  ;;  %v622_v20 = vsub.f32 %v620_v0, %v621_v12  ;;  %v625_v21 = vadd.f32 %v624_v1, %v623_v13  ;;  %v628_v22 = vadd.f32 %v627_v2, %v626_v14  ;;  %v636_v28 = vld [vmem:[%s635_s26] ss:$0 sm:$0xff]  ;;  %s661_s26 = smov [#allocation20] }
 0x217   : >>> { %v843_v23 = vsub.f32 %v841_v3, %v842_v15  ;;  %v846_v24 = vsub.f32 %v844_v4, %v845_v16  ;;  %v849_v25 = vadd.f32 %v848_v5, %v847_v17  ;;  %v852_v26 = vadd.f32 %v851_v8, %v850_v18  ;;  %v669_v63 = vld [vmem:[%s662_s25] ss:$0 sm:$0xff]  ;;  %s905_s25 = sadd.s32 (%p462_p9), 1, %s1645_s17  }
 0x218   : >>> { %630 = vst [vmem:[%s1819_s15] sm:$0x3] %v622_v20  ;;  %632 = vst [vmem:[%s1823_s16] sm:$0x3] %v628_v22  ;;  %s1855_s15 = smov [#allocation20]  ;;  %s703_s16 = smov [#allocation28] }
 0x219   : >>> { %629 = vst [vmem:[%s1817_s29] sm:$0x3] %v619_v19  ;;  %631 = vst [vmem:[%s1821_s24] sm:$0x3] %v625_v21  ;;  %s1857_s24 = smov [#allocation16]  ;;  %s1865_s29 = smov [#allocation21]  ;;  %v710_v59 = vld [vmem:[%s703_s16] ss:$0 sm:$0xff] }
 0x21a   : >>> { %853 = vst [vmem:[%s1825_s30] sm:$0x3] %v843_v23  ;;  %854 = vst [vmem:[%s1827_s23] sm:$0x3] %v846_v24  ;;  %s1859_s23 = smov [#allocation14]  ;;  %s689_s30 = smov [#allocation22] }
 0x21b   : >>> { %855 = vst [vmem:[%s1829_s21] sm:$0x3] %v849_v25  ;;  %856 = vst [vmem:[%s1833_s27] sm:$0x3] %v852_v26  ;;  %s1863_s27 = smov [#allocation18]  ;;  %s702_s21 = smov [#allocation23] }
 0x21c   : >>> { %s805_s16 = smov [#allocation21]  ;;  %p458_p10 = scmp.ge.s32.totalorder (%p462_p9), %s905_s25, 15 }
 0x21d   : >> { %s2042_s17 = smov (%p462_p9), %s905_s25 }
 0x21f   : >>> { %v644_v30 = vld [vmem:[%s1853_s14] sm:$0x3] }
 0x220   : >>> { %v643_v29 = vld [vmem:[%s1851_s22] sm:$0x3]  ;;  %v652_v36 = vmul.f32 %v644_v30, %v636_v28  ;;  %v655_v42 = vmul.f32 %v644_v30, %v634_v27 }
 0x221   : >>> { %v641_v31 = vld [vmem:[%s1855_s15] sm:$0x3]  ;;  %v651_v35 = vmul.f32 %v643_v29, %v634_v27  ;;  %v654_v37 = vmul.f32 %v643_v29, %v636_v28 }
 0x222   : >>> { %v859_v32 = vld [vmem:[%s1849_s11] ss:$0 sm:$0xff]  ;;  %v1531_v34 = vld [vmem:[%s1849_s11 + $0x1] ss:$0 sm:$0xff]  ;;  %v645_v48 = vmul.f32 %v641_v31, %v634_v27  ;;  %v648_v49 = vmul.f32 %v641_v31, %v636_v28 }
 0x223   : >>> { %v1530_v33 = vld [vmem:[%s1849_s11 - $0x1] sm:$0x2]  ;;  %v1533_v40 = vld [vmem:[%s1857_s24 + $0x1] sm:$0x1]  ;;  %v653_v47 = vsub.f32 %v651_v35, %v652_v36  ;;  %v656_v53 = vadd.f32 %v655_v42, %v654_v37 }
 0x224   : >>> { %v866_v38 = vsel %vm789_vm14, %v859_v32, %v1530_v33  ;;  %v870_v39 = vld [vmem:[%s1857_s24] ss:$0 sm:$0xff]  ;;  %v878_v43 = vsel %vm801_vm15, %v1531_v34, %v1533_v40  ;;  %v1535_v45 = vld [vmem:[%s1859_s23 + $0x1] ss:$0 sm:$0xff] }
 0x225   : >>> { %v883_v41 = vld [vmem:[%s1859_s23] ss:$0 sm:$0xff]  ;;  %869 = vst [vmem:[%s1849_s11] sm:$0x3] %v866_v38  ;;  %880 = vst [vmem:[%s1857_s24] sm:$0x3] %v878_v43  ;;  %v1537_v51 = vld [vmem:[%s1863_s27 + $0x1] sm:$0x1] }
 0x226   : >>> { %v1534_v44 = vld [vmem:[%s1859_s23 - $0x1] sm:$0x2]  ;;  %1532 = vst [vmem:[%s1849_s11 + $0x1] sm:$0x1] %v870_v39  ;;  %v902_v54 = vsel %vm801_vm15, %v1535_v45, %v1537_v51  ;;  %659 = vst [vmem:[%s1851_s22] sm:$0x3] %v653_v47  ;;  %s676_s11 = smov [#allocation21] }
 0x227   : >>> { %v894_v46 = vld [vmem:[%s1863_s27] ss:$0 sm:$0xff]  ;;  %v890_v50 = vsel %vm789_vm14, %v883_v41, %v1534_v44  ;;  %660 = vst [vmem:[%s1853_s14] sm:$0x3] %v656_v53  ;;  %s1907_s22 = smov [#allocation22]  ;;  %s1652_s14 = smov 1  }
 0x228   : >>> { %v642_v52 = vld [vmem:[%s1865_s29] sm:$0x3]  ;;  %893 = vst [vmem:[%s1859_s23] sm:$0x3] %v890_v50  ;;  %904 = vst [vmem:[%s1863_s27] sm:$0x3] %v902_v54  ;;  %s718_s24 = smov [#allocation21]  ;;  %s1910_s27 = smov [#allocation23] }
 0x229   : >>> { %v646_v55 = vmul.f32 %v642_v52, %v636_v28  ;;  %v649_v56 = vmul.f32 %v642_v52, %v634_v27  ;;  %1536 = vst [vmem:[%s1859_s23 + $0x1] sm:$0x1] %v894_v46  ;;  %s1653_s23 = smov 127  }
 0x22b   : >>> { %v647_v57 = vsub.f32 %v645_v48, %v646_v55  ;;  %v650_v58 = vadd.f32 %v649_v56, %v648_v49 }
 0x22d   : >>> { %657 = vst [vmem:[%s1855_s15] sm:$0x3] %v647_v57  ;;  %658 = vst [vmem:[%s1865_s29] sm:$0x3] %v650_v58  ;;  %v696_v60 = vld [vmem:[%s689_s30] sm:$0x3]  ;;  %s717_s15 = smov [#allocation20]  ;;  %s781_s29 = smov [#allocation20] }
 0x22e   : >>> { %v700_v61 = vsel %vm699_vm0, 0.0, %v696_v60  ;;  %v711_v62 = vld [vmem:[%s702_s21] sm:$0x3] }
 0x22f   : >>> { %701 = vst [vmem:[%s689_s30] sm:$0x3] %v700_v61  ;;  %v715_v0 = vsel %vm714_vm1, %v710_v59, %v711_v62  ;;  %s782_s30 = smov [#allocation22] }
 0x230   : >>> { %716 = vst [vmem:[%s702_s21] sm:$0x3] %v715_v0  ;;  %s806_s21 = smov [#allocation23] }
 0x234   : >>> { %v670_v1 = vld [vmem:[%s661_s26] sm:$0x3] }
 0x235   : >>> { %v683_v2 = vld [vmem:[%s676_s11] sm:$0x3]  ;;  %v674_v3 = vsel %vm673_vm3, %v669_v63, %v670_v1 }
 0x236   : >>> { %v687_v4 = vsel %vm686_vm4, 0.0, %v683_v2  ;;  %675 = vst [vmem:[%s661_s26] sm:$0x3] %v674_v3  ;;  %v755_v5 = vld [vmem:[%s1907_s22] sm:$0x3]  ;;  %s370_s26 = smov (%p462_p9), [#allocation20] }
 0x237   : >>> { %688 = vst [vmem:[%s676_s11] sm:$0x3] %v687_v4  ;;  %756 = vrot.lane.b32.xlu0 %v755_v5, %s1652_s14  ;;  %v751_v11 = vld [vmem:[%s1910_s27] sm:$0x3]  ;;  %s389_s11 = smov (%p462_p9), [#allocation21] }
 0x238   : >>> { %v772_v12 = vld [vmem:[%s1910_s27] sm:$0x3] }
 0x239   : >>> { %v754_v30 = vld [vmem:[%s1907_s22] sm:$0x3] }
 0x23d   : >>> { %v723_v8 = vld [vmem:[%s717_s15] sm:$0x3] }
 0x23e   : >>> { %724 = vrot.lane.b32.xlu1 %v723_v8, %s1652_s14  ;;  %v719_v9 = vld [vmem:[%s718_s24] sm:$0x3] }
 0x23f   : >>> { %v740_v10 = vld [vmem:[%s718_s24] sm:$0x3] }
 0x240   : >>> { %v722_v18 = vld [vmem:[%s717_s15] sm:$0x3] }
 0x242   : >>> { %720 = vrot.lane.b32.xlu1 %v719_v9, %s1652_s14 }
 0x246   : >>> { %741 = vrot.lane.b32.xlu1 %v740_v10, %s1653_s23 }
 0x24a   : >>> { %752 = vrot.lane.b32.xlu1 %v751_v11, %s1652_s14  ;;  %s423_s14 = smov (%p462_p9), [#allocation23] }
 0x24e   : >>> { %773 = vrot.lane.b32.xlu1 %v772_v12, %s1653_s23 }
 0x2a9   : >>> { %v757_v20 = vpop.permute.xlu0 %756 }
 0x2aa   : >>> { %v761_v22 = vsel %vm728_vm5, %v755_v5, %v757_v20 }
 0x2b0   : >>> { %v725_v13 = vpop.permute.xlu1 %724 }
 0x2b1   : >>> { %v729_v14 = vsel %vm728_vm5, %v723_v8, %v725_v13 }
 0x2b4   : >>> { %v721_v15 = vpop.permute.xlu1 %720 }
 0x2b5   : >>> { %v733_v16 = vsel %vm732_vm6, %v721_v15, %v729_v14 }
 0x2b6   : >>> { %v739_v17 = vsel %vm1391_vm2, %v733_v16, 0.0 }
 0x2b7   : >>> { %747 = vst [vmem:[%s717_s15] sm:$0x3] %v739_v17 }
 0x2b8   : >>> { %v742_v19 = vpop.permute.xlu1 %741 }
 0x2b9   : >>> { %v746_v21 = vsel %vm732_vm6, %v722_v18, %v742_v19 }
 0x2ba   : >>> { %748 = vst [vmem:[%s718_s24] sm:$0x3] %v746_v21 }
 0x2bc   : >>> { %v753_v23 = vpop.permute.xlu1 %752 }
 0x2bd   : >>> { %v765_v24 = vsel %vm732_vm6, %v753_v23, %v761_v22 }
 0x2be   : >>> { %v783_v25 = vld [vmem:[%s781_s29] ss:$0 sm:$0xff]  ;;  %v1523_v27 = vld [vmem:[%s781_s29 + $0x1] ss:$0 sm:$0xff]  ;;  %v771_v29 = vsel %vm1391_vm2, %v765_v24, 0.0 }
 0x2bf   : >>> { %v1522_v26 = vld [vmem:[%s781_s29 - $0x1] sm:$0x2]  ;;  %779 = vst [vmem:[%s1907_s22] sm:$0x3] %v771_v29  ;;  %s406_s22 = smov (%p462_p9), [#allocation22] }
 0x2c0   : >>> { %v790_v28 = vsel %vm789_vm14, %v783_v25, %v1522_v26  ;;  %v774_v31 = vpop.permute.xlu1 %773 }
 0x2c1   : >>> { %793 = vst [vmem:[%s781_s29] sm:$0x3] %v790_v28  ;;  %v807_v32 = vld [vmem:[%s805_s16] ss:$0 sm:$0xff]  ;;  %v1527_v34 = vld [vmem:[%s805_s16 + $0x1] ss:$0 sm:$0xff]  ;;  %v778_v35 = vsel %vm732_vm6, %v754_v30, %v774_v31 }
 0x2c2   : >>> { %v1526_v33 = vld [vmem:[%s805_s16 - $0x1] sm:$0x2]  ;;  %780 = vst [vmem:[%s1910_s27] sm:$0x3] %v778_v35 }
 0x2c3   : >>> { %v814_v36 = vsel %vm789_vm14, %v807_v32, %v1526_v33 }
 0x2c4   : >>> { %817 = vst [vmem:[%s805_s16] sm:$0x3] %v814_v36 }
 0x2c6   : >>> { %v794_v37 = vld [vmem:[%s782_s30] ss:$0 sm:$0xff]  ;;  %v1525_v38 = vld [vmem:[%s782_s30 + $0x1] sm:$0x1] }
 0x2c7   : >>> { %1524 = vst [vmem:[%s781_s29 + $0x1] sm:$0x1] %v794_v37  ;;  %v802_v39 = vsel %vm801_vm15, %v1523_v27, %v1525_v38  ;;  %464 = sbr.rel (!%p462_p9) target bundleno = 279 (0x117), region = 462 }
 0x2c8   : >>> { %804 = vst [vmem:[%s782_s30] sm:$0x3] %v802_v39 }
 0x2c9   : >>> { %v818_v40 = vld [vmem:[%s806_s21] ss:$0 sm:$0xff]  ;;  %v1529_v41 = vld [vmem:[%s806_s21 + $0x1] sm:$0x1] }
 0x2ca   : >>> { %1528 = vst [vmem:[%s805_s16 + $0x1] sm:$0x1] %v818_v40  ;;  %v826_v42 = vsel %vm801_vm15, %v1527_v34, %v1529_v41 }
 0x2cb   : >>> { %828 = vst [vmem:[%s806_s21] sm:$0x3] %v826_v42 }
 0x2ce   : >> { %v376_v43 = vld [vmem:[%s370_s26] sm:$0x3] }
 0x2cf   : >> { %v377_v45 = vsel %vm1391_vm2, %v376_v43, 0.0  ;;  %v412_v47 = vld [vmem:[%s406_s22] sm:$0x3] }
 0x2d0   : >> { %v378_v49 = vmul.f32 %v377_v45, %v377_v45  ;;  %v413_v51 = vsel %vm1391_vm2, %v412_v47, 0.0 }
 0x2d1   : >> { %v395_v44 = vld [vmem:[%s389_s11] sm:$0x3]  ;;  %v414_v53 = vmul.f32 %v413_v51, %v413_v51 }
 0x2d2   : >> { %v396_v46 = vsel %vm1391_vm2, %v395_v44, 0.0  ;;  %v429_v48 = vld [vmem:[%s423_s14] sm:$0x3]  ;;  %v382_v56 = vsel %vm381_vm7, 0.0, %v378_v49 }
 0x2d3   : >> { %v397_v50 = vmul.f32 %v396_v46, %v396_v46  ;;  %v430_v52 = vsel %vm1391_vm2, %v429_v48, 0.0 }
 0x2d4   : >> { %v431_v55 = vmul.f32 %v430_v52, %v430_v52 }
 0x2d5   : >> { %v399_v54 = vadd.f32 %v397_v50, %v378_v49  ;;  %v398_v57 = vadd.f32 %v397_v50, %v382_v56 }
 0x2d6   : >> { %v435_v60 = vsel %vm434_vm8, 0.0, %v431_v55 }
 0x2d7   : >> { %v416_v58 = vadd.f32 %v414_v53, %v399_v54  ;;  %v415_v59 = vadd.f32 %v414_v53, %v398_v57 }
 0x2d9   : >> { %v437_v61 = vadd.f32 %v431_v55, %v416_v58  ;;  %v436_v62 = vadd.f32 %v435_v60, %v415_v59 }
 0x2db   : >> { %438 = vadd.xlane.f32.xlu0 %v437_v61 }
 0x2df   : >> { %446 = vadd.xlane.f32.xlu0 %v436_v62 }
 0x368   : >> { %v439_v63 = vpop.xlane.xlu0 %438 }
 0x369   : >> { %v440_v0 = vrot.slane %v439_v63, 4 }
 0x36b   : >> { %v441_v1 = vadd.f32 %v440_v0, %v439_v63 }
 0x36c   : >> { %v447_v2 = vpop.xlane.xlu0 %446 }
 0x36d   : >> { %v442_v3 = vrot.slane %v441_v1, 2  ;;  %v448_v4 = vrot.slane %v447_v2, 4 }
 0x36f   : >> { %v449_v5 = vadd.f32 %v448_v4, %v447_v2  ;;  %v443_v8 = vadd.f32 %v442_v3, %v441_v1 }
 0x371   : >> { %v450_v9 = vrot.slane %v449_v5, 2  ;;  %v444_v11 = vrot.slane %v443_v8, 1 }
 0x373   : >> { %v451_v10 = vadd.f32 %v450_v9, %v449_v5  ;;  %v445_v14 = vadd.f32 %v444_v11, %v443_v8 }
 0x375   : >> { %v452_v12 = vrot.slane %v451_v10, 1 }
 0x377   : >> { %v453_v13 = vadd.f32 %v452_v12, %v451_v10 }
 0x379   : >> { %1556 = vpush %v453_v13 }
 0x37a   : >> { %1558 = vpush %v445_v14 }
 0x3aa   : >> { %s1557_s20 = spop %1556 }
 0x3ab   : >> { %s1559_s15 = spop %1558 }
 0x3ac   : >> { %s456_s24 = smul.f32 1e-10, %s1559_s15 }
 0x3ae   : >> { %p457_p11 = scmp.le.f32.partialorder %s1557_s20, %s456_s24 }
 0x3b0   : >> { %p459_p12 = por %p458_p10, %p457_p11 }
 0x3b2   : > { %907 = sbr.rel (!%p459_p12) target bundleno = 278 (0x116), region = 473 }
 0x3b9 PF: > { %s912_s23 = smov [#allocation20]  ;;  %v916_v6 = vmov %v1761_v6  ;;  %v919_v7 = vmov %v1763_v7  ;;  %v967_v15 = vld [vmem:[#allocation12] sm:$0x3]  ;;  %v973_v16 = vld [vmem:[#allocation14] sm:$0x3]  ;;  %s2043_s17 = scalar_lea.vmem [#allocation13], %s1757_s28 }
 0x3ba   : > { %v936_v6 = vmov %v1761_v6  ;;  %v939_v7 = vmov %v1763_v7  ;;  %v920_v17 = vld [vmem:[%s912_s23] sm:$0x3]  ;;  %vm923_vm9 = vcmp.eq.s32.totalorder %v919_v7, %v916_v6  ;;  %969 = vst [vmem:[%s2043_s17] sm:$0x3] %v967_v15  ;;  %s2044_s27 = scalar_lea.vmem [#allocation15], %s1757_s28  ;;  %s932_s29 = smov [#allocation23] }
 0x3bb   : > { %vm943_vm10 = vcmp.eq.s32.totalorder %v939_v7, %v936_v6  ;;  %975 = vst [vmem:[%s2044_s27] sm:$0x3] %v973_v16  ;;  %v979_v18 = vld [vmem:[#allocation16] sm:$0x3]  ;;  %v924_v19 = vsel %vm923_vm9, %v920_v17, 0.0  ;;  %s2045_s16 = scalar_lea.vmem [#allocation17], %s1757_s28  ;;  %s2046_s30 = scalar_lea.vmem [#allocation19], %s1757_s28 }
 0x3bc   : > { %981 = vst [vmem:[%s2045_s16] sm:$0x3] %v979_v18  ;;  %v985_v20 = vld [vmem:[#allocation18] sm:$0x3]  ;;  %v925_v21 = vrot.slane %v924_v19, 4  ;;  %v940_v22 = vld [vmem:[%s932_s29] sm:$0x3] }
 0x3bd   : > { %987 = vst [vmem:[%s2046_s30] sm:$0x3] %v985_v20  ;;  %v944_v23 = vsel %vm943_vm10, %v940_v22, 0.0  ;;  %s908_s21 = sand.u32 7, %s1720_s12   ;;  %s2047_s11 = scalar_lea.vmem [#allocation9], %s1759_s18 }
 0x3be   : > { %v926_v24 = vadd.f32 %v925_v21, %v924_v19  ;;  %v945_v25 = vrot.slane %v944_v23, 4  ;;  %s909_s25 = scalar_lea.vmem [#allocation8], %s908_s21  ;;  %s911_s26 = scalar_lea.vmem [#allocation10], %s908_s21 }
 0x3bf   : > { %s913_s25 = smov %s909_s25  ;;  %s933_s26 = smov %s911_s26 }
 0x3c0   : > { %v927_v26 = vrot.slane %v926_v24, 2  ;;  %v946_v6 = vadd.f32 %v945_v25, %v944_v23  ;;  %s2048_s22 = scalar_lea.vmem [#allocation11], %s1759_s18  ;;  %s1015_s14 = sshrl.u32 (%p1734_p3), %s1720_s12, 3 }
 0x3c1   : > { %s2049_s20 = scalar_lea.vmem (%p1734_p3), [#allocation9], %s1759_s18  ;;  %s1544_s15 = sshll.u32 (%p1734_p3), %s1015_s14, 1 }
 0x3c2   : > { %v928_v7 = vadd.f32 %v927_v26, %v926_v24  ;;  %v947_v27 = vrot.slane %v946_v6, 2  ;;  %s1017_s17 = scalar_lea.vmem (%p1734_p3), %s2034_s4, %s1544_s15 }
 0x3c4   : > { %v929_v28 = vrot.slane %v928_v7, 1  ;;  %v948_v29 = vadd.f32 %v947_v27, %v946_v6 }
 0x3c6   : > { %v930_v30 = vadd.f32 %v929_v28, %v928_v7  ;;  %v949_v31 = vrot.slane %v948_v29, 1 }
 0x3c8   : > { %931 = vst [vmem:[%s913_s25] sm:$0x1] %v930_v30  ;;  %v950_v32 = vadd.f32 %v949_v31, %v948_v29 }
 0x3ca   : > { %951 = vst [vmem:[%s933_s26] sm:$0x1] %v950_v32 }
 0x3cc   : > { %1014 = sbr.rel (!%p1734_p3) target bundleno = 985 (0x3d9), region = 158 }
 0x3cf   : > { %v955_v33 = vld [vmem:[#allocation8] sm:$0x3] }
 0x3d0   : > { %957 = vst [vmem:[%s2047_s11] sm:$0x3] %v955_v33 }
 0x3d1   : > { %v961_v34 = vld [vmem:[#allocation10] sm:$0x3] }
 0x3d2   : > { %963 = vst [vmem:[%s2048_s22] sm:$0x3] %v961_v34 }
 0x3d7   : > { %v1033_v35 = vld [vmem:[%s2049_s20] sm:$0x3] }
 0x3d8   : > { %1034 = vst [vmem:[%s1017_s17] sm:$0x3] %v1033_v35 }
 0x3d9 PF: > { %1051 = sbr.rel (!%p1734_p3) target bundleno = 993 (0x3e1), region = 192  ;;  %s1052_s27 = sshrl.u32 (%p1734_p3), %s1720_s12, 3 }
 0x3da   : > { %s2050_s29 = scalar_lea.vmem (%p1734_p3), [#allocation11], %s1759_s18  ;;  %s1545_s16 = sshll.u32 (%p1734_p3), %s1052_s27, 1 }
 0x3db   : > { %s1054_s25 = scalar_lea.vmem (%p1734_p3), %s2035_s5, %s1545_s16 }
 0x3df   : > { %v1070_v36 = vld [vmem:[%s2050_s29] sm:$0x3] (%p1734_p3) }
 0x3e0   : > { %1071 = vst [vmem:[%s1054_s25] sm:$0x3] %v1070_v36 }
 0x3e1 PF: > { %s1546_s26 = sshll.u32 %s1720_s12, 1  ;;  %s2051_s19 = scalar_lea.vmem [#allocation13], %s1757_s28 }
 0x3e2   : > { %v1103_v37 = vld [vmem:[%s2051_s19] sm:$0x3]  ;;  %s2052_s11 = scalar_lea.vmem [#allocation15], %s1757_s28  ;;  %s1087_s14 = scalar_lea.vmem %s2036_s6, %s1546_s26 }
 0x3e3   : > { %v1136_v38 = vld [vmem:[%s2052_s11] sm:$0x3]  ;;  %s1120_s24 = scalar_lea.vmem %s2037_s7, %s1546_s26  ;;  %s2053_s23 = scalar_lea.vmem [#allocation17], %s1757_s28  ;;  %1104 = vst [vmem:[%s1087_s14] sm:$0x3] %v1103_v37 }
 0x3e4   : > { %v1169_v39 = vld [vmem:[%s2053_s23] sm:$0x3]  ;;  %s2054_s17 = scalar_lea.vmem [#allocation19], %s1757_s28  ;;  %1137 = vst [vmem:[%s1120_s24] sm:$0x3] %v1136_v38  ;;  %s1153_s29 = scalar_lea.vmem %s2038_s8, %s1546_s26 }
 0x3e5   : > { %v1202_v40 = vld [vmem:[%s2054_s17] sm:$0x3]  ;;  %s1186_s21 = scalar_lea.vmem %s2039_s9, %s1546_s26  ;;  %1170 = vst [vmem:[%s1153_s29] sm:$0x3] %v1169_v39 }
 0x3e6   : > { %1203 = vst [vmem:[%s1186_s21] sm:$0x3] %v1202_v40 }
 0x3e7 PF: > { %s2055_s25 = sld [smem:[#allocation33_spill]]  ;;  %p13_p13 = scmp.ge.s32.totalorder %s1723_s13, 4  }
 0x3e8   : > { %s2056_s30 = smov %s1637_s10  ;;  %s2058_s11 = smov %s1723_s13 }
 0x3e9   :  { %15 = sbr.rel (!%p13_p13) target bundleno = 2 (0x2), region = 484 }
 0x3ed   : > { %s2057_s10 = smov %s2055_s25 }

// kernel: vae_forward.1
= control target key start
LH: loop header
LB: loop body
LE: loop exit
PB: predicated region body
PF: predicated region fallthrough
CT: control target
= control target key end

     0   :  { %vm59_vm0 = vcmask 1044480   ;;  %v684_v0 = vmov 0.0   ;;  %vm685_vm1 = vmmov 0   ;;  %vm55_vm2 = vcmask 80896   ;;  %s686_s19 = smov 112   ;;  %s881_s1 = inlined_call_operand.vmem [shape: bf16[10,128], index: 1, kind: input, shape index: {}]   ;;  %s882_s0 = inlined_call_operand.vmem [shape: f32[8,10], index: 0, kind: input, shape index: {}]   ;;  %s883_s3 = inlined_call_operand.vmem [shape: bf16[128,64], index: 3, kind: input, shape index: {}]   ;;  %s884_s5 = inlined_call_operand.vmem [shape: bf16[64,80], index: 5, kind: input, shape index: {}]   ;;  %s885_s2 = inlined_call_operand.vmem [shape: f32[1,128], index: 2, kind: input, shape index: {}]   ;;  %s886_s4 = inlined_call_operand.vmem [shape: f32[1,64], index: 4, kind: input, shape index: {}]   ;;  %s887_s7 = inlined_call_operand.vmem [shape: bf16[64,128], index: 7, kind: input, shape index: {}]   ;;  %s888_s6 = inlined_call_operand.vmem [shape: f32[1,80], index: 6, kind: input, shape index: {}]   ;;  %s889_s9 = inlined_call_operand.vmem [shape: bf16[128,10], index: 9, kind: input, shape index: {}]   ;;  %s890_s8 = inlined_call_operand.vmem [shape: f32[1,128], index: 8, kind: input, shape index: {}]   ;;  %s891_s10 = inlined_call_operand.vmem [shape: f32[1,10], index: 10, kind: input, shape index: {}]   ;;  %s892_s11 = inlined_call_operand.vmem [shape: f32[8,128], index: 11, kind: output, shape index: {}]  }
   0x1   :  { %585 = vmatprep.subr.bf16.mxu0 %v684_v0  ;;  %v659_v1 = vld [vmem:[%s881_s1] sm:$0x1f]   ;;  %587 = vmatprep.mubr.msk.bf16.mxu0 %vm685_vm1, %v684_v0  ;;  %v661_v6 = vld [vmem:[%s883_s3 + $0x8] sm:$0xff]   ;;  %v662_v7 = vld [vmem:[%s883_s3 + $0x10] sm:$0xff]   ;;  %vm261_vm5 = vcmask 523264   ;;  %vm513_vm8 = vcmask 130048  }
   0x2   :  { %v39_v2 = vld [vmem:[%s882_s0] sm:$0xff]  ;;  %591 = vmatprep.subr.bf16.mxu1 %v684_v0  ;;  %607 = vmatprep.mubr.msk.bf16.mxu1 %vm685_vm1, %v684_v0  ;;  %v61_v3 = vsel %vm59_vm0, %v659_v1, 0  ;;  %v663_v8 = vld [vmem:[%s883_s3 + $0x18] sm:$0xff]   ;;  %v665_v10 = vld [vmem:[%s883_s3 + $0x28] sm:$0xff]   ;;  %vm515_vm9 = vcmask 211968  }
   0x3   :  { %v40_v4 = vpack.c.bf16 %v39_v2, %v39_v2  ;;  %v660_v5 = vld [vmem:[%s883_s3] sm:$0xff]   ;;  %586 = vmatpush3.bf16.msra.mxu0 %v61_v3  ;;  %v666_v11 = vld [vmem:[%s883_s3 + $0x30] sm:$0xff]   ;;  %v667_v12 = vld [vmem:[%s883_s3 + $0x38] sm:$0xff]  }
   0x4   :  { %592 = vmatpush3.bf16.msra.mxu1 %v660_v5  ;;  %611 = vmatprep.subr.bf16.mxu0 %v684_v0  ;;  %v664_v9 = vld [vmem:[%s883_s3 + $0x20] sm:$0xff]   ;;  %v669_v14 = vld [vmem:[%s884_s5 + $0x8] sm:$0xff]   ;;  %v670_v24 = vld [vmem:[%s884_s5 + $0x10] sm:$0xff]  }
   0x5   :  { %593 = vmatprep.subr.bf16.mxu1 %v684_v0  ;;  %v668_v13 = vld [vmem:[%s884_s5] sm:$0xff]   ;;  %v671_v25 = vld [vmem:[%s884_s5 + $0x18] sm:$0xff]   ;;  %v673_v36 = vld [vmem:[%s887_s7 + $0x8] sm:$0xff]  }
   0x6   :  { %588 = vmatmul.mubr.msk.bf16.vlgmr.msra.gmra.mrb[0].mxu0 %vm55_vm2, %v40_v4  ;;  %v522_v15 = vld [vmem:[%s885_s2] ss:$0 sm:$0xff]  ;;  %v674_v37 = vld [vmem:[%s887_s7 + $0x10] sm:$0xff]   ;;  %v675_v38 = vld [vmem:[%s887_s7 + $0x18] sm:$0xff]  }
   0x7   :  { %619 = vmatprep.mubr.msk.bf16.mxu0 %vm685_vm1, %v684_v0  ;;  %612 = vmatpush3.bf16.msra.mxu0 %v668_v13  ;;  %v525_v26 = vld [vmem:[%s886_s4] ss:$0 sm:$0xff]  ;;  %v677_v41 = vld [vmem:[%s889_s9 + $0x8] sm:$0xff]   ;;  %v678_v46 = vld [vmem:[%s889_s9 + $0x10] sm:$0xff]  }
   0x8   :  { %594 = vmatpush3.bf16.msra.mxu1 %v661_v6  ;;  %613 = vmatprep.subr.bf16.mxu0 %v684_v0  ;;  %v672_v35 = vld [vmem:[%s887_s7] sm:$0xff]   ;;  %v679_v51 = vld [vmem:[%s889_s9 + $0x18] sm:$0xff]   ;;  %v681_v53 = vld [vmem:[%s889_s9 + $0x28] sm:$0xff]  }
   0x9   :  { %595 = vmatprep.subr.bf16.mxu1 %v684_v0  ;;  %v676_v39 = vld [vmem:[%s889_s9] sm:$0xff]   ;;  %v682_v55 = vld [vmem:[%s889_s9 + $0x30] sm:$0xff]   ;;  %v683_v56 = vld [vmem:[%s889_s9 + $0x38] sm:$0xff]  }
   0xa   :  { %v534_v40 = vld [vmem:[%s888_s6] ss:$0 sm:$0xff] }
   0xb   :  { %614 = vmatpush3.bf16.msra.mxu0 %v669_v14  ;;  %v680_v52 = vld [vmem:[%s889_s9 + $0x20] sm:$0xff]   ;;  %s687_s9 = smov 16  }
   0xc   :  { %596 = vmatpush3.bf16.msra.mxu1 %v662_v7  ;;  %615 = vmatprep.subr.bf16.mxu0 %v684_v0  ;;  %v540_v57 = vld [vmem:[%s890_s8] ss:$0 sm:$0xff] }
   0xd   :  { %597 = vmatprep.subr.bf16.mxu1 %v684_v0 }
   0xf   :  { %616 = vmatpush3.bf16.msra.mxu0 %v670_v24 }
  0x10   :  { %598 = vmatpush3.bf16.msra.mxu1 %v663_v8  ;;  %617 = vmatprep.subr.bf16.mxu0 %v684_v0 }
  0x11   :  { %599 = vmatprep.subr.bf16.mxu1 %v684_v0 }
  0x13   :  { %618 = vmatpush3.bf16.msra.mxu0 %v671_v25 }
  0x14   :  { %600 = vmatpush3.bf16.msra.mxu1 %v664_v9  ;;  %623 = vmatprep.subr.bf16.mxu0 %v684_v0 }
  0x15   :  { %601 = vmatprep.subr.bf16.mxu1 %v684_v0 }
  0x18   :  { %602 = vmatpush3.bf16.msra.mxu1 %v665_v10 }
  0x19   :  { %603 = vmatprep.subr.bf16.mxu1 %v684_v0 }
  0x1c   :  { %604 = vmatpush3.bf16.msra.mxu1 %v666_v11 }
  0x1d   :  { %605 = vmatprep.subr.bf16.mxu1 %v684_v0 }
  0x20   :  { %606 = vmatpush3.bf16.msra.mxu1 %v667_v12 }
  0x21   :  { %635 = vmatprep.subr.bf16.mxu1 %v684_v0 }
  0xd9   :  { %v97_v16 = vpop.f32.mrb[0].mxu0 }
  0xda   :  { %v98_v17 = vadd.f32 %v522_v15, %v97_v16  ;;  %v589_v18 = vpop.f32.mrb[1].mxu0 }
  0xdb   :  { %v100_v19 = vpop.f32.mrb[2].mxu0 }
  0xdc   :  { %vm103_vm3 = vcmp.ge.f32.partialorder %v98_v17, 0.0  ;;  %v104_v20 = vmul.f32 0.2, %v98_v17  ;;  %v590_v21 = vpop.f32.mrb[3].mxu0 }
  0xde   :  { %v105_v22 = vsel %vm103_vm3, %v98_v17, %v104_v20 }
  0xdf   :  { %v106_v23 = vpack.c.bf16 %v105_v22, %v105_v22 }
  0xe1   :  { %608 = vmatmul.mubr.bf16.vlgmr.msra.gmra.mrb[0].mxu1 %v106_v23 }
  0xe2   :  { %651 = vmatprep.mubr.msk.bf16.mxu1 %vm685_vm1, %v684_v0  ;;  %636 = vmatpush3.bf16.msra.mxu1 %v676_v39 }
  0xe3   :  { %637 = vmatprep.subr.bf16.mxu1 %v684_v0 }
  0xe6   :  { %638 = vmatpush3.bf16.msra.mxu1 %v677_v41 }
  0xe7   :  { %639 = vmatprep.subr.bf16.mxu1 %v684_v0 }
  0xea   :  { %640 = vmatpush3.bf16.msra.mxu1 %v678_v46 }
  0xeb   :  { %641 = vmatprep.subr.bf16.mxu1 %v684_v0 }
  0xee   :  { %642 = vmatpush3.bf16.msra.mxu1 %v679_v51 }
  0xef   :  { %643 = vmatprep.subr.bf16.mxu1 %v684_v0 }
  0xf2   :  { %644 = vmatpush3.bf16.msra.mxu1 %v680_v52 }
  0xf3   :  { %645 = vmatprep.subr.bf16.mxu1 %v684_v0 }
  0xf6   :  { %646 = vmatpush3.bf16.msra.mxu1 %v681_v53 }
  0xf7   :  { %647 = vmatprep.subr.bf16.mxu1 %v684_v0 }
  0xfa   :  { %648 = vmatpush3.bf16.msra.mxu1 %v682_v55 }
  0xfb   :  { %649 = vmatprep.subr.bf16.mxu1 %v684_v0 }
  0xfe   :  { %650 = vmatpush3.bf16.msra.mxu1 %v683_v56 }
 0x1b4   :  { %v212_v27 = vpop.f32.mrb[0].mxu1 }
 0x1b5   :  { %v213_v28 = vadd.f32 %v525_v26, %v212_v27  ;;  %v609_v29 = vpop.f32.mrb[1].mxu1 }
 0x1b6   :  { %v215_v30 = vpop.f32.mrb[2].mxu1 }
 0x1b7   :  { %vm218_vm4 = vcmp.ge.f32.partialorder %v213_v28, 0.0  ;;  %v219_v31 = vmul.f32 0.2, %v213_v28  ;;  %v610_v32 = vpop.f32.mrb[3].mxu1 }
 0x1b9   :  { %v220_v33 = vsel %vm218_vm4, %v213_v28, %v219_v31 }
 0x1ba   :  { %v221_v34 = vpack.c.bf16 %v220_v33, %v220_v33 }
 0x1bc   :  { %620 = vmatmul.mubr.msk.bf16.vlgmr.msra.gmra.mrb[4].mxu0 %vm261_vm5, %v221_v34 }
 0x1bd   :  { %631 = vmatprep.mubr.msk.bf16.mxu0 %vm685_vm1, %v684_v0  ;;  %624 = vmatpush3.bf16.msra.mxu0 %v672_v35 }
 0x1be   :  { %625 = vmatprep.subr.bf16.mxu0 %v684_v0 }
 0x1c1   :  { %626 = vmatpush3.bf16.msra.mxu0 %v673_v36 }
 0x1c2   :  { %627 = vmatprep.subr.bf16.mxu0 %v684_v0 }
 0x1c5   :  { %628 = vmatpush3.bf16.msra.mxu0 %v674_v37 }
 0x1c6   :  { %629 = vmatprep.subr.bf16.mxu0 %v684_v0  ;;  %v546_v0 = vld [vmem:[%s891_s10] ss:$0 sm:$0xff] }
 0x1c9   :  { %630 = vmatpush3.bf16.msra.mxu0 %v675_v38 }
 0x28f   :  { %v299_v42 = vpop.f32.mrb[4].mxu0 }
 0x290   :  { %v300_v43 = vadd.f32 %v534_v40, %v299_v42  ;;  %v621_v44 = vpop.f32.mrb[5].mxu0 }
 0x291   :  { %v302_v45 = vpop.f32.mrb[6].mxu0 }
 0x292   :  { %v622_v47 = vpop.f32.mrb[7].mxu0  ;;  %vm305_vm6 = vcmp.ge.f32.partialorder %v300_v43, 0.0  ;;  %v306_v48 = vmul.f32 0.2, %v300_v43 }
 0x294   :  { %v307_v49 = vsel %vm305_vm6, %v300_v43, %v306_v48 }
 0x295   :  { %v308_v50 = vpack.c.bf16 %v307_v49, %v307_v49 }
 0x297   :  { %325 = vrot.lane.b32.xlu0 %v308_v50, %s686_s19 }
 0x309   :  { %v326_v54 = vpop.permute.xlu0 %325 }
 0x30a   :  { %632 = vmatmul.mubr.msk.bf16.vlgmr.msra.gmra.mrb[8].mxu0 %vm261_vm5, %v326_v54 }
 0x3dd   :  { %v388_v58 = vpop.f32.mrb[8].mxu0 }
 0x3de   :  { %v389_v59 = vadd.f32 %v540_v57, %v388_v58  ;;  %v633_v60 = vpop.f32.mrb[9].mxu0 }
 0x3df   :  { %v391_v61 = vpop.f32.mrb[10].mxu0 }
 0x3e0   :  { %vm394_vm7 = vcmp.ge.f32.partialorder %v389_v59, 0.0  ;;  %v395_v62 = vmul.f32 0.2, %v389_v59  ;;  %v634_v63 = vpop.f32.mrb[11].mxu0 }
 0x3e2   :  { %v396_v1 = vsel %vm394_vm7, %v389_v59, %v395_v62 }
 0x3e3   :  { %v397_v2 = vpack.c.bf16 %v396_v1, %v396_v1 }
 0x3e5   :  { %652 = vmatmul.mubr.bf16.vlgmr.msra.gmra.mrb[4].mxu1 %v397_v2 }
 0x4b8   :  { %v503_v3 = vpop.f32.mrb[4].mxu1 }
 0x4b9   :  { %v504_v4 = vadd.f32 %v546_v0, %v503_v3  ;;  %v653_v5 = vpop.f32.mrb[5].mxu1 }
 0x4ba   :  { %v506_v6 = vpop.f32.mrb[6].mxu1 }
 0x4bb   :  { %510 = vrot.lane.b32.xlu0 %v504_v4, %s687_s9  ;;  %v654_v7 = vpop.f32.mrb[7].mxu1 }
 0x52d   :  { %v511_v8 = vpop.permute.xlu0 %510 }
 0x52e   :  { %v514_v9 = vsel %vm513_vm8, %v300_v43, %v511_v8 }
 0x52f   :  { %v516_v10 = vsel %vm515_vm9, %v514_v9, 0.0 }
 0x530   :  { %517 = vst [vmem:[%s892_s11] sm:$0xff] %v516_v10 }

</bundles_post_ra>
